<compile_context>
chip_gen: v7x
topology: tpu7x:2x2x1
jax: 0.10.0
libtpu: 0.0.40
codegen_flags: <defaults>
</compile_context>

<pallas_src>
import functools
import math

import jax
import jax.numpy as jnp
from jax import lax
from jax.experimental import pallas as pl
from jax.experimental.pallas import tpu as pltpu


def _hw_budgets():
    """Generation-aware VMEM limit / batch-tile caps."""
    conservative = {"vmem_limit": 32 * 1024 * 1024, "bb_cap": 8, "min_steps": 2}
    try:
        vmem_phys = int(pltpu.get_tpu_info().vmem_capacity_bytes)
    except Exception:
        return conservative
    if vmem_phys <= 64 * 1024 * 1024:          # v7x-class: 64 MiB / TC, 2 TCs
        return {"vmem_limit": 32 * 1024 * 1024, "bb_cap": 4, "min_steps": 4}
    return {"vmem_limit": 96 * 1024 * 1024, "bb_cap": 16, "min_steps": 2}


def _rep_spec(arr):
    nd = arr.ndim
    return pl.BlockSpec(arr.shape, lambda i, _nd=nd: (0,) * _nd)


def _pick_block_batch(batch, cap, min_steps):
    """Largest divisor of `batch` <= cap, preferring >= min_steps grid steps."""
    divs = [d for d in range(1, batch + 1) if batch % d == 0 and d <= cap]
    for want in (min_steps, 2, 1):
        ok = [d for d in divs if batch // d >= want]
        if ok:
            return max(ok)
    return 1


def _pick_k_chunk(num_nb, block_b, num_points, max_chan, budget_bytes):
    """Largest divisor of K whose per-chunk MLP activations fit the budget."""
    per_k = block_b * num_points * max_chan * 10   # ~ f32 act + bf16 cast + f32 next
    best = 1
    for kc in range(1, num_nb + 1):
        if num_nb % kc == 0 and kc * per_k <= budget_bytes:
            best = kc
    return best


def _pick_row_tile(batch, cap=512):
    if batch <= cap:
        return batch
    for t in range(cap, 7, -1):
        if batch % t == 0 and t % 8 == 0:
            return t
    return batch


# ----------------------------------------------------------------------------
# Fused EdgeConv block kernel:
#   batched KNN -> stacked one-hot gather matmul -> fused first conv / shortcut
#   -> per-k-chunk edge MLP accumulation -> residual ReLU -> mask.
# ----------------------------------------------------------------------------
def _edge_block_kernel(pts_ref, fts_ref, mask_ref, *refs,
                       num_points, num_nb, block_b, num_layers, k_chunk):
    P, K, bB, kc = num_points, num_nb, block_b, k_chunk
    sel_ref = refs[-1]                 # VMEM scratch: (bB, K*P, P) bf16
    out_ref = refs[-2]
    w_pre_ref, s1_ref, b1_ref = refs[0], refs[1], refs[2]
    layer_refs = refs[3:3 + 3 * (num_layers - 1)]
    ssc_ref = refs[3 + 3 * (num_layers - 1)]
    bsc_ref = refs[4 + 3 * (num_layers - 1)]

    C1 = s1_ref.shape[-1]
    Cout = ssc_ref.shape[-1]
    cin = fts_ref.shape[-1]

    NEG_MASK = jnp.float32(-1e30)      # padded-particle columns: only picked when forced
    NEG_SEL = jnp.float32(-3e30)       # self / already-selected columns: picked last

    mask = mask_ref[...]                                      # (bB, P, 1) f32
    pts = pts_ref[...].astype(jnp.float32)                    # f32 only for KNN scores
    fts_b = fts_ref[...].astype(jnp.bfloat16)                 # (bB, P, Cin) bf16

    # ---- batched KNN scores: per-row ordering of -||xi - xj||^2 (row-constant
    #      -||xi||^2 dropped; it cannot change the per-row top-K). ------------
    inner = jnp.einsum('bpc,bqc->bpq', pts, pts,
                       preferred_element_type=jnp.float32)            # (bB, P, P)
    sq = jnp.sum(pts * pts, axis=-1, keepdims=True)                   # (bB, P, 1)
    score = 2.0 * inner - jnp.swapaxes(sq, 1, 2)
    col = lax.broadcasted_iota(jnp.int32, (bB, P, P), 2)
    row = lax.broadcasted_iota(jnp.int32, (bB, P, P), 1)
    score = jnp.where(jnp.swapaxes(mask, 1, 2) > 0.0, score, NEG_MASK)
    score = jnp.where(col == row, NEG_SEL, score)                     # drop self match

    # ---- iterative top-K: stack K one-hot gather matrices in VMEM ----------
    for k in range(K):
        maxv = jnp.max(score, axis=-1, keepdims=True)                          # (bB, P, 1)
        am = jnp.min(jnp.where(score == maxv, col, P), axis=-1, keepdims=True)  # first argmax
        sel_ref[:, k * P:(k + 1) * P, :] = (col == am).astype(jnp.bfloat16)
        score = jnp.where(col == am, NEG_SEL, score)

    # ---- fused projection: fts @ [w1a - w1b | w1b | wsc] (shared LHS) -------
    x = fts_b.reshape(bB * P, cin)
    proj = jnp.dot(x, w_pre_ref[...], preferred_element_type=jnp.float32)
    h_base = proj[:, :C1].reshape(bB, 1, P, C1)             # fts @ (w1a - w1b)
    p_nbr = proj[:, C1:2 * C1].astype(jnp.bfloat16).reshape(bB, P, C1)
    sc = proj[:, 2 * C1:] * ssc_ref[...] + bsc_ref[...]     # shortcut conv + BN

    # ---- ONE gather matmul per item: (K*P, P) x (P, C1) ---------------------
    g = jnp.einsum('bsp,bpc->bsc', sel_ref[...], p_nbr,
                   preferred_element_type=jnp.float32)                # (bB, K*P, C1)

    # first edge conv: relu(((nb - ctr) @ w1b + ctr @ w1a) * s1 + b1)
    h1 = g.reshape(bB, K, P, C1) + h_base                             # broadcast over K
    h1 = jnp.maximum(h1 * s1_ref[...] + b1_ref[...], 0.0)             # (bB, K, P, C1)

    # ---- remaining MLP layers, per-k-chunk accumulation (VMEM bounded) ------
    acc = None
    for ci in range(K // kc):
        h = h1[:, ci * kc:(ci + 1) * kc].reshape(bB * kc * P, C1)
        for li in range(num_layers - 1):
            w = layer_refs[3 * li]
            s = layer_refs[3 * li + 1]
            b = layer_refs[3 * li + 2]
            h = jnp.dot(h.astype(jnp.bfloat16), w[...],
                        preferred_element_type=jnp.float32)
            h = jnp.maximum(h * s[...] + b[...], 0.0)
        part = jnp.sum(h.reshape(bB, kc, P, Cout), axis=1)            # sum over k in chunk
        acc = part if acc is None else acc + part

    agg = acc.reshape(bB * P, Cout) * jnp.float32(1.0 / K)            # mean over K
    out = jnp.maximum(agg + sc, 0.0) * mask.reshape(bB * P, 1)
    out_ref[...] = out.reshape(bB, P, Cout).astype(out_ref.dtype)


def edge_conv_block_pallas(pts_cl, fts_cl, mask_cl, blk, num_nb, block_b,
                           k_chunk, vmem_limit):
    B, P, cp = pts_cl.shape
    if num_nb >= P:
        raise ValueError("num_nb must be < num_points (torch.topk(k+1) constraint)")
    if B % block_b != 0:
        raise ValueError("block_batch must divide the batch size")
    cin = fts_cl.shape[-1]
    num_layers = (len(blk) - 5) // 3 + 1
    cout = blk[-2].shape[-1]
    bB = block_b
    kern = functools.partial(_edge_block_kernel, num_points=P, num_nb=num_nb,
                             block_b=bB, num_layers=num_layers, k_chunk=k_chunk)
    in_specs = [
        pl.BlockSpec((bB, P, cp), lambda i: (i, 0, 0)),
        pl.BlockSpec((bB, P, cin), lambda i: (i, 0, 0)),
        pl.BlockSpec((bB, P, 1), lambda i: (i, 0, 0)),
    ] + [_rep_spec(a) for a in blk]
    return pl.pallas_call(
        kern,
        out_shape=jax.ShapeDtypeStruct((B, P, cout), jnp.bfloat16),
        grid=(B // bB,),
        in_specs=in_specs,
        out_specs=pl.BlockSpec((bB, P, cout), lambda i: (i, 0, 0)),
        scratch_shapes=[pltpu.VMEM((bB, num_nb * P, P), jnp.bfloat16)],
        compiler_params=pltpu.CompilerParams(
            dimension_semantics=("parallel",),
            vmem_limit_bytes=vmem_limit),
    )(pts_cl, fts_cl, mask_cl, *blk)


# ----------------------------------------------------------------------------
# Head kernel 1: fusion 1x1 conv on the (un-concatenated) per-block outputs,
# BN + ReLU + mask, count-normalised pooling.
# ----------------------------------------------------------------------------
def _fuse_pool_kernel(*refs, num_blocks):
    out_ref = refs[-1]
    mask_ref = refs[num_blocks]
    sf_ref = refs[2 * num_blocks + 1]
    bf_ref = refs[2 * num_blocks + 2]
    bB, P, _ = refs[0].shape

    h = None
    for i in range(num_blocks):        # split fusion conv: sum of partial matmuls
        x = refs[i][...].reshape(bB * P, refs[i].shape[-1]).astype(jnp.bfloat16)
        part = jnp.dot(x, refs[num_blocks + 1 + i][...],
                       preferred_element_type=jnp.float32)
        h = part if h is None else h + part
    h = jnp.maximum(h * sf_ref[...] + bf_ref[...], 0.0)               # (bB*P, Cf)

    m = mask_ref[...]                                                  # (bB, P, 1)
    pooled = jnp.sum(h.reshape(bB, P, -1) * m, axis=1)                 # (bB, Cf)
    cnt = jnp.maximum(jnp.sum(m, axis=1), 1.0)                         # (bB, 1)
    out_ref[...] = (pooled / cnt).reshape(1, bB, -1)


def fuse_pool_pallas(fts_list, mask_cl, fusion, block_b, vmem_limit):
    wf_parts, sf, bf = fusion
    num_blocks = len(fts_list)
    B, P, _ = fts_list[0].shape
    cf = sf.shape[-1]
    bB = block_b
    nblk = B // bB
    kern = functools.partial(_fuse_pool_kernel, num_blocks=num_blocks)
    in_specs = ([pl.BlockSpec((bB, P, f.shape[-1]), lambda i: (i, 0, 0))
                 for f in fts_list]
                + [pl.BlockSpec((bB, P, 1), lambda i: (i, 0, 0))]
                + [_rep_spec(w) for w in wf_parts]
                + [_rep_spec(sf), _rep_spec(bf)])
    out = pl.pallas_call(
        kern,
        out_shape=jax.ShapeDtypeStruct((nblk, bB, cf), jnp.float32),
        grid=(nblk,),
        in_specs=in_specs,
        out_specs=pl.BlockSpec((1, bB, cf), lambda i: (i, 0, 0)),
        compiler_params=pltpu.CompilerParams(
            dimension_semantics=("parallel",),
            vmem_limit_bytes=vmem_limit),
    )(*fts_list, mask_cl, *wf_parts, sf, bf)
    return out.reshape(B, cf)


# ----------------------------------------------------------------------------
# Head kernel 2: row-tiled FC stack (Linear -> ReLU -> [Dropout=id]) ... -> Linear.
# ----------------------------------------------------------------------------
def _fc_kernel(x_ref, *refs, num_hidden):
    out_ref = refs[-1]
    h = x_ref[...]
    for li in range(num_hidden):
        w, b = refs[2 * li], refs[2 * li + 1]
        h = jnp.dot(h.astype(jnp.bfloat16), w[...],
                    preferred_element_type=jnp.float32) + b[...]
        h = jnp.maximum(h, 0.0)        # Dropout: eval-mode identity
    w, b = refs[2 * num_hidden], refs[2 * num_hidden + 1]
    out_ref[...] = jnp.dot(h.astype(jnp.bfloat16), w[...],
                           preferred_element_type=jnp.float32) + b[...]


def fc_pallas(pooled, fc, num_classes, vmem_limit):
    B, cf = pooled.shape
    num_hidden = (len(fc) - 2) // 2
    tile = _pick_row_tile(B)
    kern = functools.partial(_fc_kernel, num_hidden=num_hidden)
    return pl.pallas_call(
        kern,
        out_shape=jax.ShapeDtypeStruct((B, num_classes), jnp.float32),
        grid=(B // tile,),
        in_specs=[pl.BlockSpec((tile, cf), lambda i: (i, 0))]
                 + [_rep_spec(a) for a in fc],
        out_specs=pl.BlockSpec((tile, num_classes), lambda i: (i, 0)),
        compiler_params=pltpu.CompilerParams(
            dimension_semantics=("parallel",),
            vmem_limit_bytes=vmem_limit),
    )(pooled, *fc)


# ----------------------------------------------------------------------------
# Parameter init (deterministic, synthetic) + forward glue
# ----------------------------------------------------------------------------
def init_params(key, input_dims, num_classes, conv_params, fc_params):
    keys = iter(jax.random.split(key, 256))

    def nrm(shape, scale):
        return scale * jax.random.normal(next(keys), shape, jnp.float32)

    def bn_fold(c):
        gamma = 1.0 + 0.1 * jax.random.normal(next(keys), (c,), jnp.float32)
        beta = 0.1 * jax.random.normal(next(keys), (c,), jnp.float32)
        mean = 0.1 * jax.random.normal(next(keys), (c,), jnp.float32)
        var = 1.0 + 0.05 * jnp.abs(jax.random.normal(next(keys), (c,), jnp.float32))
        scale = gamma / jnp.sqrt(var + 1e-5)
        shift = beta - mean * scale
        return scale.astype(jnp.float32), shift.astype(jnp.float32)

    params = {'bn_fts': bn_fold(input_dims)}

    edge_blocks = []
    in_feat = input_dims
    for _, channels in conv_params:
        c1, cout = channels[0], channels[-1]
        c_first = 2 * in_feat
        # first conv acts on [center, nb - center]: split weight halves
        w1a = nrm((in_feat, c1), 1.0 / math.sqrt(c_first))
        w1b = nrm((in_feat, c1), 1.0 / math.sqrt(c_first))
        s1, b1 = bn_fold(c1)
        if in_feat == cout:
            wsc = jnp.eye(in_feat, dtype=jnp.float32)      # identity shortcut
            ssc = jnp.ones((cout,), jnp.float32)
            bsc = jnp.zeros((cout,), jnp.float32)
        else:
            wsc = nrm((in_feat, cout), 1.0 / math.sqrt(in_feat))
            ssc, bsc = bn_fold(cout)
        # fused projection weight [w1a - w1b | w1b | wsc] (all share the same LHS)
        w_pre = jnp.concatenate([w1a - w1b, w1b, wsc], axis=1).astype(jnp.bfloat16)
        blk = [w_pre, s1[None, :], b1[None, :]]
        c_prev = c1
        for c in channels[1:]:
            w = nrm((c_prev, c), 1.0 / math.sqrt(c_prev)).astype(jnp.bfloat16)
            s, b = bn_fold(c)
            blk += [w, s[None, :], b[None, :]]
            c_prev = c
        blk += [ssc[None, :], bsc[None, :]]
        edge_blocks.append(tuple(blk))
        in_feat = cout
    params['edge_convs'] = edge_blocks

    in_chn = sum(c[-1] for _, c in conv_params)
    out_chn = max(min((in_chn // 128) * 128, 1024), 128)
    wf = nrm((in_chn, out_chn), 1.0 / math.sqrt(in_chn)).astype(jnp.bfloat16)
    # split the fusion conv weight row-wise per EdgeConv block so the XLA-level
    # concatenate of block outputs is never materialised.
    wf_parts, off = [], 0
    for _, c in conv_params:
        wf_parts.append(wf[off:off + c[-1], :])
        off += c[-1]
    sf, bf = bn_fold(out_chn)
    params['fusion'] = (tuple(wf_parts), sf[None, :], bf[None, :])

    fc_list = []
    in_chn_fc = out_chn
    for channels_fc, _drop in fc_params:
        w = nrm((in_chn_fc, channels_fc), 1.0 / math.sqrt(in_chn_fc)).astype(jnp.bfloat16)
        b = nrm((1, channels_fc), 0.01)
        fc_list += [w, b]
        in_chn_fc = channels_fc
    w_out = nrm((in_chn_fc, num_classes), 1.0 / math.sqrt(in_chn_fc)).astype(jnp.bfloat16)
    b_out = nrm((1, num_classes), 0.01)
    fc_list += [w_out, b_out]
    params['fc'] = tuple(fc_list)
    return params


def particle_net_forward(points, features, params, conv_params, num_classes,
                         block_batch=None):
    # points: (B, Cp, P), features: (B, Cfeat, P)  -- PyTorch NCW layout
    B, _, P = points.shape
    budgets = _hw_budgets()
    vmem_limit = budgets["vmem_limit"]

    mask_cf = (jnp.sum(jnp.abs(features), axis=1, keepdims=True) != 0).astype(jnp.float32)
    points = points * mask_cf
    features = features * mask_cf

    # channels-last layouts (channel dim on the 128-wide lane axis)
    pts_cl = jnp.transpose(points, (0, 2, 1))        # (B, P, Cp) f32
    fts_cl = jnp.transpose(features, (0, 2, 1))      # (B, P, Cfeat)
    mask_cl = jnp.transpose(mask_cf, (0, 2, 1))      # (B, P, 1)

    # bn_fts (eval-mode, folded) * mask; block inputs carried in bf16
    s, b = params['bn_fts']
    fts_cl = ((fts_cl * s[None, None, :] + b[None, None, :]) * mask_cl).astype(jnp.bfloat16)

    bB = (_pick_block_batch(B, budgets["bb_cap"], budgets["min_steps"])
          if block_batch is None else block_batch)

    outputs = []
    cur_pts = pts_cl
    for (num_nb, channels), blk in zip(conv_params, params['edge_convs']):
        k_chunk = _pick_k_chunk(num_nb, bB, P, max(channels), vmem_limit // 4)
        fts_cl = edge_conv_block_pallas(cur_pts, fts_cl, mask_cl, blk, num_nb,
                                        bB, k_chunk, vmem_limit)
        outputs.append(fts_cl)
        cur_pts = fts_cl            # next block builds KNN on current features (bf16)

    pooled = fuse_pool_pallas(outputs, mask_cl, params['fusion'], bB, vmem_limit)
    return fc_pallas(pooled, params['fc'], num_classes, vmem_limit)


if __name__ == "__main__":
    B, P = 2, 16
    Cp, Cf = 2, 4            # 2 coordinate dims, 4 input feature dims
    num_classes = 5
    conv_params = [(7, (32, 32, 32)), (7, (64, 64, 64))]
    fc_params = [(128, 0.1)]

    key = jax.random.PRNGKey(0)
    kp, kf, kw = jax.random.split(key, 3)
    points = jax.random.normal(kp, (B, Cp, P), jnp.float32)
    features = jax.random.normal(kf, (B, Cf, P), jnp.float32)
    # mark two padded particles in batch item 1 (exercises mask handling)
    features = features.at[1, :, -2:].set(0.0)

    params = init_params(kw, Cf, num_classes, conv_params, fc_params)

    fwd = jax.jit(functools.partial(particle_net_forward,
                                    conv_params=conv_params,
                                    num_classes=num_classes))
    out = fwd(points, features, params)
    out = jax.block_until_ready(out)

    assert out.shape == (B, num_classes), out.shape
    assert bool(jnp.all(jnp.isfinite(out)))
    print("KERNEL_OK")
</pallas_src>

<mosaic_0001>
module attributes {stable_mosaic.version = 11 : i64} {
  func.func @_fuse_pool_kernel(%arg0: i32, %arg1: memref<1x16x32xbf16, #tpu.memory_space<vmem>>, %arg2: memref<1x16x64xbf16, #tpu.memory_space<vmem>>, %arg3: memref<1x16x1xf32, #tpu.memory_space<vmem>>, %arg4: memref<32x128xbf16, #tpu.memory_space<vmem>>, %arg5: memref<64x128xbf16, #tpu.memory_space<vmem>>, %arg6: memref<1x128xf32, #tpu.memory_space<vmem>>, %arg7: memref<1x128xf32, #tpu.memory_space<vmem>>, %arg8: memref<1x1x128xf32, #tpu.memory_space<vmem>>) attributes {dimension_semantics = [#tpu.dimension_semantics<parallel>], iteration_bounds = array<i64: 2>, scalar_prefetch = 0 : i64, scratch_operands = 0 : i64, tpu.core_type = #tpu.core_type<tc>, window_params = [{transform_indices = @transform_0, window_bounds = array<i64: 1, 16, 32>}, {transform_indices = @transform_1, window_bounds = array<i64: 1, 16, 64>}, {transform_indices = @transform_2, window_bounds = array<i64: 1, 16, 1>}, {pipeline_mode = #tpu.pipeline_mode<synchronous>, transform_indices = @transform_3, window_bounds = array<i64: 32, 128>}, {pipeline_mode = #tpu.pipeline_mode<synchronous>, transform_indices = @transform_4, window_bounds = array<i64: 64, 128>}, {pipeline_mode = #tpu.pipeline_mode<synchronous>, transform_indices = @transform_5, window_bounds = array<i64: 1, 128>}, {pipeline_mode = #tpu.pipeline_mode<synchronous>, transform_indices = @transform_6, window_bounds = array<i64: 1, 128>}, {transform_indices = @transform_7, window_bounds = array<i64: 1, 1, 128>}]} {
    %c0 = arith.constant 0 : index
    %c0_0 = arith.constant 0 : index
    %c0_1 = arith.constant 0 : index
    %0 = vector.load %arg1[%c0, %c0_0, %c0_1] : memref<1x16x32xbf16, #tpu.memory_space<vmem>>, vector<1x16x32xbf16>
    %1 = vector.shape_cast %0 : vector<1x16x32xbf16> to vector<16x32xbf16>
    %c0_2 = arith.constant 0 : index
    %c0_3 = arith.constant 0 : index
    %2 = vector.load %arg4[%c0_2, %c0_3] : memref<32x128xbf16, #tpu.memory_space<vmem>>, vector<32x128xbf16>
    %cst = arith.constant dense<0.000000e+00> : vector<16x128xf32>
    %3 = tpu.matmul %1, %2, %cst {dimension_numbers = #tpu.dot_dimension_numbers<[1], [0], [0], [1], [0, 0, 1, 1], [], []>} : vector<16x32xbf16>, vector<32x128xbf16>, vector<16x128xf32> -> vector<16x128xf32>
    %c0_4 = arith.constant 0 : index
    %c0_5 = arith.constant 0 : index
    %c0_6 = arith.constant 0 : index
    %4 = vector.load %arg2[%c0_4, %c0_5, %c0_6] : memref<1x16x64xbf16, #tpu.memory_space<vmem>>, vector<1x16x64xbf16>
    %5 = vector.shape_cast %4 : vector<1x16x64xbf16> to vector<16x64xbf16>
    %c0_7 = arith.constant 0 : index
    %c0_8 = arith.constant 0 : index
    %6 = vector.load %arg5[%c0_7, %c0_8] : memref<64x128xbf16, #tpu.memory_space<vmem>>, vector<64x128xbf16>
    %cst_9 = arith.constant dense<0.000000e+00> : vector<16x128xf32>
    %7 = tpu.matmul %5, %6, %cst_9 {dimension_numbers = #tpu.dot_dimension_numbers<[1], [0], [0], [1], [0, 0, 1, 1], [], []>} : vector<16x64xbf16>, vector<64x128xbf16>, vector<16x128xf32> -> vector<16x128xf32>
    %8 = arith.addf %3, %7 : vector<16x128xf32>
    %c0_10 = arith.constant 0 : index
    %c0_11 = arith.constant 0 : index
    %9 = vector.load %arg6[%c0_10, %c0_11] : memref<1x128xf32, #tpu.memory_space<vmem>>, vector<1x128xf32>
    %10 = vector.broadcast %9 : vector<1x128xf32> to vector<16x128xf32>
    %11 = arith.mulf %8, %10 : vector<16x128xf32>
    %c0_12 = arith.constant 0 : index
    %c0_13 = arith.constant 0 : index
    %12 = vector.load %arg7[%c0_12, %c0_13] : memref<1x128xf32, #tpu.memory_space<vmem>>, vector<1x128xf32>
    %13 = vector.broadcast %12 : vector<1x128xf32> to vector<16x128xf32>
    %14 = arith.addf %11, %13 : vector<16x128xf32>
    %cst_14 = arith.constant 0.000000e+00 : f32
    %15 = vector.broadcast %cst_14 : f32 to vector<16x128xf32>
    %16 = arith.maximumf %14, %15 : vector<16x128xf32>
    %c0_15 = arith.constant 0 : index
    %c0_16 = arith.constant 0 : index
    %c0_17 = arith.constant 0 : index
    %17 = vector.load %arg3[%c0_15, %c0_16, %c0_17] : memref<1x16x1xf32, #tpu.memory_space<vmem>>, vector<1x16x1xf32>
    %18 = vector.shape_cast %16 : vector<16x128xf32> to vector<1x16x128xf32>
    %19 = vector.broadcast %17 : vector<1x16x1xf32> to vector<1x16x128xf32>
    %20 = arith.mulf %18, %19 : vector<1x16x128xf32>
    %cst_18 = arith.constant dense<0.000000e+00> : vector<1x128xf32>
    %21 = vector.multi_reduction <add>, %20, %cst_18 [1] : vector<1x16x128xf32> to vector<1x128xf32>
    %cst_19 = arith.constant dense<0.000000e+00> : vector<1x1xf32>
    %22 = vector.multi_reduction <add>, %17, %cst_19 [1] : vector<1x16x1xf32> to vector<1x1xf32>
    %cst_20 = arith.constant 1.000000e+00 : f32
    %23 = vector.broadcast %cst_20 : f32 to vector<1x1xf32>
    %24 = arith.maximumf %22, %23 : vector<1x1xf32>
    %25 = vector.broadcast %24 : vector<1x1xf32> to vector<1x128xf32>
    %26 = arith.divf %21, %25 : vector<1x128xf32>
    %27 = vector.shape_cast %26 : vector<1x128xf32> to vector<1x1x128xf32>
    %c0_21 = arith.constant 0 : index
    %c0_22 = arith.constant 0 : index
    %c0_23 = arith.constant 0 : index
    %28 = vector.load %arg8[%c0_21, %c0_22, %c0_23] : memref<1x1x128xf32, #tpu.memory_space<vmem>>, vector<1x1x128xf32>
    tpu.vector_store %arg8[%c0_21, %c0_22, %c0_23], %27 {strides = array<i32>} : memref<1x1x128xf32, #tpu.memory_space<vmem>>, vector<1x1x128xf32>,
    return
  }
  func.func @transform_0(%arg0: i32) -> (i32, i32, i32) {
    %c0_i32 = arith.constant 0 : i32
    %c0_i32_0 = arith.constant 0 : i32
    %c0_i32_1 = arith.constant 0 : i32
    return %arg0, %c0_i32, %c0_i32_0 : i32, i32, i32
  }
  func.func @transform_1(%arg0: i32) -> (i32, i32, i32) {
    %c0_i32 = arith.constant 0 : i32
    %c0_i32_0 = arith.constant 0 : i32
    %c0_i32_1 = arith.constant 0 : i32
    return %arg0, %c0_i32, %c0_i32_0 : i32, i32, i32
  }
  func.func @transform_2(%arg0: i32) -> (i32, i32, i32) {
    %c0_i32 = arith.constant 0 : i32
    %c0_i32_0 = arith.constant 0 : i32
    %c0_i32_1 = arith.constant 0 : i32
    return %arg0, %c0_i32, %c0_i32_0 : i32, i32, i32
  }
  func.func @transform_3(%arg0: i32) -> (i32, i32) {
    %c0_i32 = arith.constant 0 : i32
    %c0_i32_0 = arith.constant 0 : i32
    %c0_i32_1 = arith.constant 0 : i32
    return %c0_i32, %c0_i32_0 : i32, i32
  }
  func.func @transform_4(%arg0: i32) -> (i32, i32) {
    %c0_i32 = arith.constant 0 : i32
    %c0_i32_0 = arith.constant 0 : i32
    %c0_i32_1 = arith.constant 0 : i32
    return %c0_i32, %c0_i32_0 : i32, i32
  }
  func.func @transform_5(%arg0: i32) -> (i32, i32) {
    %c0_i32 = arith.constant 0 : i32
    %c0_i32_0 = arith.constant 0 : i32
    %c0_i32_1 = arith.constant 0 : i32
    return %c0_i32, %c0_i32_0 : i32, i32
  }
  func.func @transform_6(%arg0: i32) -> (i32, i32) {
    %c0_i32 = arith.constant 0 : i32
    %c0_i32_0 = arith.constant 0 : i32
    %c0_i32_1 = arith.constant 0 : i32
    return %c0_i32, %c0_i32_0 : i32, i32
  }
  func.func @transform_7(%arg0: i32) -> (i32, i32, i32) {
    %c0_i32 = arith.constant 0 : i32
    %c0_i32_0 = arith.constant 0 : i32
    %c0_i32_1 = arith.constant 0 : i32
    return %arg0, %c0_i32, %c0_i32_0 : i32, i32, i32
  }
}

module attributes {stable_mosaic.version = 11 : i64} {
  func.func @_fc_kernel(%arg0: i32, %arg1: memref<2x128xf32, #tpu.memory_space<vmem>>, %arg2: memref<128x128xbf16, #tpu.memory_space<vmem>>, %arg3: memref<1x128xf32, #tpu.memory_space<vmem>>, %arg4: memref<128x5xbf16, #tpu.memory_space<vmem>>, %arg5: memref<1x5xf32, #tpu.memory_space<vmem>>, %arg6: memref<2x5xf32, #tpu.memory_space<vmem>>) attributes {dimension_semantics = [#tpu.dimension_semantics<parallel>], iteration_bounds = array<i64: 1>, scalar_prefetch = 0 : i64, scratch_operands = 0 : i64, tpu.core_type = #tpu.core_type<tc>, window_params = [{transform_indices = @transform_0, window_bounds = array<i64: 2, 128>}, {pipeline_mode = #tpu.pipeline_mode<synchronous>, transform_indices = @transform_1, window_bounds = array<i64: 128, 128>}, {pipeline_mode = #tpu.pipeline_mode<synchronous>, transform_indices = @transform_2, window_bounds = array<i64: 1, 128>}, {pipeline_mode = #tpu.pipeline_mode<synchronous>, transform_indices = @transform_3, window_bounds = array<i64: 128, 5>}, {pipeline_mode = #tpu.pipeline_mode<synchronous>, transform_indices = @transform_4, window_bounds = array<i64: 1, 5>}, {transform_indices = @transform_5, window_bounds = array<i64: 2, 5>}]} {
    %c0 = arith.constant 0 : index
    %c0_0 = arith.constant 0 : index
    %0 = vector.load %arg1[%c0, %c0_0] : memref<2x128xf32, #tpu.memory_space<vmem>>, vector<2x128xf32>
    %1 = arith.truncf %0 : vector<2x128xf32> to vector<2x128xbf16>
    %c0_1 = arith.constant 0 : index
    %c0_2 = arith.constant 0 : index
    %2 = vector.load %arg2[%c0_1, %c0_2] : memref<128x128xbf16, #tpu.memory_space<vmem>>, vector<128x128xbf16>
    %cst = arith.constant dense<0.000000e+00> : vector<2x128xf32>
    %3 = tpu.matmul %1, %2, %cst {dimension_numbers = #tpu.dot_dimension_numbers<[1], [0], [0], [1], [0, 0, 1, 1], [], []>} : vector<2x128xbf16>, vector<128x128xbf16>, vector<2x128xf32> -> vector<2x128xf32>
    %c0_3 = arith.constant 0 : index
    %c0_4 = arith.constant 0 : index
    %4 = vector.load %arg3[%c0_3, %c0_4] : memref<1x128xf32, #tpu.memory_space<vmem>>, vector<1x128xf32>
    %5 = vector.broadcast %4 : vector<1x128xf32> to vector<2x128xf32>
    %6 = arith.addf %3, %5 : vector<2x128xf32>
    %cst_5 = arith.constant 0.000000e+00 : f32
    %7 = vector.broadcast %cst_5 : f32 to vector<2x128xf32>
    %8 = arith.maximumf %6, %7 : vector<2x128xf32>
    %9 = arith.truncf %8 : vector<2x128xf32> to vector<2x128xbf16>
    %c0_6 = arith.constant 0 : index
    %c0_7 = arith.constant 0 : index
    %10 = vector.load %arg4[%c0_6, %c0_7] : memref<128x5xbf16, #tpu.memory_space<vmem>>, vector<128x5xbf16>
    %cst_8 = arith.constant dense<0.000000e+00> : vector<2x5xf32>
    %11 = tpu.matmul %9, %10, %cst_8 {dimension_numbers = #tpu.dot_dimension_numbers<[1], [0], [0], [1], [0, 0, 1, 1], [], []>} : vector<2x128xbf16>, vector<128x5xbf16>, vector<2x5xf32> -> vector<2x5xf32>
    %c0_9 = arith.constant 0 : index
    %c0_10 = arith.constant 0 : index
    %12 = vector.load %arg5[%c0_9, %c0_10] : memref<1x5xf32, #tpu.memory_space<vmem>>, vector<1x5xf32>
    %13 = vector.broadcast %12 : vector<1x5xf32> to vector<2x5xf32>
    %14 = arith.addf %11, %13 : vector<2x5xf32>
    %c0_11 = arith.constant 0 : index
    %c0_12 = arith.constant 0 : index
    %15 = vector.load %arg6[%c0_11, %c0_12] : memref<2x5xf32, #tpu.memory_space<vmem>>, vector<2x5xf32>
    tpu.vector_store %arg6[%c0_11, %c0_12], %14 {strides = array<i32>} : memref<2x5xf32, #tpu.memory_space<vmem>>, vector<2x5xf32>,
    return
  }
  func.func @transform_0(%arg0: i32) -> (i32, i32) {
    %c0_i32 = arith.constant 0 : i32
    %c0_i32_0 = arith.constant 0 : i32
    return %arg0, %c0_i32 : i32, i32
  }
  func.func @transform_1(%arg0: i32) -> (i32, i32) {
    %c0_i32 = arith.constant 0 : i32
    %c0_i32_0 = arith.constant 0 : i32
    %c0_i32_1 = arith.constant 0 : i32
    return %c0_i32, %c0_i32_0 : i32, i32
  }
  func.func @transform_2(%arg0: i32) -> (i32, i32) {
    %c0_i32 = arith.constant 0 : i32
    %c0_i32_0 = arith.constant 0 : i32
    %c0_i32_1 = arith.constant 0 : i32
    return %c0_i32, %c0_i32_0 : i32, i32
  }
  func.func @transform_3(%arg0: i32) -> (i32, i32) {
    %c0_i32 = arith.constant 0 : i32
    %c0_i32_0 = arith.constant 0 : i32
    %c0_i32_1 = arith.constant 0 : i32
    return %c0_i32, %c0_i32_0 : i32, i32
  }
  func.func @transform_4(%arg0: i32) -> (i32, i32) {
    %c0_i32 = arith.constant 0 : i32
    %c0_i32_0 = arith.constant 0 : i32
    %c0_i32_1 = arith.constant 0 : i32
    return %c0_i32, %c0_i32_0 : i32, i32
  }
  func.func @transform_5(%arg0: i32) -> (i32, i32) {
    %c0_i32 = arith.constant 0 : i32
    %c0_i32_0 = arith.constant 0 : i32
    return %arg0, %c0_i32 : i32, i32
  }
}

module attributes {stable_mosaic.version = 11 : i64} {
  func.func @_edge_block_kernel(%arg0: i32, %arg1: memref<1x16x32xbf16, #tpu.memory_space<vmem>>, %arg2: memref<1x16x32xbf16, #tpu.memory_space<vmem>>, %arg3: memref<1x16x1xf32, #tpu.memory_space<vmem>>, %arg4: memref<32x192xbf16, #tpu.memory_space<vmem>>, %arg5: memref<1x64xf32, #tpu.memory_space<vmem>>, %arg6: memref<1x64xf32, #tpu.memory_space<vmem>>, %arg7: memref<64x64xbf16, #tpu.memory_space<vmem>>, %arg8: memref<1x64xf32, #tpu.memory_space<vmem>>, %arg9: memref<1x64xf32, #tpu.memory_space<vmem>>, %arg10: memref<64x64xbf16, #tpu.memory_space<vmem>>, %arg11: memref<1x64xf32, #tpu.memory_space<vmem>>, %arg12: memref<1x64xf32, #tpu.memory_space<vmem>>, %arg13: memref<1x64xf32, #tpu.memory_space<vmem>>, %arg14: memref<1x64xf32, #tpu.memory_space<vmem>>, %arg15: memref<1x16x64xbf16, #tpu.memory_space<vmem>>, %arg16: memref<1x112x16xbf16, #tpu.memory_space<vmem>>) attributes {dimension_semantics = [#tpu.dimension_semantics<parallel>], iteration_bounds = array<i64: 2>, scalar_prefetch = 0 : i64, scratch_operands = 1 : i64, tpu.core_type = #tpu.core_type<tc>, window_params = [{transform_indices = @transform_0, window_bounds = array<i64: 1, 16, 32>}, {transform_indices = @transform_1, window_bounds = array<i64: 1, 16, 32>}, {transform_indices = @transform_2, window_bounds = array<i64: 1, 16, 1>}, {pipeline_mode = #tpu.pipeline_mode<synchronous>, transform_indices = @transform_3, window_bounds = array<i64: 32, 192>}, {pipeline_mode = #tpu.pipeline_mode<synchronous>, transform_indices = @transform_4, window_bounds = array<i64: 1, 64>}, {pipeline_mode = #tpu.pipeline_mode<synchronous>, transform_indices = @transform_5, window_bounds = array<i64: 1, 64>}, {pipeline_mode = #tpu.pipeline_mode<synchronous>, transform_indices = @transform_6, window_bounds = array<i64: 64, 64>}, {pipeline_mode = #tpu.pipeline_mode<synchronous>, transform_indices = @transform_7, window_bounds = array<i64: 1, 64>}, {pipeline_mode = #tpu.pipeline_mode<synchronous>, transform_indices = @transform_8, window_bounds = array<i64: 1, 64>}, {pipeline_mode = #tpu.pipeline_mode<synchronous>, transform_indices = @transform_9, window_bounds = array<i64: 64, 64>}, {pipeline_mode = #tpu.pipeline_mode<synchronous>, transform_indices = @transform_10, window_bounds = array<i64: 1, 64>}, {pipeline_mode = #tpu.pipeline_mode<synchronous>, transform_indices = @transform_11, window_bounds = array<i64: 1, 64>}, {pipeline_mode = #tpu.pipeline_mode<synchronous>, transform_indices = @transform_12, window_bounds = array<i64: 1, 64>}, {pipeline_mode = #tpu.pipeline_mode<synchronous>, transform_indices = @transform_13, window_bounds = array<i64: 1, 64>}, {transform_indices = @transform_14, window_bounds = array<i64: 1, 16, 64>}]} {
    %c0 = arith.constant 0 : index
    %c0_0 = arith.constant 0 : index
    %c0_1 = arith.constant 0 : index
    %0 = vector.load %arg3[%c0, %c0_0, %c0_1] : memref<1x16x1xf32, #tpu.memory_space<vmem>>, vector<1x16x1xf32>
    %c0_2 = arith.constant 0 : index
    %c0_3 = arith.constant 0 : index
    %c0_4 = arith.constant 0 : index
    %1 = vector.load %arg1[%c0_2, %c0_3, %c0_4] : memref<1x16x32xbf16, #tpu.memory_space<vmem>>, vector<1x16x32xbf16>
    %2 = arith.extf %1 : vector<1x16x32xbf16> to vector<1x16x32xf32>
    %c0_5 = arith.constant 0 : index
    %c0_6 = arith.constant 0 : index
    %c0_7 = arith.constant 0 : index
    %3 = vector.load %arg2[%c0_5, %c0_6, %c0_7] : memref<1x16x32xbf16, #tpu.memory_space<vmem>>, vector<1x16x32xbf16>
    "tpu.trace_start"() <{level = 10 : i32, message = "bpc,bqc->bpq"}> : () -> ()
    %cst = arith.constant dense<0.000000e+00> : vector<1x16x16xf32>
    %4 = tpu.matmul %2, %2, %cst {dimension_numbers = #tpu.dot_dimension_numbers<[2], [2], [1], [1], [0, 0, 0, 1, 1, 1], [0], [0]>} : vector<1x16x32xf32>, vector<1x16x32xf32>, vector<1x16x16xf32> -> vector<1x16x16xf32>
    "tpu.trace_stop"() : () -> ()
    %5 = arith.mulf %2, %2 : vector<1x16x32xf32>
    %cst_8 = arith.constant dense<0.000000e+00> : vector<1x16xf32>
    %6 = vector.multi_reduction <add>, %5, %cst_8 [2] : vector<1x16x32xf32> to vector<1x16xf32>
    %7 = vector.shape_cast %6 : vector<1x16xf32> to vector<1x16x1xf32>
    %cst_9 = arith.constant 2.000000e+00 : f32
    %8 = vector.broadcast %cst_9 : f32 to vector<1x16x16xf32>
    %9 = arith.mulf %8, %4 : vector<1x16x16xf32>
    %10 = tpu.transpose %7, [0, 2, 1] : vector<1x16x1xf32> -> vector<1x1x16xf32>
    %11 = vector.broadcast %10 : vector<1x1x16xf32> to vector<1x16x16xf32>
    %12 = arith.subf %9, %11 : vector<1x16x16xf32>
    %13 = tpu.iota {dimensions = array<i32: 2>} : vector<1x16x16xi32>
    %14 = tpu.iota {dimensions = array<i32: 1>} : vector<1x16x16xi32>
    %15 = tpu.transpose %0, [0, 2, 1] : vector<1x16x1xf32> -> vector<1x1x16xf32>
    %cst_10 = arith.constant 0.000000e+00 : f32
    %16 = vector.broadcast %cst_10 : f32 to vector<1x1x16xf32>
    %17 = arith.cmpf ogt, %15, %16 : vector<1x1x16xf32>
    %cst_11 = arith.constant -1.000000e+30 : f32
    %18 = vector.shape_cast %17 : vector<1x1x16xi1> to vector<1x1x16xi1>
    %19 = vector.broadcast %18 : vector<1x1x16xi1> to vector<1x16x16xi1>
    %20 = vector.broadcast %cst_11 : f32 to vector<1x16x16xf32>
    %21 = arith.select %19, %12, %20 : vector<1x16x16xi1>, vector<1x16x16xf32>
    %22 = arith.cmpi eq, %13, %14 : vector<1x16x16xi32>
    %cst_12 = arith.constant -3.000000e+30 : f32
    %23 = vector.broadcast %cst_12 : f32 to vector<1x16x16xf32>
    %24 = arith.select %22, %23, %21 : vector<1x16x16xi1>, vector<1x16x16xf32>
    %cst_13 = arith.constant dense<0xFF800000> : vector<1x16xf32>
    %25 = vector.multi_reduction <maximumf>, %24, %cst_13 [2] : vector<1x16x16xf32> to vector<1x16xf32>
    %26 = vector.shape_cast %25 : vector<1x16xf32> to vector<1x16x1xf32>
    %27 = vector.broadcast %26 : vector<1x16x1xf32> to vector<1x16x16xf32>
    %28 = arith.cmpf oeq, %24, %27 : vector<1x16x16xf32>
    %c16_i32 = arith.constant 16 : i32
    %29 = vector.broadcast %c16_i32 : i32 to vector<1x16x16xi32>
    %30 = arith.select %28, %13, %29 : vector<1x16x16xi1>, vector<1x16x16xi32>
    %cst_14 = arith.constant dense<2147483647> : vector<1x16xi32>
    %31 = vector.multi_reduction <minsi>, %30, %cst_14 [2] : vector<1x16x16xi32> to vector<1x16xi32>
    %32 = vector.shape_cast %31 : vector<1x16xi32> to vector<1x16x1xi32>
    %33 = vector.broadcast %32 : vector<1x16x1xi32> to vector<1x16x16xi32>
    %34 = arith.cmpi eq, %13, %33 : vector<1x16x16xi32>
    %35 = arith.extui %34 : vector<1x16x16xi1> to vector<1x16x16xi32>
    %36 = arith.sitofp %35 : vector<1x16x16xi32> to vector<1x16x16xf32>
    %37 = arith.truncf %36 : vector<1x16x16xf32> to vector<1x16x16xbf16>
    %c0_15 = arith.constant 0 : index
    %c0_16 = arith.constant 0 : index
    %c0_17 = arith.constant 0 : index
    %38 = vector.load %arg16[%c0_15, %c0_16, %c0_17] : memref<1x112x16xbf16, #tpu.memory_space<vmem>>, vector<1x16x16xbf16>
    tpu.vector_store %arg16[%c0_15, %c0_16, %c0_17], %37 {strides = array<i32>} : memref<1x112x16xbf16, #tpu.memory_space<vmem>>, vector<1x16x16xbf16>,
    %39 = vector.broadcast %32 : vector<1x16x1xi32> to vector<1x16x16xi32>
    %40 = arith.cmpi eq, %13, %39 : vector<1x16x16xi32>
    %cst_18 = arith.constant -3.000000e+30 : f32
    %41 = vector.broadcast %cst_18 : f32 to vector<1x16x16xf32>
    %42 = arith.select %40, %41, %24 : vector<1x16x16xi1>, vector<1x16x16xf32>
    %cst_19 = arith.constant dense<0xFF800000> : vector<1x16xf32>
    %43 = vector.multi_reduction <maximumf>, %42, %cst_19 [2] : vector<1x16x16xf32> to vector<1x16xf32>
    %44 = vector.shape_cast %43 : vector<1x16xf32> to vector<1x16x1xf32>
    %45 = vector.broadcast %44 : vector<1x16x1xf32> to vector<1x16x16xf32>
    %46 = arith.cmpf oeq, %42, %45 : vector<1x16x16xf32>
    %c16_i32_20 = arith.constant 16 : i32
    %47 = vector.broadcast %c16_i32_20 : i32 to vector<1x16x16xi32>
    %48 = arith.select %46, %13, %47 : vector<1x16x16xi1>, vector<1x16x16xi32>
    %cst_21 = arith.constant dense<2147483647> : vector<1x16xi32>
    %49 = vector.multi_reduction <minsi>, %48, %cst_21 [2] : vector<1x16x16xi32> to vector<1x16xi32>
    %50 = vector.shape_cast %49 : vector<1x16xi32> to vector<1x16x1xi32>
    %51 = vector.broadcast %50 : vector<1x16x1xi32> to vector<1x16x16xi32>
    %52 = arith.cmpi eq, %13, %51 : vector<1x16x16xi32>
    %53 = arith.extui %52 : vector<1x16x16xi1> to vector<1x16x16xi32>
    %54 = arith.sitofp %53 : vector<1x16x16xi32> to vector<1x16x16xf32>
    %55 = arith.truncf %54 : vector<1x16x16xf32> to vector<1x16x16xbf16>
    %c0_22 = arith.constant 0 : index
    %c16 = arith.constant 16 : index
    %c0_23 = arith.constant 0 : index
    %56 = vector.load %arg16[%c0_22, %c16, %c0_23] : memref<1x112x16xbf16, #tpu.memory_space<vmem>>, vector<1x16x16xbf16>
    tpu.vector_store %arg16[%c0_22, %c16, %c0_23], %55 {strides = array<i32>} : memref<1x112x16xbf16, #tpu.memory_space<vmem>>, vector<1x16x16xbf16>,
    %57 = vector.broadcast %50 : vector<1x16x1xi32> to vector<1x16x16xi32>
    %58 = arith.cmpi eq, %13, %57 : vector<1x16x16xi32>
    %cst_24 = arith.constant -3.000000e+30 : f32
    %59 = vector.broadcast %cst_24 : f32 to vector<1x16x16xf32>
    %60 = arith.select %58, %59, %42 : vector<1x16x16xi1>, vector<1x16x16xf32>
    %cst_25 = arith.constant dense<0xFF800000> : vector<1x16xf32>
    %61 = vector.multi_reduction <maximumf>, %60, %cst_25 [2] : vector<1x16x16xf32> to vector<1x16xf32>
    %62 = vector.shape_cast %61 : vector<1x16xf32> to vector<1x16x1xf32>
    %63 = vector.broadcast %62 : vector<1x16x1xf32> to vector<1x16x16xf32>
    %64 = arith.cmpf oeq, %60, %63 : vector<1x16x16xf32>
    %c16_i32_26 = arith.constant 16 : i32
    %65 = vector.broadcast %c16_i32_26 : i32 to vector<1x16x16xi32>
    %66 = arith.select %64, %13, %65 : vector<1x16x16xi1>, vector<1x16x16xi32>
    %cst_27 = arith.constant dense<2147483647> : vector<1x16xi32>
    %67 = vector.multi_reduction <minsi>, %66, %cst_27 [2] : vector<1x16x16xi32> to vector<1x16xi32>
    %68 = vector.shape_cast %67 : vector<1x16xi32> to vector<1x16x1xi32>
    %69 = vector.broadcast %68 : vector<1x16x1xi32> to vector<1x16x16xi32>
    %70 = arith.cmpi eq, %13, %69 : vector<1x16x16xi32>
    %71 = arith.extui %70 : vector<1x16x16xi1> to vector<1x16x16xi32>
    %72 = arith.sitofp %71 : vector<1x16x16xi32> to vector<1x16x16xf32>
    %73 = arith.truncf %72 : vector<1x16x16xf32> to vector<1x16x16xbf16>
    %c0_28 = arith.constant 0 : index
    %c32 = arith.constant 32 : index
    %c0_29 = arith.constant 0 : index
    %74 = vector.load %arg16[%c0_28, %c32, %c0_29] : memref<1x112x16xbf16, #tpu.memory_space<vmem>>, vector<1x16x16xbf16>
    tpu.vector_store %arg16[%c0_28, %c32, %c0_29], %73 {strides = array<i32>} : memref<1x112x16xbf16, #tpu.memory_space<vmem>>, vector<1x16x16xbf16>,
    %75 = vector.broadcast %68 : vector<1x16x1xi32> to vector<1x16x16xi32>
    %76 = arith.cmpi eq, %13, %75 : vector<1x16x16xi32>
    %cst_30 = arith.constant -3.000000e+30 : f32
    %77 = vector.broadcast %cst_30 : f32 to vector<1x16x16xf32>
    %78 = arith.select %76, %77, %60 : vector<1x16x16xi1>, vector<1x16x16xf32>
    %cst_31 = arith.constant dense<0xFF800000> : vector<1x16xf32>
    %79 = vector.multi_reduction <maximumf>, %78, %cst_31 [2] : vector<1x16x16xf32> to vector<1x16xf32>
    %80 = vector.shape_cast %79 : vector<1x16xf32> to vector<1x16x1xf32>
    %81 = vector.broadcast %80 : vector<1x16x1xf32> to vector<1x16x16xf32>
    %82 = arith.cmpf oeq, %78, %81 : vector<1x16x16xf32>
    %c16_i32_32 = arith.constant 16 : i32
    %83 = vector.broadcast %c16_i32_32 : i32 to vector<1x16x16xi32>
    %84 = arith.select %82, %13, %83 : vector<1x16x16xi1>, vector<1x16x16xi32>
    %cst_33 = arith.constant dense<2147483647> : vector<1x16xi32>
    %85 = vector.multi_reduction <minsi>, %84, %cst_33 [2] : vector<1x16x16xi32> to vector<1x16xi32>
    %86 = vector.shape_cast %85 : vector<1x16xi32> to vector<1x16x1xi32>
    %87 = vector.broadcast %86 : vector<1x16x1xi32> to vector<1x16x16xi32>
    %88 = arith.cmpi eq, %13, %87 : vector<1x16x16xi32>
    %89 = arith.extui %88 : vector<1x16x16xi1> to vector<1x16x16xi32>
    %90 = arith.sitofp %89 : vector<1x16x16xi32> to vector<1x16x16xf32>
    %91 = arith.truncf %90 : vector<1x16x16xf32> to vector<1x16x16xbf16>
    %c0_34 = arith.constant 0 : index
    %c48 = arith.constant 48 : index
    %c0_35 = arith.constant 0 : index
    %92 = vector.load %arg16[%c0_34, %c48, %c0_35] : memref<1x112x16xbf16, #tpu.memory_space<vmem>>, vector<1x16x16xbf16>
    tpu.vector_store %arg16[%c0_34, %c48, %c0_35], %91 {strides = array<i32>} : memref<1x112x16xbf16, #tpu.memory_space<vmem>>, vector<1x16x16xbf16>,
    %93 = vector.broadcast %86 : vector<1x16x1xi32> to vector<1x16x16xi32>
    %94 = arith.cmpi eq, %13, %93 : vector<1x16x16xi32>
    %cst_36 = arith.constant -3.000000e+30 : f32
    %95 = vector.broadcast %cst_36 : f32 to vector<1x16x16xf32>
    %96 = arith.select %94, %95, %78 : vector<1x16x16xi1>, vector<1x16x16xf32>
    %cst_37 = arith.constant dense<0xFF800000> : vector<1x16xf32>
    %97 = vector.multi_reduction <maximumf>, %96, %cst_37 [2] : vector<1x16x16xf32> to vector<1x16xf32>
    %98 = vector.shape_cast %97 : vector<1x16xf32> to vector<1x16x1xf32>
    %99 = vector.broadcast %98 : vector<1x16x1xf32> to vector<1x16x16xf32>
    %100 = arith.cmpf oeq, %96, %99 : vector<1x16x16xf32>
    %c16_i32_38 = arith.constant 16 : i32
    %101 = vector.broadcast %c16_i32_38 : i32 to vector<1x16x16xi32>
    %102 = arith.select %100, %13, %101 : vector<1x16x16xi1>, vector<1x16x16xi32>
    %cst_39 = arith.constant dense<2147483647> : vector<1x16xi32>
    %103 = vector.multi_reduction <minsi>, %102, %cst_39 [2] : vector<1x16x16xi32> to vector<1x16xi32>
    %104 = vector.shape_cast %103 : vector<1x16xi32> to vector<1x16x1xi32>
    %105 = vector.broadcast %104 : vector<1x16x1xi32> to vector<1x16x16xi32>
    %106 = arith.cmpi eq, %13, %105 : vector<1x16x16xi32>
    %107 = arith.extui %106 : vector<1x16x16xi1> to vector<1x16x16xi32>
    %108 = arith.sitofp %107 : vector<1x16x16xi32> to vector<1x16x16xf32>
    %109 = arith.truncf %108 : vector<1x16x16xf32> to vector<1x16x16xbf16>
    %c0_40 = arith.constant 0 : index
    %c64 = arith.constant 64 : index
    %c0_41 = arith.constant 0 : index
    %110 = vector.load %arg16[%c0_40, %c64, %c0_41] : memref<1x112x16xbf16, #tpu.memory_space<vmem>>, vector<1x16x16xbf16>
    tpu.vector_store %arg16[%c0_40, %c64, %c0_41], %109 {strides = array<i32>} : memref<1x112x16xbf16, #tpu.memory_space<vmem>>, vector<1x16x16xbf16>,
    %111 = vector.broadcast %104 : vector<1x16x1xi32> to vector<1x16x16xi32>
    %112 = arith.cmpi eq, %13, %111 : vector<1x16x16xi32>
    %cst_42 = arith.constant -3.000000e+30 : f32
    %113 = vector.broadcast %cst_42 : f32 to vector<1x16x16xf32>
    %114 = arith.select %112, %113, %96 : vector<1x16x16xi1>, vector<1x16x16xf32>
    %cst_43 = arith.constant dense<0xFF800000> : vector<1x16xf32>
    %115 = vector.multi_reduction <maximumf>, %114, %cst_43 [2] : vector<1x16x16xf32> to vector<1x16xf32>
    %116 = vector.shape_cast %115 : vector<1x16xf32> to vector<1x16x1xf32>
    %117 = vector.broadcast %116 : vector<1x16x1xf32> to vector<1x16x16xf32>
    %118 = arith.cmpf oeq, %114, %117 : vector<1x16x16xf32>
    %c16_i32_44 = arith.constant 16 : i32
    %119 = vector.broadcast %c16_i32_44 : i32 to vector<1x16x16xi32>
    %120 = arith.select %118, %13, %119 : vector<1x16x16xi1>, vector<1x16x16xi32>
    %cst_45 = arith.constant dense<2147483647> : vector<1x16xi32>
    %121 = vector.multi_reduction <minsi>, %120, %cst_45 [2] : vector<1x16x16xi32> to vector<1x16xi32>
    %122 = vector.shape_cast %121 : vector<1x16xi32> to vector<1x16x1xi32>
    %123 = vector.broadcast %122 : vector<1x16x1xi32> to vector<1x16x16xi32>
    %124 = arith.cmpi eq, %13, %123 : vector<1x16x16xi32>
    %125 = arith.extui %124 : vector<1x16x16xi1> to vector<1x16x16xi32>
    %126 = arith.sitofp %125 : vector<1x16x16xi32> to vector<1x16x16xf32>
    %127 = arith.truncf %126 : vector<1x16x16xf32> to vector<1x16x16xbf16>
    %c0_46 = arith.constant 0 : index
    %c80 = arith.constant 80 : index
    %c0_47 = arith.constant 0 : index
    %128 = vector.load %arg16[%c0_46, %c80, %c0_47] : memref<1x112x16xbf16, #tpu.memory_space<vmem>>, vector<1x16x16xbf16>
    tpu.vector_store %arg16[%c0_46, %c80, %c0_47], %127 {strides = array<i32>} : memref<1x112x16xbf16, #tpu.memory_space<vmem>>, vector<1x16x16xbf16>,
    %129 = vector.broadcast %122 : vector<1x16x1xi32> to vector<1x16x16xi32>
    %130 = arith.cmpi eq, %13, %129 : vector<1x16x16xi32>
    %cst_48 = arith.constant -3.000000e+30 : f32
    %131 = vector.broadcast %cst_48 : f32 to vector<1x16x16xf32>
    %132 = arith.select %130, %131, %114 : vector<1x16x16xi1>, vector<1x16x16xf32>
    %cst_49 = arith.constant dense<0xFF800000> : vector<1x16xf32>
    %133 = vector.multi_reduction <maximumf>, %132, %cst_49 [2] : vector<1x16x16xf32> to vector<1x16xf32>
    %134 = vector.shape_cast %133 : vector<1x16xf32> to vector<1x16x1xf32>
    %135 = vector.broadcast %134 : vector<1x16x1xf32> to vector<1x16x16xf32>
    %136 = arith.cmpf oeq, %132, %135 : vector<1x16x16xf32>
    %c16_i32_50 = arith.constant 16 : i32
    %137 = vector.broadcast %c16_i32_50 : i32 to vector<1x16x16xi32>
    %138 = arith.select %136, %13, %137 : vector<1x16x16xi1>, vector<1x16x16xi32>
    %cst_51 = arith.constant dense<2147483647> : vector<1x16xi32>
    %139 = vector.multi_reduction <minsi>, %138, %cst_51 [2] : vector<1x16x16xi32> to vector<1x16xi32>
    %140 = vector.shape_cast %139 : vector<1x16xi32> to vector<1x16x1xi32>
    %141 = vector.broadcast %140 : vector<1x16x1xi32> to vector<1x16x16xi32>
    %142 = arith.cmpi eq, %13, %141 : vector<1x16x16xi32>
    %143 = arith.extui %142 : vector<1x16x16xi1> to vector<1x16x16xi32>
    %144 = arith.sitofp %143 : vector<1x16x16xi32> to vector<1x16x16xf32>
    %145 = arith.truncf %144 : vector<1x16x16xf32> to vector<1x16x16xbf16>
    %c0_52 = arith.constant 0 : index
    %c96 = arith.constant 96 : index
    %c0_53 = arith.constant 0 : index
    %146 = vector.load %arg16[%c0_52, %c96, %c0_53] : memref<1x112x16xbf16, #tpu.memory_space<vmem>>, vector<1x16x16xbf16>
    tpu.vector_store %arg16[%c0_52, %c96, %c0_53], %145 {strides = array<i32>} : memref<1x112x16xbf16, #tpu.memory_space<vmem>>, vector<1x16x16xbf16>,
    %147 = vector.shape_cast %3 : vector<1x16x32xbf16> to vector<16x32xbf16>
    %c0_54 = arith.constant 0 : index
    %c0_55 = arith.constant 0 : index
    %148 = vector.load %arg4[%c0_54, %c0_55] : memref<32x192xbf16, #tpu.memory_space<vmem>>, vector<32x192xbf16>
    %cst_56 = arith.constant dense<0.000000e+00> : vector<16x192xf32>
    %149 = tpu.matmul %147, %148, %cst_56 {dimension_numbers = #tpu.dot_dimension_numbers<[1], [0], [0], [1], [0, 0, 1, 1], [], []>} : vector<16x32xbf16>, vector<32x192xbf16>, vector<16x192xf32> -> vector<16x192xf32>
    %150 = vector.extract_strided_slice %149 {offsets = [0, 0], sizes = [16, 64], strides = [1, 1]} : vector<16x192xf32> to vector<16x64xf32>
    %151 = vector.shape_cast %150 : vector<16x64xf32> to vector<1x1x16x64xf32>
    %152 = vector.extract_strided_slice %149 {offsets = [0, 64], sizes = [16, 64], strides = [1, 1]} : vector<16x192xf32> to vector<16x64xf32>
    %153 = arith.truncf %152 : vector<16x64xf32> to vector<16x64xbf16>
    %154 = vector.shape_cast %153 : vector<16x64xbf16> to vector<1x16x64xbf16>
    %155 = vector.extract_strided_slice %149 {offsets = [0, 128], sizes = [16, 64], strides = [1, 1]} : vector<16x192xf32> to vector<16x64xf32>
    %c0_57 = arith.constant 0 : index
    %c0_58 = arith.constant 0 : index
    %156 = vector.load %arg13[%c0_57, %c0_58] : memref<1x64xf32, #tpu.memory_space<vmem>>, vector<1x64xf32>
    %157 = vector.broadcast %156 : vector<1x64xf32> to vector<16x64xf32>
    %158 = arith.mulf %155, %157 : vector<16x64xf32>
    %c0_59 = arith.constant 0 : index
    %c0_60 = arith.constant 0 : index
    %159 = vector.load %arg14[%c0_59, %c0_60] : memref<1x64xf32, #tpu.memory_space<vmem>>, vector<1x64xf32>
    %160 = vector.broadcast %159 : vector<1x64xf32> to vector<16x64xf32>
    %161 = arith.addf %158, %160 : vector<16x64xf32>
    %c0_61 = arith.constant 0 : index
    %c0_62 = arith.constant 0 : index
    %c0_63 = arith.constant 0 : index
    %162 = vector.load %arg16[%c0_61, %c0_62, %c0_63] : memref<1x112x16xbf16, #tpu.memory_space<vmem>>, vector<1x112x16xbf16>
    "tpu.trace_start"() <{level = 10 : i32, message = "bsp,bpc->bsc"}> : () -> ()
    %cst_64 = arith.constant dense<0.000000e+00> : vector<1x112x64xf32>
    %163 = tpu.matmul %162, %154, %cst_64 {dimension_numbers = #tpu.dot_dimension_numbers<[2], [1], [1], [2], [0, 0, 0, 1, 1, 2], [0], [0]>} : vector<1x112x16xbf16>, vector<1x16x64xbf16>, vector<1x112x64xf32> -> vector<1x112x64xf32>
    "tpu.trace_stop"() : () -> ()
    %164 = vector.shape_cast %163 : vector<1x112x64xf32> to vector<1x7x16x64xf32>
    %165 = vector.broadcast %151 : vector<1x1x16x64xf32> to vector<1x7x16x64xf32>
    %166 = arith.addf %164, %165 : vector<1x7x16x64xf32>
    %c0_65 = arith.constant 0 : index
    %c0_66 = arith.constant 0 : index
    %167 = vector.load %arg5[%c0_65, %c0_66] : memref<1x64xf32, #tpu.memory_space<vmem>>, vector<1x64xf32>
    %168 = vector.shape_cast %167 : vector<1x64xf32> to vector<1x1x1x64xf32>
    %169 = vector.broadcast %168 : vector<1x1x1x64xf32> to vector<1x7x16x64xf32>
    %170 = arith.mulf %166, %169 : vector<1x7x16x64xf32>
    %c0_67 = arith.constant 0 : index
    %c0_68 = arith.constant 0 : index
    %171 = vector.load %arg6[%c0_67, %c0_68] : memref<1x64xf32, #tpu.memory_space<vmem>>, vector<1x64xf32>
    %172 = vector.shape_cast %171 : vector<1x64xf32> to vector<1x1x1x64xf32>
    %173 = vector.broadcast %172 : vector<1x1x1x64xf32> to vector<1x7x16x64xf32>
    %174 = arith.addf %170, %173 : vector<1x7x16x64xf32>
    %cst_69 = arith.constant 0.000000e+00 : f32
    %175 = vector.broadcast %cst_69 : f32 to vector<1x7x16x64xf32>
    %176 = arith.maximumf %174, %175 : vector<1x7x16x64xf32>
    %177 = vector.shape_cast %176 : vector<1x7x16x64xf32> to vector<112x64xf32>
    %178 = arith.truncf %177 : vector<112x64xf32> to vector<112x64xbf16>
    %c0_70 = arith.constant 0 : index
    %c0_71 = arith.constant 0 : index
    %179 = vector.load %arg7[%c0_70, %c0_71] : memref<64x64xbf16, #tpu.memory_space<vmem>>, vector<64x64xbf16>
    %cst_72 = arith.constant dense<0.000000e+00> : vector<112x64xf32>
    %180 = tpu.matmul %178, %179, %cst_72 {dimension_numbers = #tpu.dot_dimension_numbers<[1], [0], [0], [1], [0, 0, 1, 1], [], []>} : vector<112x64xbf16>, vector<64x64xbf16>, vector<112x64xf32> -> vector<112x64xf32>
    %c0_73 = arith.constant 0 : index
    %c0_74 = arith.constant 0 : index
    %181 = vector.load %arg8[%c0_73, %c0_74] : memref<1x64xf32, #tpu.memory_space<vmem>>, vector<1x64xf32>
    %182 = vector.broadcast %181 : vector<1x64xf32> to vector<112x64xf32>
    %183 = arith.mulf %180, %182 : vector<112x64xf32>
    %c0_75 = arith.constant 0 : index
    %c0_76 = arith.constant 0 : index
    %184 = vector.load %arg9[%c0_75, %c0_76] : memref<1x64xf32, #tpu.memory_space<vmem>>, vector<1x64xf32>
    %185 = vector.broadcast %184 : vector<1x64xf32> to vector<112x64xf32>
    %186 = arith.addf %183, %185 : vector<112x64xf32>
    %cst_77 = arith.constant 0.000000e+00 : f32
    %187 = vector.broadcast %cst_77 : f32 to vector<112x64xf32>
    %188 = arith.maximumf %186, %187 : vector<112x64xf32>
    %189 = arith.truncf %188 : vector<112x64xf32> to vector<112x64xbf16>
    %c0_78 = arith.constant 0 : index
    %c0_79 = arith.constant 0 : index
    %190 = vector.load %arg10[%c0_78, %c0_79] : memref<64x64xbf16, #tpu.memory_space<vmem>>, vector<64x64xbf16>
    %cst_80 = arith.constant dense<0.000000e+00> : vector<112x64xf32>
    %191 = tpu.matmul %189, %190, %cst_80 {dimension_numbers = #tpu.dot_dimension_numbers<[1], [0], [0], [1], [0, 0, 1, 1], [], []>} : vector<112x64xbf16>, vector<64x64xbf16>, vector<112x64xf32> -> vector<112x64xf32>
    %c0_81 = arith.constant 0 : index
    %c0_82 = arith.constant 0 : index
    %192 = vector.load %arg11[%c0_81, %c0_82] : memref<1x64xf32, #tpu.memory_space<vmem>>, vector<1x64xf32>
    %193 = vector.broadcast %192 : vector<1x64xf32> to vector<112x64xf32>
    %194 = arith.mulf %191, %193 : vector<112x64xf32>
    %c0_83 = arith.constant 0 : index
    %c0_84 = arith.constant 0 : index
    %195 = vector.load %arg12[%c0_83, %c0_84] : memref<1x64xf32, #tpu.memory_space<vmem>>, vector<1x64xf32>
    %196 = vector.broadcast %195 : vector<1x64xf32> to vector<112x64xf32>
    %197 = arith.addf %194, %196 : vector<112x64xf32>
    %cst_85 = arith.constant 0.000000e+00 : f32
    %198 = vector.broadcast %cst_85 : f32 to vector<112x64xf32>
    %199 = arith.maximumf %197, %198 : vector<112x64xf32>
    %200 = vector.shape_cast %199 : vector<112x64xf32> to vector<1x7x16x64xf32>
    %cst_86 = arith.constant dense<0.000000e+00> : vector<1x16x64xf32>
    %201 = vector.multi_reduction <add>, %200, %cst_86 [1] : vector<1x7x16x64xf32> to vector<1x16x64xf32>
    %202 = vector.shape_cast %201 : vector<1x16x64xf32> to vector<16x64xf32>
    %cst_87 = arith.constant 0.142857149 : f32
    %203 = vector.broadcast %cst_87 : f32 to vector<16x64xf32>
    %204 = arith.mulf %202, %203 : vector<16x64xf32>
    %205 = arith.addf %204, %161 : vector<16x64xf32>
    %cst_88 = arith.constant 0.000000e+00 : f32
    %206 = vector.broadcast %cst_88 : f32 to vector<16x64xf32>
    %207 = arith.maximumf %205, %206 : vector<16x64xf32>
    %208 = vector.shape_cast %0 : vector<1x16x1xf32> to vector<16x1xf32>
    %209 = vector.broadcast %208 : vector<16x1xf32> to vector<16x64xf32>
    %210 = arith.mulf %207, %209 : vector<16x64xf32>
    %211 = vector.shape_cast %210 : vector<16x64xf32> to vector<1x16x64xf32>
    %212 = arith.truncf %211 : vector<1x16x64xf32> to vector<1x16x64xbf16>
    %c0_89 = arith.constant 0 : index
    %c0_90 = arith.constant 0 : index
    %c0_91 = arith.constant 0 : index
    %213 = vector.load %arg15[%c0_89, %c0_90, %c0_91] : memref<1x16x64xbf16, #tpu.memory_space<vmem>>, vector<1x16x64xbf16>
    tpu.vector_store %arg15[%c0_89, %c0_90, %c0_91], %212 {strides = array<i32>} : memref<1x16x64xbf16, #tpu.memory_space<vmem>>, vector<1x16x64xbf16>,
    return
  }
  func.func @transform_0(%arg0: i32) -> (i32, i32, i32) {
    %c0_i32 = arith.constant 0 : i32
    %c0_i32_0 = arith.constant 0 : i32
    %c0_i32_1 = arith.constant 0 : i32
    return %arg0, %c0_i32, %c0_i32_0 : i32, i32, i32
  }
  func.func @transform_1(%arg0: i32) -> (i32, i32, i32) {
    %c0_i32 = arith.constant 0 : i32
    %c0_i32_0 = arith.constant 0 : i32
    %c0_i32_1 = arith.constant 0 : i32
    return %arg0, %c0_i32, %c0_i32_0 : i32, i32, i32
  }
  func.func @transform_2(%arg0: i32) -> (i32, i32, i32) {
    %c0_i32 = arith.constant 0 : i32
    %c0_i32_0 = arith.constant 0 : i32
    %c0_i32_1 = arith.constant 0 : i32
    return %arg0, %c0_i32, %c0_i32_0 : i32, i32, i32
  }
  func.func @transform_3(%arg0: i32) -> (i32, i32) {
    %c0_i32 = arith.constant 0 : i32
    %c0_i32_0 = arith.constant 0 : i32
    %c0_i32_1 = arith.constant 0 : i32
    return %c0_i32, %c0_i32_0 : i32, i32
  }
  func.func @transform_4(%arg0: i32) -> (i32, i32) {
    %c0_i32 = arith.constant 0 : i32
    %c0_i32_0 = arith.constant 0 : i32
    %c0_i32_1 = arith.constant 0 : i32
    return %c0_i32, %c0_i32_0 : i32, i32
  }
  func.func @transform_5(%arg0: i32) -> (i32, i32) {
    %c0_i32 = arith.constant 0 : i32
    %c0_i32_0 = arith.constant 0 : i32
    %c0_i32_1 = arith.constant 0 : i32
    return %c0_i32, %c0_i32_0 : i32, i32
  }
  func.func @transform_6(%arg0: i32) -> (i32, i32) {
    %c0_i32 = arith.constant 0 : i32
    %c0_i32_0 = arith.constant 0 : i32
    %c0_i32_1 = arith.constant 0 : i32
    return %c0_i32, %c0_i32_0 : i32, i32
  }
  func.func @transform_7(%arg0: i32) -> (i32, i32) {
    %c0_i32 = arith.constant 0 : i32
    %c0_i32_0 = arith.constant 0 : i32
    %c0_i32_1 = arith.constant 0 : i32
    return %c0_i32, %c0_i32_0 : i32, i32
  }
  func.func @transform_8(%arg0: i32) -> (i32, i32) {
    %c0_i32 = arith.constant 0 : i32
    %c0_i32_0 = arith.constant 0 : i32
    %c0_i32_1 = arith.constant 0 : i32
    return %c0_i32, %c0_i32_0 : i32, i32
  }
  func.func @transform_9(%arg0: i32) -> (i32, i32) {
    %c0_i32 = arith.constant 0 : i32
    %c0_i32_0 = arith.constant 0 : i32
    %c0_i32_1 = arith.constant 0 : i32
    return %c0_i32, %c0_i32_0 : i32, i32
  }
  func.func @transform_10(%arg0: i32) -> (i32, i32) {
    %c0_i32 = arith.constant 0 : i32
    %c0_i32_0 = arith.constant 0 : i32
    %c0_i32_1 = arith.constant 0 : i32
    return %c0_i32, %c0_i32_0 : i32, i32
  }
  func.func @transform_11(%arg0: i32) -> (i32, i32) {
    %c0_i32 = arith.constant 0 : i32
    %c0_i32_0 = arith.constant 0 : i32
    %c0_i32_1 = arith.constant 0 : i32
    return %c0_i32, %c0_i32_0 : i32, i32
  }
  func.func @transform_12(%arg0: i32) -> (i32, i32) {
    %c0_i32 = arith.constant 0 : i32
    %c0_i32_0 = arith.constant 0 : i32
    %c0_i32_1 = arith.constant 0 : i32
    return %c0_i32, %c0_i32_0 : i32, i32
  }
  func.func @transform_13(%arg0: i32) -> (i32, i32) {
    %c0_i32 = arith.constant 0 : i32
    %c0_i32_0 = arith.constant 0 : i32
    %c0_i32_1 = arith.constant 0 : i32
    return %c0_i32, %c0_i32_0 : i32, i32
  }
  func.func @transform_14(%arg0: i32) -> (i32, i32, i32) {
    %c0_i32 = arith.constant 0 : i32
    %c0_i32_0 = arith.constant 0 : i32
    %c0_i32_1 = arith.constant 0 : i32
    return %arg0, %c0_i32, %c0_i32_0 : i32, i32, i32
  }
}

module attributes {stable_mosaic.version = 11 : i64} {
  func.func @_edge_block_kernel(%arg0: i32, %arg1: memref<1x16x2xf32, #tpu.memory_space<vmem>>, %arg2: memref<1x16x4xbf16, #tpu.memory_space<vmem>>, %arg3: memref<1x16x1xf32, #tpu.memory_space<vmem>>, %arg4: memref<4x96xbf16, #tpu.memory_space<vmem>>, %arg5: memref<1x32xf32, #tpu.memory_space<vmem>>, %arg6: memref<1x32xf32, #tpu.memory_space<vmem>>, %arg7: memref<32x32xbf16, #tpu.memory_space<vmem>>, %arg8: memref<1x32xf32, #tpu.memory_space<vmem>>, %arg9: memref<1x32xf32, #tpu.memory_space<vmem>>, %arg10: memref<32x32xbf16, #tpu.memory_space<vmem>>, %arg11: memref<1x32xf32, #tpu.memory_space<vmem>>, %arg12: memref<1x32xf32, #tpu.memory_space<vmem>>, %arg13: memref<1x32xf32, #tpu.memory_space<vmem>>, %arg14: memref<1x32xf32, #tpu.memory_space<vmem>>, %arg15: memref<1x16x32xbf16, #tpu.memory_space<vmem>>, %arg16: memref<1x112x16xbf16, #tpu.memory_space<vmem>>) attributes {dimension_semantics = [#tpu.dimension_semantics<parallel>], iteration_bounds = array<i64: 2>, scalar_prefetch = 0 : i64, scratch_operands = 1 : i64, tpu.core_type = #tpu.core_type<tc>, window_params = [{transform_indices = @transform_0, window_bounds = array<i64: 1, 16, 2>}, {transform_indices = @transform_1, window_bounds = array<i64: 1, 16, 4>}, {transform_indices = @transform_2, window_bounds = array<i64: 1, 16, 1>}, {pipeline_mode = #tpu.pipeline_mode<synchronous>, transform_indices = @transform_3, window_bounds = array<i64: 4, 96>}, {pipeline_mode = #tpu.pipeline_mode<synchronous>, transform_indices = @transform_4, window_bounds = array<i64: 1, 32>}, {pipeline_mode = #tpu.pipeline_mode<synchronous>, transform_indices = @transform_5, window_bounds = array<i64: 1, 32>}, {pipeline_mode = #tpu.pipeline_mode<synchronous>, transform_indices = @transform_6, window_bounds = array<i64: 32, 32>}, {pipeline_mode = #tpu.pipeline_mode<synchronous>, transform_indices = @transform_7, window_bounds = array<i64: 1, 32>}, {pipeline_mode = #tpu.pipeline_mode<synchronous>, transform_indices = @transform_8, window_bounds = array<i64: 1, 32>}, {pipeline_mode = #tpu.pipeline_mode<synchronous>, transform_indices = @transform_9, window_bounds = array<i64: 32, 32>}, {pipeline_mode = #tpu.pipeline_mode<synchronous>, transform_indices = @transform_10, window_bounds = array<i64: 1, 32>}, {pipeline_mode = #tpu.pipeline_mode<synchronous>, transform_indices = @transform_11, window_bounds = array<i64: 1, 32>}, {pipeline_mode = #tpu.pipeline_mode<synchronous>, transform_indices = @transform_12, window_bounds = array<i64: 1, 32>}, {pipeline_mode = #tpu.pipeline_mode<synchronous>, transform_indices = @transform_13, window_bounds = array<i64: 1, 32>}, {transform_indices = @transform_14, window_bounds = array<i64: 1, 16, 32>}]} {
    %c0 = arith.constant 0 : index
    %c0_0 = arith.constant 0 : index
    %c0_1 = arith.constant 0 : index
    %0 = vector.load %arg3[%c0, %c0_0, %c0_1] : memref<1x16x1xf32, #tpu.memory_space<vmem>>, vector<1x16x1xf32>
    %c0_2 = arith.constant 0 : index
    %c0_3 = arith.constant 0 : index
    %c0_4 = arith.constant 0 : index
    %1 = vector.load %arg1[%c0_2, %c0_3, %c0_4] : memref<1x16x2xf32, #tpu.memory_space<vmem>>, vector<1x16x2xf32>
    %c0_5 = arith.constant 0 : index
    %c0_6 = arith.constant 0 : index
    %c0_7 = arith.constant 0 : index
    %2 = vector.load %arg2[%c0_5, %c0_6, %c0_7] : memref<1x16x4xbf16, #tpu.memory_space<vmem>>, vector<1x16x4xbf16>
    "tpu.trace_start"() <{level = 10 : i32, message = "bpc,bqc->bpq"}> : () -> ()
    %cst = arith.constant dense<0.000000e+00> : vector<1x16x16xf32>
    %3 = tpu.matmul %1, %1, %cst {dimension_numbers = #tpu.dot_dimension_numbers<[2], [2], [1], [1], [0, 0, 0, 1, 1, 1], [0], [0]>} : vector<1x16x2xf32>, vector<1x16x2xf32>, vector<1x16x16xf32> -> vector<1x16x16xf32>
    "tpu.trace_stop"() : () -> ()
    %4 = arith.mulf %1, %1 : vector<1x16x2xf32>
    %cst_8 = arith.constant dense<0.000000e+00> : vector<1x16xf32>
    %5 = vector.multi_reduction <add>, %4, %cst_8 [2] : vector<1x16x2xf32> to vector<1x16xf32>
    %6 = vector.shape_cast %5 : vector<1x16xf32> to vector<1x16x1xf32>
    %cst_9 = arith.constant 2.000000e+00 : f32
    %7 = vector.broadcast %cst_9 : f32 to vector<1x16x16xf32>
    %8 = arith.mulf %7, %3 : vector<1x16x16xf32>
    %9 = tpu.transpose %6, [0, 2, 1] : vector<1x16x1xf32> -> vector<1x1x16xf32>
    %10 = vector.broadcast %9 : vector<1x1x16xf32> to vector<1x16x16xf32>
    %11 = arith.subf %8, %10 : vector<1x16x16xf32>
    %12 = tpu.iota {dimensions = array<i32: 2>} : vector<1x16x16xi32>
    %13 = tpu.iota {dimensions = array<i32: 1>} : vector<1x16x16xi32>
    %14 = tpu.transpose %0, [0, 2, 1] : vector<1x16x1xf32> -> vector<1x1x16xf32>
    %cst_10 = arith.constant 0.000000e+00 : f32
    %15 = vector.broadcast %cst_10 : f32 to vector<1x1x16xf32>
    %16 = arith.cmpf ogt, %14, %15 : vector<1x1x16xf32>
    %cst_11 = arith.constant -1.000000e+30 : f32
    %17 = vector.shape_cast %16 : vector<1x1x16xi1> to vector<1x1x16xi1>
    %18 = vector.broadcast %17 : vector<1x1x16xi1> to vector<1x16x16xi1>
    %19 = vector.broadcast %cst_11 : f32 to vector<1x16x16xf32>
    %20 = arith.select %18, %11, %19 : vector<1x16x16xi1>, vector<1x16x16xf32>
    %21 = arith.cmpi eq, %12, %13 : vector<1x16x16xi32>
    %cst_12 = arith.constant -3.000000e+30 : f32
    %22 = vector.broadcast %cst_12 : f32 to vector<1x16x16xf32>
    %23 = arith.select %21, %22, %20 : vector<1x16x16xi1>, vector<1x16x16xf32>
    %cst_13 = arith.constant dense<0xFF800000> : vector<1x16xf32>
    %24 = vector.multi_reduction <maximumf>, %23, %cst_13 [2] : vector<1x16x16xf32> to vector<1x16xf32>
    %25 = vector.shape_cast %24 : vector<1x16xf32> to vector<1x16x1xf32>
    %26 = vector.broadcast %25 : vector<1x16x1xf32> to vector<1x16x16xf32>
    %27 = arith.cmpf oeq, %23, %26 : vector<1x16x16xf32>
    %c16_i32 = arith.constant 16 : i32
    %28 = vector.broadcast %c16_i32 : i32 to vector<1x16x16xi32>
    %29 = arith.select %27, %12, %28 : vector<1x16x16xi1>, vector<1x16x16xi32>
    %cst_14 = arith.constant dense<2147483647> : vector<1x16xi32>
    %30 = vector.multi_reduction <minsi>, %29, %cst_14 [2] : vector<1x16x16xi32> to vector<1x16xi32>
    %31 = vector.shape_cast %30 : vector<1x16xi32> to vector<1x16x1xi32>
    %32 = vector.broadcast %31 : vector<1x16x1xi32> to vector<1x16x16xi32>
    %33 = arith.cmpi eq, %12, %32 : vector<1x16x16xi32>
    %34 = arith.extui %33 : vector<1x16x16xi1> to vector<1x16x16xi32>
    %35 = arith.sitofp %34 : vector<1x16x16xi32> to vector<1x16x16xf32>
    %36 = arith.truncf %35 : vector<1x16x16xf32> to vector<1x16x16xbf16>
    %c0_15 = arith.constant 0 : index
    %c0_16 = arith.constant 0 : index
    %c0_17 = arith.constant 0 : index
    %37 = vector.load %arg16[%c0_15, %c0_16, %c0_17] : memref<1x112x16xbf16, #tpu.memory_space<vmem>>, vector<1x16x16xbf16>
    tpu.vector_store %arg16[%c0_15, %c0_16, %c0_17], %36 {strides = array<i32>} : memref<1x112x16xbf16, #tpu.memory_space<vmem>>, vector<1x16x16xbf16>,
    %38 = vector.broadcast %31 : vector<1x16x1xi32> to vector<1x16x16xi32>
    %39 = arith.cmpi eq, %12, %38 : vector<1x16x16xi32>
    %cst_18 = arith.constant -3.000000e+30 : f32
    %40 = vector.broadcast %cst_18 : f32 to vector<1x16x16xf32>
    %41 = arith.select %39, %40, %23 : vector<1x16x16xi1>, vector<1x16x16xf32>
    %cst_19 = arith.constant dense<0xFF800000> : vector<1x16xf32>
    %42 = vector.multi_reduction <maximumf>, %41, %cst_19 [2] : vector<1x16x16xf32> to vector<1x16xf32>
    %43 = vector.shape_cast %42 : vector<1x16xf32> to vector<1x16x1xf32>
    %44 = vector.broadcast %43 : vector<1x16x1xf32> to vector<1x16x16xf32>
    %45 = arith.cmpf oeq, %41, %44 : vector<1x16x16xf32>
    %c16_i32_20 = arith.constant 16 : i32
    %46 = vector.broadcast %c16_i32_20 : i32 to vector<1x16x16xi32>
    %47 = arith.select %45, %12, %46 : vector<1x16x16xi1>, vector<1x16x16xi32>
    %cst_21 = arith.constant dense<2147483647> : vector<1x16xi32>
    %48 = vector.multi_reduction <minsi>, %47, %cst_21 [2] : vector<1x16x16xi32> to vector<1x16xi32>
    %49 = vector.shape_cast %48 : vector<1x16xi32> to vector<1x16x1xi32>
    %50 = vector.broadcast %49 : vector<1x16x1xi32> to vector<1x16x16xi32>
    %51 = arith.cmpi eq, %12, %50 : vector<1x16x16xi32>
    %52 = arith.extui %51 : vector<1x16x16xi1> to vector<1x16x16xi32>
    %53 = arith.sitofp %52 : vector<1x16x16xi32> to vector<1x16x16xf32>
    %54 = arith.truncf %53 : vector<1x16x16xf32> to vector<1x16x16xbf16>
    %c0_22 = arith.constant 0 : index
    %c16 = arith.constant 16 : index
    %c0_23 = arith.constant 0 : index
    %55 = vector.load %arg16[%c0_22, %c16, %c0_23] : memref<1x112x16xbf16, #tpu.memory_space<vmem>>, vector<1x16x16xbf16>
    tpu.vector_store %arg16[%c0_22, %c16, %c0_23], %54 {strides = array<i32>} : memref<1x112x16xbf16, #tpu.memory_space<vmem>>, vector<1x16x16xbf16>,
    %56 = vector.broadcast %49 : vector<1x16x1xi32> to vector<1x16x16xi32>
    %57 = arith.cmpi eq, %12, %56 : vector<1x16x16xi32>
    %cst_24 = arith.constant -3.000000e+30 : f32
    %58 = vector.broadcast %cst_24 : f32 to vector<1x16x16xf32>
    %59 = arith.select %57, %58, %41 : vector<1x16x16xi1>, vector<1x16x16xf32>
    %cst_25 = arith.constant dense<0xFF800000> : vector<1x16xf32>
    %60 = vector.multi_reduction <maximumf>, %59, %cst_25 [2] : vector<1x16x16xf32> to vector<1x16xf32>
    %61 = vector.shape_cast %60 : vector<1x16xf32> to vector<1x16x1xf32>
    %62 = vector.broadcast %61 : vector<1x16x1xf32> to vector<1x16x16xf32>
    %63 = arith.cmpf oeq, %59, %62 : vector<1x16x16xf32>
    %c16_i32_26 = arith.constant 16 : i32
    %64 = vector.broadcast %c16_i32_26 : i32 to vector<1x16x16xi32>
    %65 = arith.select %63, %12, %64 : vector<1x16x16xi1>, vector<1x16x16xi32>
    %cst_27 = arith.constant dense<2147483647> : vector<1x16xi32>
    %66 = vector.multi_reduction <minsi>, %65, %cst_27 [2] : vector<1x16x16xi32> to vector<1x16xi32>
    %67 = vector.shape_cast %66 : vector<1x16xi32> to vector<1x16x1xi32>
    %68 = vector.broadcast %67 : vector<1x16x1xi32> to vector<1x16x16xi32>
    %69 = arith.cmpi eq, %12, %68 : vector<1x16x16xi32>
    %70 = arith.extui %69 : vector<1x16x16xi1> to vector<1x16x16xi32>
    %71 = arith.sitofp %70 : vector<1x16x16xi32> to vector<1x16x16xf32>
    %72 = arith.truncf %71 : vector<1x16x16xf32> to vector<1x16x16xbf16>
    %c0_28 = arith.constant 0 : index
    %c32 = arith.constant 32 : index
    %c0_29 = arith.constant 0 : index
    %73 = vector.load %arg16[%c0_28, %c32, %c0_29] : memref<1x112x16xbf16, #tpu.memory_space<vmem>>, vector<1x16x16xbf16>
    tpu.vector_store %arg16[%c0_28, %c32, %c0_29], %72 {strides = array<i32>} : memref<1x112x16xbf16, #tpu.memory_space<vmem>>, vector<1x16x16xbf16>,
    %74 = vector.broadcast %67 : vector<1x16x1xi32> to vector<1x16x16xi32>
    %75 = arith.cmpi eq, %12, %74 : vector<1x16x16xi32>
    %cst_30 = arith.constant -3.000000e+30 : f32
    %76 = vector.broadcast %cst_30 : f32 to vector<1x16x16xf32>
    %77 = arith.select %75, %76, %59 : vector<1x16x16xi1>, vector<1x16x16xf32>
    %cst_31 = arith.constant dense<0xFF800000> : vector<1x16xf32>
    %78 = vector.multi_reduction <maximumf>, %77, %cst_31 [2] : vector<1x16x16xf32> to vector<1x16xf32>
    %79 = vector.shape_cast %78 : vector<1x16xf32> to vector<1x16x1xf32>
    %80 = vector.broadcast %79 : vector<1x16x1xf32> to vector<1x16x16xf32>
    %81 = arith.cmpf oeq, %77, %80 : vector<1x16x16xf32>
    %c16_i32_32 = arith.constant 16 : i32
    %82 = vector.broadcast %c16_i32_32 : i32 to vector<1x16x16xi32>
    %83 = arith.select %81, %12, %82 : vector<1x16x16xi1>, vector<1x16x16xi32>
    %cst_33 = arith.constant dense<2147483647> : vector<1x16xi32>
    %84 = vector.multi_reduction <minsi>, %83, %cst_33 [2] : vector<1x16x16xi32> to vector<1x16xi32>
    %85 = vector.shape_cast %84 : vector<1x16xi32> to vector<1x16x1xi32>
    %86 = vector.broadcast %85 : vector<1x16x1xi32> to vector<1x16x16xi32>
    %87 = arith.cmpi eq, %12, %86 : vector<1x16x16xi32>
    %88 = arith.extui %87 : vector<1x16x16xi1> to vector<1x16x16xi32>
    %89 = arith.sitofp %88 : vector<1x16x16xi32> to vector<1x16x16xf32>
    %90 = arith.truncf %89 : vector<1x16x16xf32> to vector<1x16x16xbf16>
    %c0_34 = arith.constant 0 : index
    %c48 = arith.constant 48 : index
    %c0_35 = arith.constant 0 : index
    %91 = vector.load %arg16[%c0_34, %c48, %c0_35] : memref<1x112x16xbf16, #tpu.memory_space<vmem>>, vector<1x16x16xbf16>
    tpu.vector_store %arg16[%c0_34, %c48, %c0_35], %90 {strides = array<i32>} : memref<1x112x16xbf16, #tpu.memory_space<vmem>>, vector<1x16x16xbf16>,
    %92 = vector.broadcast %85 : vector<1x16x1xi32> to vector<1x16x16xi32>
    %93 = arith.cmpi eq, %12, %92 : vector<1x16x16xi32>
    %cst_36 = arith.constant -3.000000e+30 : f32
    %94 = vector.broadcast %cst_36 : f32 to vector<1x16x16xf32>
    %95 = arith.select %93, %94, %77 : vector<1x16x16xi1>, vector<1x16x16xf32>
    %cst_37 = arith.constant dense<0xFF800000> : vector<1x16xf32>
    %96 = vector.multi_reduction <maximumf>, %95, %cst_37 [2] : vector<1x16x16xf32> to vector<1x16xf32>
    %97 = vector.shape_cast %96 : vector<1x16xf32> to vector<1x16x1xf32>
    %98 = vector.broadcast %97 : vector<1x16x1xf32> to vector<1x16x16xf32>
    %99 = arith.cmpf oeq, %95, %98 : vector<1x16x16xf32>
    %c16_i32_38 = arith.constant 16 : i32
    %100 = vector.broadcast %c16_i32_38 : i32 to vector<1x16x16xi32>
    %101 = arith.select %99, %12, %100 : vector<1x16x16xi1>, vector<1x16x16xi32>
    %cst_39 = arith.constant dense<2147483647> : vector<1x16xi32>
    %102 = vector.multi_reduction <minsi>, %101, %cst_39 [2] : vector<1x16x16xi32> to vector<1x16xi32>
    %103 = vector.shape_cast %102 : vector<1x16xi32> to vector<1x16x1xi32>
    %104 = vector.broadcast %103 : vector<1x16x1xi32> to vector<1x16x16xi32>
    %105 = arith.cmpi eq, %12, %104 : vector<1x16x16xi32>
    %106 = arith.extui %105 : vector<1x16x16xi1> to vector<1x16x16xi32>
    %107 = arith.sitofp %106 : vector<1x16x16xi32> to vector<1x16x16xf32>
    %108 = arith.truncf %107 : vector<1x16x16xf32> to vector<1x16x16xbf16>
    %c0_40 = arith.constant 0 : index
    %c64 = arith.constant 64 : index
    %c0_41 = arith.constant 0 : index
    %109 = vector.load %arg16[%c0_40, %c64, %c0_41] : memref<1x112x16xbf16, #tpu.memory_space<vmem>>, vector<1x16x16xbf16>
    tpu.vector_store %arg16[%c0_40, %c64, %c0_41], %108 {strides = array<i32>} : memref<1x112x16xbf16, #tpu.memory_space<vmem>>, vector<1x16x16xbf16>,
    %110 = vector.broadcast %103 : vector<1x16x1xi32> to vector<1x16x16xi32>
    %111 = arith.cmpi eq, %12, %110 : vector<1x16x16xi32>
    %cst_42 = arith.constant -3.000000e+30 : f32
    %112 = vector.broadcast %cst_42 : f32 to vector<1x16x16xf32>
    %113 = arith.select %111, %112, %95 : vector<1x16x16xi1>, vector<1x16x16xf32>
    %cst_43 = arith.constant dense<0xFF800000> : vector<1x16xf32>
    %114 = vector.multi_reduction <maximumf>, %113, %cst_43 [2] : vector<1x16x16xf32> to vector<1x16xf32>
    %115 = vector.shape_cast %114 : vector<1x16xf32> to vector<1x16x1xf32>
    %116 = vector.broadcast %115 : vector<1x16x1xf32> to vector<1x16x16xf32>
    %117 = arith.cmpf oeq, %113, %116 : vector<1x16x16xf32>
    %c16_i32_44 = arith.constant 16 : i32
    %118 = vector.broadcast %c16_i32_44 : i32 to vector<1x16x16xi32>
    %119 = arith.select %117, %12, %118 : vector<1x16x16xi1>, vector<1x16x16xi32>
    %cst_45 = arith.constant dense<2147483647> : vector<1x16xi32>
    %120 = vector.multi_reduction <minsi>, %119, %cst_45 [2] : vector<1x16x16xi32> to vector<1x16xi32>
    %121 = vector.shape_cast %120 : vector<1x16xi32> to vector<1x16x1xi32>
    %122 = vector.broadcast %121 : vector<1x16x1xi32> to vector<1x16x16xi32>
    %123 = arith.cmpi eq, %12, %122 : vector<1x16x16xi32>
    %124 = arith.extui %123 : vector<1x16x16xi1> to vector<1x16x16xi32>
    %125 = arith.sitofp %124 : vector<1x16x16xi32> to vector<1x16x16xf32>
    %126 = arith.truncf %125 : vector<1x16x16xf32> to vector<1x16x16xbf16>
    %c0_46 = arith.constant 0 : index
    %c80 = arith.constant 80 : index
    %c0_47 = arith.constant 0 : index
    %127 = vector.load %arg16[%c0_46, %c80, %c0_47] : memref<1x112x16xbf16, #tpu.memory_space<vmem>>, vector<1x16x16xbf16>
    tpu.vector_store %arg16[%c0_46, %c80, %c0_47], %126 {strides = array<i32>} : memref<1x112x16xbf16, #tpu.memory_space<vmem>>, vector<1x16x16xbf16>,
    %128 = vector.broadcast %121 : vector<1x16x1xi32> to vector<1x16x16xi32>
    %129 = arith.cmpi eq, %12, %128 : vector<1x16x16xi32>
    %cst_48 = arith.constant -3.000000e+30 : f32
    %130 = vector.broadcast %cst_48 : f32 to vector<1x16x16xf32>
    %131 = arith.select %129, %130, %113 : vector<1x16x16xi1>, vector<1x16x16xf32>
    %cst_49 = arith.constant dense<0xFF800000> : vector<1x16xf32>
    %132 = vector.multi_reduction <maximumf>, %131, %cst_49 [2] : vector<1x16x16xf32> to vector<1x16xf32>
    %133 = vector.shape_cast %132 : vector<1x16xf32> to vector<1x16x1xf32>
    %134 = vector.broadcast %133 : vector<1x16x1xf32> to vector<1x16x16xf32>
    %135 = arith.cmpf oeq, %131, %134 : vector<1x16x16xf32>
    %c16_i32_50 = arith.constant 16 : i32
    %136 = vector.broadcast %c16_i32_50 : i32 to vector<1x16x16xi32>
    %137 = arith.select %135, %12, %136 : vector<1x16x16xi1>, vector<1x16x16xi32>
    %cst_51 = arith.constant dense<2147483647> : vector<1x16xi32>
    %138 = vector.multi_reduction <minsi>, %137, %cst_51 [2] : vector<1x16x16xi32> to vector<1x16xi32>
    %139 = vector.shape_cast %138 : vector<1x16xi32> to vector<1x16x1xi32>
    %140 = vector.broadcast %139 : vector<1x16x1xi32> to vector<1x16x16xi32>
    %141 = arith.cmpi eq, %12, %140 : vector<1x16x16xi32>
    %142 = arith.extui %141 : vector<1x16x16xi1> to vector<1x16x16xi32>
    %143 = arith.sitofp %142 : vector<1x16x16xi32> to vector<1x16x16xf32>
    %144 = arith.truncf %143 : vector<1x16x16xf32> to vector<1x16x16xbf16>
    %c0_52 = arith.constant 0 : index
    %c96 = arith.constant 96 : index
    %c0_53 = arith.constant 0 : index
    %145 = vector.load %arg16[%c0_52, %c96, %c0_53] : memref<1x112x16xbf16, #tpu.memory_space<vmem>>, vector<1x16x16xbf16>
    tpu.vector_store %arg16[%c0_52, %c96, %c0_53], %144 {strides = array<i32>} : memref<1x112x16xbf16, #tpu.memory_space<vmem>>, vector<1x16x16xbf16>,
    %146 = vector.shape_cast %2 : vector<1x16x4xbf16> to vector<16x4xbf16>
    %c0_54 = arith.constant 0 : index
    %c0_55 = arith.constant 0 : index
    %147 = vector.load %arg4[%c0_54, %c0_55] : memref<4x96xbf16, #tpu.memory_space<vmem>>, vector<4x96xbf16>
    %cst_56 = arith.constant dense<0.000000e+00> : vector<16x96xf32>
    %148 = tpu.matmul %146, %147, %cst_56 {dimension_numbers = #tpu.dot_dimension_numbers<[1], [0], [0], [1], [0, 0, 1, 1], [], []>} : vector<16x4xbf16>, vector<4x96xbf16>, vector<16x96xf32> -> vector<16x96xf32>
    %149 = vector.extract_strided_slice %148 {offsets = [0, 0], sizes = [16, 32], strides = [1, 1]} : vector<16x96xf32> to vector<16x32xf32>
    %150 = vector.shape_cast %149 : vector<16x32xf32> to vector<1x1x16x32xf32>
    %151 = vector.extract_strided_slice %148 {offsets = [0, 32], sizes = [16, 32], strides = [1, 1]} : vector<16x96xf32> to vector<16x32xf32>
    %152 = arith.truncf %151 : vector<16x32xf32> to vector<16x32xbf16>
    %153 = vector.shape_cast %152 : vector<16x32xbf16> to vector<1x16x32xbf16>
    %154 = vector.extract_strided_slice %148 {offsets = [0, 64], sizes = [16, 32], strides = [1, 1]} : vector<16x96xf32> to vector<16x32xf32>
    %c0_57 = arith.constant 0 : index
    %c0_58 = arith.constant 0 : index
    %155 = vector.load %arg13[%c0_57, %c0_58] : memref<1x32xf32, #tpu.memory_space<vmem>>, vector<1x32xf32>
    %156 = vector.broadcast %155 : vector<1x32xf32> to vector<16x32xf32>
    %157 = arith.mulf %154, %156 : vector<16x32xf32>
    %c0_59 = arith.constant 0 : index
    %c0_60 = arith.constant 0 : index
    %158 = vector.load %arg14[%c0_59, %c0_60] : memref<1x32xf32, #tpu.memory_space<vmem>>, vector<1x32xf32>
    %159 = vector.broadcast %158 : vector<1x32xf32> to vector<16x32xf32>
    %160 = arith.addf %157, %159 : vector<16x32xf32>
    %c0_61 = arith.constant 0 : index
    %c0_62 = arith.constant 0 : index
    %c0_63 = arith.constant 0 : index
    %161 = vector.load %arg16[%c0_61, %c0_62, %c0_63] : memref<1x112x16xbf16, #tpu.memory_space<vmem>>, vector<1x112x16xbf16>
    "tpu.trace_start"() <{level = 10 : i32, message = "bsp,bpc->bsc"}> : () -> ()
    %cst_64 = arith.constant dense<0.000000e+00> : vector<1x112x32xf32>
    %162 = tpu.matmul %161, %153, %cst_64 {dimension_numbers = #tpu.dot_dimension_numbers<[2], [1], [1], [2], [0, 0, 0, 1, 1, 2], [0], [0]>} : vector<1x112x16xbf16>, vector<1x16x32xbf16>, vector<1x112x32xf32> -> vector<1x112x32xf32>
    "tpu.trace_stop"() : () -> ()
    %163 = vector.shape_cast %162 : vector<1x112x32xf32> to vector<1x7x16x32xf32>
    %164 = vector.broadcast %150 : vector<1x1x16x32xf32> to vector<1x7x16x32xf32>
    %165 = arith.addf %163, %164 : vector<1x7x16x32xf32>
    %c0_65 = arith.constant 0 : index
    %c0_66 = arith.constant 0 : index
    %166 = vector.load %arg5[%c0_65, %c0_66] : memref<1x32xf32, #tpu.memory_space<vmem>>, vector<1x32xf32>
    %167 = vector.shape_cast %166 : vector<1x32xf32> to vector<1x1x1x32xf32>
    %168 = vector.broadcast %167 : vector<1x1x1x32xf32> to vector<1x7x16x32xf32>
    %169 = arith.mulf %165, %168 : vector<1x7x16x32xf32>
    %c0_67 = arith.constant 0 : index
    %c0_68 = arith.constant 0 : index
    %170 = vector.load %arg6[%c0_67, %c0_68] : memref<1x32xf32, #tpu.memory_space<vmem>>, vector<1x32xf32>
    %171 = vector.shape_cast %170 : vector<1x32xf32> to vector<1x1x1x32xf32>
    %172 = vector.broadcast %171 : vector<1x1x1x32xf32> to vector<1x7x16x32xf32>
    %173 = arith.addf %169, %172 : vector<1x7x16x32xf32>
    %cst_69 = arith.constant 0.000000e+00 : f32
    %174 = vector.broadcast %cst_69 : f32 to vector<1x7x16x32xf32>
    %175 = arith.maximumf %173, %174 : vector<1x7x16x32xf32>
    %176 = vector.shape_cast %175 : vector<1x7x16x32xf32> to vector<112x32xf32>
    %177 = arith.truncf %176 : vector<112x32xf32> to vector<112x32xbf16>
    %c0_70 = arith.constant 0 : index
    %c0_71 = arith.constant 0 : index
    %178 = vector.load %arg7[%c0_70, %c0_71] : memref<32x32xbf16, #tpu.memory_space<vmem>>, vector<32x32xbf16>
    %cst_72 = arith.constant dense<0.000000e+00> : vector<112x32xf32>
    %179 = tpu.matmul %177, %178, %cst_72 {dimension_numbers = #tpu.dot_dimension_numbers<[1], [0], [0], [1], [0, 0, 1, 1], [], []>} : vector<112x32xbf16>, vector<32x32xbf16>, vector<112x32xf32> -> vector<112x32xf32>
    %c0_73 = arith.constant 0 : index
    %c0_74 = arith.constant 0 : index
    %180 = vector.load %arg8[%c0_73, %c0_74] : memref<1x32xf32, #tpu.memory_space<vmem>>, vector<1x32xf32>
    %181 = vector.broadcast %180 : vector<1x32xf32> to vector<112x32xf32>
    %182 = arith.mulf %179, %181 : vector<112x32xf32>
    %c0_75 = arith.constant 0 : index
    %c0_76 = arith.constant 0 : index
    %183 = vector.load %arg9[%c0_75, %c0_76] : memref<1x32xf32, #tpu.memory_space<vmem>>, vector<1x32xf32>
    %184 = vector.broadcast %183 : vector<1x32xf32> to vector<112x32xf32>
    %185 = arith.addf %182, %184 : vector<112x32xf32>
    %cst_77 = arith.constant 0.000000e+00 : f32
    %186 = vector.broadcast %cst_77 : f32 to vector<112x32xf32>
    %187 = arith.maximumf %185, %186 : vector<112x32xf32>
    %188 = arith.truncf %187 : vector<112x32xf32> to vector<112x32xbf16>
    %c0_78 = arith.constant 0 : index
    %c0_79 = arith.constant 0 : index
    %189 = vector.load %arg10[%c0_78, %c0_79] : memref<32x32xbf16, #tpu.memory_space<vmem>>, vector<32x32xbf16>
    %cst_80 = arith.constant dense<0.000000e+00> : vector<112x32xf32>
    %190 = tpu.matmul %188, %189, %cst_80 {dimension_numbers = #tpu.dot_dimension_numbers<[1], [0], [0], [1], [0, 0, 1, 1], [], []>} : vector<112x32xbf16>, vector<32x32xbf16>, vector<112x32xf32> -> vector<112x32xf32>
    %c0_81 = arith.constant 0 : index
    %c0_82 = arith.constant 0 : index
    %191 = vector.load %arg11[%c0_81, %c0_82] : memref<1x32xf32, #tpu.memory_space<vmem>>, vector<1x32xf32>
    %192 = vector.broadcast %191 : vector<1x32xf32> to vector<112x32xf32>
    %193 = arith.mulf %190, %192 : vector<112x32xf32>
    %c0_83 = arith.constant 0 : index
    %c0_84 = arith.constant 0 : index
    %194 = vector.load %arg12[%c0_83, %c0_84] : memref<1x32xf32, #tpu.memory_space<vmem>>, vector<1x32xf32>
    %195 = vector.broadcast %194 : vector<1x32xf32> to vector<112x32xf32>
    %196 = arith.addf %193, %195 : vector<112x32xf32>
    %cst_85 = arith.constant 0.000000e+00 : f32
    %197 = vector.broadcast %cst_85 : f32 to vector<112x32xf32>
    %198 = arith.maximumf %196, %197 : vector<112x32xf32>
    %199 = vector.shape_cast %198 : vector<112x32xf32> to vector<1x7x16x32xf32>
    %cst_86 = arith.constant dense<0.000000e+00> : vector<1x16x32xf32>
    %200 = vector.multi_reduction <add>, %199, %cst_86 [1] : vector<1x7x16x32xf32> to vector<1x16x32xf32>
    %201 = vector.shape_cast %200 : vector<1x16x32xf32> to vector<16x32xf32>
    %cst_87 = arith.constant 0.142857149 : f32
    %202 = vector.broadcast %cst_87 : f32 to vector<16x32xf32>
    %203 = arith.mulf %201, %202 : vector<16x32xf32>
    %204 = arith.addf %203, %160 : vector<16x32xf32>
    %cst_88 = arith.constant 0.000000e+00 : f32
    %205 = vector.broadcast %cst_88 : f32 to vector<16x32xf32>
    %206 = arith.maximumf %204, %205 : vector<16x32xf32>
    %207 = vector.shape_cast %0 : vector<1x16x1xf32> to vector<16x1xf32>
    %208 = vector.broadcast %207 : vector<16x1xf32> to vector<16x32xf32>
    %209 = arith.mulf %206, %208 : vector<16x32xf32>
    %210 = vector.shape_cast %209 : vector<16x32xf32> to vector<1x16x32xf32>
    %211 = arith.truncf %210 : vector<1x16x32xf32> to vector<1x16x32xbf16>
    %c0_89 = arith.constant 0 : index
    %c0_90 = arith.constant 0 : index
    %c0_91 = arith.constant 0 : index
    %212 = vector.load %arg15[%c0_89, %c0_90, %c0_91] : memref<1x16x32xbf16, #tpu.memory_space<vmem>>, vector<1x16x32xbf16>
    tpu.vector_store %arg15[%c0_89, %c0_90, %c0_91], %211 {strides = array<i32>} : memref<1x16x32xbf16, #tpu.memory_space<vmem>>, vector<1x16x32xbf16>,
    return
  }
  func.func @transform_0(%arg0: i32) -> (i32, i32, i32) {
    %c0_i32 = arith.constant 0 : i32
    %c0_i32_0 = arith.constant 0 : i32
    %c0_i32_1 = arith.constant 0 : i32
    return %arg0, %c0_i32, %c0_i32_0 : i32, i32, i32
  }
  func.func @transform_1(%arg0: i32) -> (i32, i32, i32) {
    %c0_i32 = arith.constant 0 : i32
    %c0_i32_0 = arith.constant 0 : i32
    %c0_i32_1 = arith.constant 0 : i32
    return %arg0, %c0_i32, %c0_i32_0 : i32, i32, i32
  }
  func.func @transform_2(%arg0: i32) -> (i32, i32, i32) {
    %c0_i32 = arith.constant 0 : i32
    %c0_i32_0 = arith.constant 0 : i32
    %c0_i32_1 = arith.constant 0 : i32
    return %arg0, %c0_i32, %c0_i32_0 : i32, i32, i32
  }
  func.func @transform_3(%arg0: i32) -> (i32, i32) {
    %c0_i32 = arith.constant 0 : i32
    %c0_i32_0 = arith.constant 0 : i32
    %c0_i32_1 = arith.constant 0 : i32
    return %c0_i32, %c0_i32_0 : i32, i32
  }
  func.func @transform_4(%arg0: i32) -> (i32, i32) {
    %c0_i32 = arith.constant 0 : i32
    %c0_i32_0 = arith.constant 0 : i32
    %c0_i32_1 = arith.constant 0 : i32
    return %c0_i32, %c0_i32_0 : i32, i32
  }
  func.func @transform_5(%arg0: i32) -> (i32, i32) {
    %c0_i32 = arith.constant 0 : i32
    %c0_i32_0 = arith.constant 0 : i32
    %c0_i32_1 = arith.constant 0 : i32
    return %c0_i32, %c0_i32_0 : i32, i32
  }
  func.func @transform_6(%arg0: i32) -> (i32, i32) {
    %c0_i32 = arith.constant 0 : i32
    %c0_i32_0 = arith.constant 0 : i32
    %c0_i32_1 = arith.constant 0 : i32
    return %c0_i32, %c0_i32_0 : i32, i32
  }
  func.func @transform_7(%arg0: i32) -> (i32, i32) {
    %c0_i32 = arith.constant 0 : i32
    %c0_i32_0 = arith.constant 0 : i32
    %c0_i32_1 = arith.constant 0 : i32
    return %c0_i32, %c0_i32_0 : i32, i32
  }
  func.func @transform_8(%arg0: i32) -> (i32, i32) {
    %c0_i32 = arith.constant 0 : i32
    %c0_i32_0 = arith.constant 0 : i32
    %c0_i32_1 = arith.constant 0 : i32
    return %c0_i32, %c0_i32_0 : i32, i32
  }
  func.func @transform_9(%arg0: i32) -> (i32, i32) {
    %c0_i32 = arith.constant 0 : i32
    %c0_i32_0 = arith.constant 0 : i32
    %c0_i32_1 = arith.constant 0 : i32
    return %c0_i32, %c0_i32_0 : i32, i32
  }
  func.func @transform_10(%arg0: i32) -> (i32, i32) {
    %c0_i32 = arith.constant 0 : i32
    %c0_i32_0 = arith.constant 0 : i32
    %c0_i32_1 = arith.constant 0 : i32
    return %c0_i32, %c0_i32_0 : i32, i32
  }
  func.func @transform_11(%arg0: i32) -> (i32, i32) {
    %c0_i32 = arith.constant 0 : i32
    %c0_i32_0 = arith.constant 0 : i32
    %c0_i32_1 = arith.constant 0 : i32
    return %c0_i32, %c0_i32_0 : i32, i32
  }
  func.func @transform_12(%arg0: i32) -> (i32, i32) {
    %c0_i32 = arith.constant 0 : i32
    %c0_i32_0 = arith.constant 0 : i32
    %c0_i32_1 = arith.constant 0 : i32
    return %c0_i32, %c0_i32_0 : i32, i32
  }
  func.func @transform_13(%arg0: i32) -> (i32, i32) {
    %c0_i32 = arith.constant 0 : i32
    %c0_i32_0 = arith.constant 0 : i32
    %c0_i32_1 = arith.constant 0 : i32
    return %c0_i32, %c0_i32_0 : i32, i32
  }
  func.func @transform_14(%arg0: i32) -> (i32, i32, i32) {
    %c0_i32 = arith.constant 0 : i32
    %c0_i32_0 = arith.constant 0 : i32
    %c0_i32_1 = arith.constant 0 : i32
    return %arg0, %c0_i32, %c0_i32_0 : i32, i32, i32
  }
}

</mosaic_0001>

<bundles_post_ra>
// kernel: particle_net_forward.7
= control target key start
LH: loop header
LB: loop body
LE: loop exit
PB: predicated region body
PF: predicated region fallthrough
CT: control target
= control target key end

     0   :  { %v383_v1 = vmov 0.0   ;;  %vm384_vm0 = vmmov 0   ;;  %s485_s0 = inlined_call_operand.vmem [shape: f32[2,128], index: 0, kind: input, shape index: {}]   ;;  %s486_s1 = inlined_call_operand.vmem [shape: bf16[128,128], index: 1, kind: input, shape index: {}]   ;;  %s487_s2 = inlined_call_operand.vmem [shape: f32[1,128], index: 2, kind: input, shape index: {}]   ;;  %s488_s3 = inlined_call_operand.vmem [shape: bf16[128,5], index: 3, kind: input, shape index: {}]   ;;  %s489_s4 = inlined_call_operand.vmem [shape: f32[1,5], index: 4, kind: input, shape index: {}]   ;;  %s490_s5 = inlined_call_operand.hbm [shape: f32[2,5], index: 5, kind: output, shape index: {}]  }
   0x1   :  { %v343_v0 = vld [vmem:[%s486_s1] sm:$0xff]   ;;  %300 = vmatprep.subr.bf16.mxu0 %v383_v1  ;;  %320 = vmatprep.subr.bf16.mxu1 %v383_v1  ;;  %v344_v2 = vld [vmem:[%s486_s1 + $0x8] sm:$0xff]   ;;  %v345_v3 = vld [vmem:[%s486_s1 + $0x10] sm:$0xff]  }
   0x2   :  { %301 = vmatpush3.bf16.msra.mxu0 %v343_v0  ;;  %316 = vmatprep.mubr.msk.bf16.mxu0 %vm384_vm0, %v383_v1  ;;  %v351_v4 = vld [vmem:[%s488_s3] sm:$0xff]   ;;  %v346_v5 = vld [vmem:[%s486_s1 + $0x18] sm:$0xff]   ;;  %v352_v6 = vld [vmem:[%s488_s3 + $0x8] sm:$0xff]  }
   0x3   :  { %302 = vmatprep.subr.bf16.mxu0 %v383_v1  ;;  %336 = vmatprep.mubr.msk.bf16.mxu1 %vm384_vm0, %v383_v1  ;;  %v347_v7 = vld [vmem:[%s486_s1 + $0x20] sm:$0xff]   ;;  %v353_v8 = vld [vmem:[%s488_s3 + $0x10] sm:$0xff]  }
   0x4   :  { %321 = vmatpush3.bf16.msra.mxu1 %v351_v4 }
   0x5   :  { %322 = vmatprep.subr.bf16.mxu1 %v383_v1 }
   0x6   :  { %303 = vmatpush3.bf16.msra.mxu0 %v344_v2 }
   0x7   :  { %304 = vmatprep.subr.bf16.mxu0 %v383_v1 }
   0x8   :  { %323 = vmatpush3.bf16.msra.mxu1 %v352_v6 }
   0x9   :  { %324 = vmatprep.subr.bf16.mxu1 %v383_v1 }
   0xa   :  { %305 = vmatpush3.bf16.msra.mxu0 %v345_v3 }
   0xb   :  { %306 = vmatprep.subr.bf16.mxu0 %v383_v1 }
   0xe   :  { %307 = vmatpush3.bf16.msra.mxu0 %v346_v5 }
   0xf   :  { %308 = vmatprep.subr.bf16.mxu0 %v383_v1 }
  0x10   :  { %10 = vsyncpa [#allocation3], 0  ;;  %v348_v9 = vld [vmem:[%s486_s1 + $0x28] sm:$0xff]   ;;  %325 = vmatpush3.bf16.msra.mxu1 %v353_v8  ;;  %v354_v10 = vld [vmem:[%s488_s3 + $0x18] sm:$0xff]   ;;  %s385_s29 = smov [#allocation2]   ;;  %vm248_vm1 = vcmask 33792  }
  0x11   :  { %326 = vmatprep.subr.bf16.mxu1 %v383_v1  ;;  %v349_v11 = vld [vmem:[%s486_s1 + $0x30] sm:$0xff]   ;;  %v355_v12 = vld [vmem:[%s488_s3 + $0x20] sm:$0xff]   ;;  %v350_v13 = vld [vmem:[%s486_s1 + $0x38] sm:$0xff]   ;;  %s256_s30 = sshll.u32 %s385_s29, 4  ;;  %s257_s30 = int_to_ptr.vmem [resolvable:$true] %s256_s30 }
  0x12   :  { %309 = vmatpush3.bf16.msra.mxu0 %v347_v7  ;;  %v22_v14 = vld [vmem:[%s485_s0] sm:$0x3]  ;;  %v356_v15 = vld [vmem:[%s488_s3 + $0x28] sm:$0xff]   ;;  %v357_v17 = vld [vmem:[%s488_s3 + $0x30] sm:$0xff]   ;;  %p364_p1 = scmp.lt.s32.totalorder %s257_s30, %s257_s30 }
  0x13   :  { %310 = vmatprep.subr.bf16.mxu0 %v383_v1  ;;  %v23_v16 = vpack.c.bf16 %v22_v14, %v22_v14  ;;  %v358_v18 = vld [vmem:[%s488_s3 + $0x38] sm:$0xff]   ;;  %v264_v19 = vld [vmem:[%s487_s2] ss:$0 sm:$0xff]  ;;  %s359_s2 = scalar_lea.vmem %s257_s30, 32 }
  0x14   :  { %327 = vmatpush3.bf16.msra.mxu1 %v354_v10  ;;  %v273_v27 = vld [vmem:[%s489_s4] ss:$0 sm:$0xff]  ;;  %p360_p0 = scmp.ne.s32.totalorder %s257_s30, %s359_s2  ;;  %p365_p2 = scmp.lt.s32.totalorder %s359_s2, %s359_s2 }
  0x15   :  { %328 = vmatprep.subr.bf16.mxu1 %v383_v1 }
  0x16   :  { %311 = vmatpush3.bf16.msra.mxu0 %v348_v9  ;;  %p366_p3 = por %p365_p2, %p364_p1 }
  0x17   :  { %312 = vmatprep.subr.bf16.mxu0 %v383_v1 }
  0x18   :  { %329 = vmatpush3.bf16.msra.mxu1 %v355_v12  ;;  %p367_p4 = pnand %p366_p3, %p360_p0 }
  0x19   :  { %330 = vmatprep.subr.bf16.mxu1 %v383_v1 }
  0x1a   :  { %313 = vmatpush3.bf16.msra.mxu0 %v349_v11 }
  0x1b   :  { %314 = vmatprep.subr.bf16.mxu0 %v383_v1 }
  0x1c   :  { %331 = vmatpush3.bf16.msra.mxu1 %v356_v15 }
  0x1d   :  { %332 = vmatprep.subr.bf16.mxu1 %v383_v1 }
  0x1e   :  { %315 = vmatpush3.bf16.msra.mxu0 %v350_v13 }
  0x20   :  { %333 = vmatpush3.bf16.msra.mxu1 %v357_v17 }
  0x21   :  { %317 = vmatmul.mubr.bf16.vlgmr.msra.gmra.mrb[0].mxu0 %v23_v16  ;;  %334 = vmatprep.subr.bf16.mxu1 %v383_v1 }
  0x24   :  { %335 = vmatpush3.bf16.msra.mxu1 %v358_v18 }
  0xf4   :  { %v129_v20 = vpop.f32.mrb[0].mxu0 }
  0xf5   :  { %v130_v21 = vadd.f32 %v264_v19, %v129_v20  ;;  %v318_v22 = vpop.f32.mrb[1].mxu0 }
  0xf6   :  { %v132_v23 = vpop.f32.mrb[2].mxu0 }
  0xf7   :  { %v135_v24 = vmax.f32 %v130_v21, 0.0  ;;  %v319_v25 = vpop.f32.mrb[3].mxu0 }
  0xf9   :  { %v136_v26 = vpack.c.bf16 %v135_v24, %v135_v24 }
  0xfb   :  { %337 = vmatmul.mubr.bf16.vlgmr.msra.gmra.mrb[0].mxu1 %v136_v26 }
 0x1ce   :  { %v242_v28 = vpop.f32.mrb[0].mxu1 }
 0x1cf   :  { %v243_v29 = vadd.f32 %v273_v27, %v242_v28  ;;  %v338_v30 = vpop.f32.mrb[1].mxu1 }
 0x1d0   :  { %v245_v31 = vpop.f32.mrb[2].mxu1 }
 0x1d1   :  { %v339_v32 = vpop.f32.mrb[3].mxu1  ;;  %249 = vst.msk [vmem:[#allocation2] sm:$0x3] %vm248_vm1, %v243_v29 }
 0x1d2   :  { %370 = shalt.err (!%p367_p4)
}
 0x1d3   :  { %s371_s4 = scalar_lea.hbm %s490_s5, 32 }
 0x1d4   :  { %p372_p5 = scmp.ne.s32.totalorder %s490_s5, %s371_s4  ;;  %p375_p6 = scmp.lt.u32.totalorder %s371_s4, %s490_s5 }
 0x1d6   :  { %p377_p7 = pnand %p375_p6, %p372_p5 }
 0x1d8   :  { %380 = shalt.err (!%p377_p7)
}
 0x1d9   :  { %259 = dma.vmem_to_hbm [thread:$0]  %s257_s30, 32, %s490_s5, [#allocation3]  }
 0x1da   :  { %381 = dma.done.wait [#allocation3], 32  }
 0x1db   :  { %382 = vsyncadd [#allocation3], 4294967264 }
 0x1dc   :  { %263 = vsyncpa [#allocation3], 1 }

// kernel: particle_net_forward.6
= control target key start
LH: loop header
LB: loop body
LE: loop exit
PB: predicated region body
PF: predicated region fallthrough
CT: control target
= control target key end

     0   :  { %s731_s24 = smov 0   ;;  %s783_s0 = inlined_call_operand.vmem [shape: bf16[2,16,32], index: 0, kind: input, shape index: {}]   ;;  %s784_s1 = inlined_call_operand.vmem [shape: bf16[2,16,64], index: 1, kind: input, shape index: {}]   ;;  %s785_s2 = inlined_call_operand.vmem [shape: f32[2,16,1], index: 2, kind: input, shape index: {}]   ;;  %s786_s3 = inlined_call_operand.vmem [shape: bf16[32,128], index: 3, kind: input, shape index: {}]   ;;  %s787_s4 = inlined_call_operand.vmem [shape: bf16[64,128], index: 4, kind: input, shape index: {}]   ;;  %s788_s5 = inlined_call_operand.vmem [shape: f32[1,128], index: 5, kind: input, shape index: {}]   ;;  %s789_s6 = inlined_call_operand.vmem [shape: f32[1,128], index: 6, kind: input, shape index: {}]   ;;  %s790_s7 = inlined_call_operand.vmem [shape: f32[2,1,128], index: 7, kind: output, shape index: {}]  }
   0x1 LB: > { %s599_s25 = sadd.s32 4294967295, %s686_s24   ;;  %p603_p0 = scmp.ge.s32.totalorder %s686_s24, 1  ;;  %s686_s24 = sphi %s731_s24, %s17_s24  }
   0x2   : > { %p257_p1 = scmp.lt.s32.totalorder %s686_s24, 3 }
   0x4   : > { %p258_p2 = pnand %p603_p0, %p257_p1 }
   0x5   : > { %v670_v0 = vld [vmem:[%s787_s4] sm:$0xff] (!%p258_p2)   ;;  %v688_v1 = vmov (!%p258_p2), 0.0   ;;  %v671_v2 = vld [vmem:[%s787_s4 + $0x8] sm:$0xff] (!%p258_p2)   ;;  %vm689_vm0 = vmmov (!%p258_p2), 0   ;;  %p297_p3 = scmp.lt.s32.totalorder (!%p258_p2), %s599_s25, 1  ;;  %v673_v5 = vld [vmem:[%s787_s4 + $0x10] sm:$0xff] (!%p258_p2)  }
   0x6   : > { %261 = sbr.rel (%p258_p2) target bundleno = 263 (0x107), region = 48  ;;  %635 = vmatprep.subr.bf16.mxu1 (!%p258_p2), %v688_v1  ;;  %647 = vmatprep.subr.bf16.mxu0 (!%p258_p2), %v688_v1  ;;  %v672_v3 = vld [vmem:[%s786_s3] sm:$0xff] (!%p258_p2)   ;;  %v674_v4 = vld [vmem:[%s786_s3 + $0x8] sm:$0xff] (!%p258_p2)   ;;  %vm423_vm1 = vcmask (!%p258_p2), 261120   ;;  %v690_v6 = vmov (!%p258_p2), 0   ;;  %vm509_vm2 = vcmask (!%p258_p2), 7168  }
   0x7   : > { %636 = vmatpush3.bf16.msra.mxu1 (!%p258_p2), %v670_v0  ;;  %651 = vmatprep.mubr.msk.bf16.mxu0 (!%p258_p2), %vm689_vm0, %v688_v1  ;;  %v675_v8 = vld [vmem:[%s787_s4 + $0x18] sm:$0xff] (!%p258_p2)   ;;  %vm361_vm3 = vcmask (!%p258_p2), 523264   ;;  %v620_v27 = vld [vmem:[%s788_s5] ss:$0 sm:$0xff] (!%p258_p2) }
   0x8   : > { %637 = vmatprep.subr.bf16.mxu1 (!%p258_p2), %v688_v1  ;;  %643 = vmatprep.mubr.msk.bf16.mxu1 (!%p258_p2), %vm689_vm0, %v688_v1  ;;  %v621_v30 = vld [vmem:[%s789_s6] ss:$0 sm:$0xff] (!%p258_p2) }
   0x9   : > { %648 = vmatpush3.bf16.msra.mxu0 (!%p258_p2), %v672_v3  ;;  %668 = vset.pattern.permute.xlu0 (!%p258_p2), %v690_v6 }
   0xa   : > { %649 = vmatprep.subr.bf16.mxu0 (!%p258_p2), %v688_v1  ;;  %669 = vset.pattern.permute.xlu1 (!%p258_p2), %v690_v6 }
   0xb   : > { %638 = vmatpush3.bf16.msra.mxu1 (!%p258_p2), %v671_v2 }
   0xc   : > { %639 = vmatprep.subr.bf16.mxu1 (!%p258_p2), %v688_v1 }
   0xd   : > { %s792_s25 = smov (!%p297_p3, %s599_s25), 1  ;;  %650 = vmatpush3.bf16.msra.mxu0 %v674_v4 }
   0xe   : > { %s624_s13 = sshll.u32 %s792_s25, 3  ;;  %s626_s14 = sshll.u32 %s792_s25, 4 }
   0xf   : > { %s301_s17 = scalar_lea.vmem %s783_s0, %s624_s13  ;;  %s306_s20 = scalar_lea.vmem %s784_s1, %s624_s13  ;;  %640 = vmatpush3.bf16.msra.mxu1 %v673_v5 }
  0x10   : > { %v676_v7 = vld [vmem:[%s301_s17] sm:$0xff]   ;;  %s311_s23 = scalar_lea.vmem %s785_s2, %s626_s14  ;;  %641 = vmatprep.subr.bf16.mxu1 %v688_v1  ;;  %s314_s11 = scalar_lea.vmem %s790_s7, %s792_s25 }
  0x11   : > { %v488_v9 = vld [vmem:[%s311_s23] sm:$0xff]  ;;  %v489_v10 = vld [vmem:[%s311_s23 + $0x8] sm:$0xff]  ;;  %652 = vmatmul.mubr.msk.bf16.vlgmr.msra.gmra.mrb[0].mxu0 %vm423_vm1, %v676_v7 }
  0x12   : > { %v510_v11 = vsel %vm509_vm2, %v488_v9, 0.0  ;;  %v511_v12 = vsel %vm509_vm2, %v489_v10, 0.0  ;;  %492 = vperm.xlu0 %668, %v488_v9   ;;  %v677_v14 = vld [vmem:[%s306_s20] sm:$0xff]  }
  0x13   : > { %v512_v13 = vadd.f32 %v511_v12, %v510_v11  ;;  %642 = vmatpush3.bf16.msra.mxu1 %v675_v8 }
  0x15   : > { %v513_v15 = vrot.slane %v512_v13, 4 }
  0x16   : > { %497 = vperm.xlu0 %668, %v489_v10   ;;  %644 = vmatmul.mubr.msk.bf16.vlgmr.msra.gmra.mrb[0].mxu1 %vm361_vm3, %v677_v14 }
  0x17   : > { %v514_v16 = vadd.f32 %v513_v15, %v512_v13 }
  0x19   : > { %v515_v17 = vrot.slane %v514_v16, 2 }
  0x1b   : > { %v516_v18 = vadd.f32 %v515_v17, %v514_v16 }
  0x1d   : > { %v517_v19 = vrot.slane %v516_v18, 1 }
  0x1f   : > { %v518_v20 = vadd.f32 %v517_v19, %v516_v18 }
  0x21   : > { %v519_v21 = vmax.f32 %v518_v20, 1.0 }
  0x23   : > { %522 = vperm.xlu1 %669, %v519_v21  }
  0x91   : > { %v493_v35 = vpop.permute.xlu0 %492 }
  0x95   : > { %v498_v41 = vpop.permute.xlu0 %497 }
  0xa2   : > { %v523_v44 = vpop.permute.xlu1 %522 }
  0xa3   : > { %678 = vrcp.f32 %v523_v44 }
  0xad   : > { %v679_v51 = vpop.eup %678 }
  0xe4   : > { %v461_v22 = vpop.f32.mrb[0].mxu0 }
  0xe5   : > { %v653_v23 = vpop.f32.mrb[1].mxu0 }
  0xe6   : > { %v464_v24 = vpop.f32.mrb[2].mxu0 }
  0xe7   : > { %v654_v25 = vpop.f32.mrb[3].mxu0 }
  0xe9   : > { %v399_v26 = vpop.f32.mrb[0].mxu1 }
  0xea   : > { %v462_v28 = vadd.f32 %v461_v22, %v399_v26  ;;  %v645_v29 = vpop.f32.mrb[1].mxu1 }
  0xeb   : > { %v402_v31 = vpop.f32.mrb[2].mxu1 }
  0xec   : > { %v475_v32 = vmul.f32 %v620_v27, %v462_v28  ;;  %v465_v33 = vadd.f32 %v464_v24, %v402_v31  ;;  %v646_v34 = vpop.f32.mrb[3].mxu1 }
  0xee   : > { %v484_v36 = vadd.f32 %v621_v30, %v475_v32  ;;  %v476_v37 = vmul.f32 %v620_v27, %v465_v33 }
  0xf0   : > { %v486_v38 = vmax.f32 %v484_v36, 0.0  ;;  %v485_v39 = vadd.f32 %v621_v30, %v476_v37 }
  0xf2   : > { %v487_v40 = vmax.f32 %v485_v39, 0.0  ;;  %v500_v42 = vmul.f32 %v493_v35, %v486_v38 }
  0xf4   : > { %v501_v43 = vmul.f32 %v498_v41, %v487_v40 }
  0xf6   : > { %v502_v45 = vadd.f32 %v501_v43, %v500_v42 }
  0xf8   : > { %v503_v46 = vrot.slane %v502_v45, 4 }
  0xfa   : > { %v504_v47 = vadd.f32 %v503_v46, %v502_v45 }
  0xfc   : > { %v505_v48 = vrot.slane %v504_v47, 2 }
  0xfe   : > { %v506_v49 = vadd.f32 %v505_v48, %v504_v47 }
 0x100   : > { %v507_v50 = vrot.slane %v506_v49, 1 }
 0x102   : > { %v508_v52 = vadd.f32 %v507_v50, %v506_v49 }
 0x104   : > { %v526_v53 = vmul.f32 %v679_v51, %v508_v52 }
 0x106   : > { %527 = vst [vmem:[%s314_s11] sm:$0x1] %v526_v53 }
 0x107 PF: > { %s17_s24 = sadd.s32 1, %s686_s24  }
 0x108   : > { %p14_p4 = scmp.ge.s32.totalorder %s17_s24, 4  }
 0x10a   :  { %16 = sbr.rel (!%p14_p4) target bundleno = 1 (0x1), region = 84 }

// kernel: particle_net_forward.4
= control target key start
LH: loop header
LB: loop body
LE: loop exit
PB: predicated region body
PF: predicated region fallthrough
CT: control target
= control target key end

     0   :  { %s2165_s29 = smov 0   ;;  %s2538_s0 = inlined_call_operand.vmem [shape: f32[2,16,2], index: 0, kind: input, shape index: {}]   ;;  %s2539_s1 = inlined_call_operand.vmem [shape: bf16[2,16,4], index: 1, kind: input, shape index: {}]   ;;  %s2540_s2 = inlined_call_operand.vmem [shape: f32[2,16,1], index: 2, kind: input, shape index: {}]   ;;  %s2541_s3 = inlined_call_operand.vmem [shape: bf16[4,96], index: 3, kind: input, shape index: {}]   ;;  %s2542_s4 = inlined_call_operand.vmem [shape: f32[1,32], index: 4, kind: input, shape index: {}]   ;;  %s2543_s5 = inlined_call_operand.vmem [shape: f32[1,32], index: 5, kind: input, shape index: {}]   ;;  %s2544_s6 = inlined_call_operand.vmem [shape: bf16[32,32], index: 6, kind: input, shape index: {}]   ;;  %s2545_s7 = inlined_call_operand.vmem [shape: f32[1,32], index: 7, kind: input, shape index: {}]   ;;  %s2546_s8 = inlined_call_operand.vmem [shape: f32[1,32], index: 8, kind: input, shape index: {}]   ;;  %s2547_s9 = inlined_call_operand.vmem [shape: bf16[32,32], index: 9, kind: input, shape index: {}]   ;;  %s2548_s10 = inlined_call_operand.vmem [shape: f32[1,32], index: 10, kind: input, shape index: {}]   ;;  %s2549_s11 = inlined_call_operand.vmem [shape: f32[1,32], index: 11, kind: input, shape index: {}]   ;;  %s2550_s12 = inlined_call_operand.vmem [shape: f32[1,32], index: 12, kind: input, shape index: {}]   ;;  %s2551_s13 = inlined_call_operand.vmem [shape: f32[1,32], index: 13, kind: input, shape index: {}]   ;;  %s2552_s14 = inlined_call_operand.vmem [shape: bf16[2,16,32], index: 14, kind: output, shape index: {}]  }
   0x1 LB: > { %s1834_s30 = sadd.s32 4294967295, %s2083_s29   ;;  %p1838_p0 = scmp.ge.s32.totalorder %s2083_s29, 1  ;;  %s2083_s29 = sphi %s2165_s29, %s24_s29  }
   0x2   : > { %p432_p1 = scmp.lt.s32.totalorder %s2083_s29, 3 }
   0x4   : > { %p433_p2 = pnand %p1838_p0, %p432_p1 }
   0x5   : > { %p488_p3 = scmp.lt.s32.totalorder (!%p433_p2), %s1834_s30, 1  ;;  %vm515_vm0 = vcmask (!%p433_p2), 15360   ;;  %v2085_v9 = vmov (!%p433_p2), 0   ;;  %v639_v14 = vlaneseq (!%p433_p2)  ;;  %vm695_vm5 = vcmask (!%p433_p2), 130048   ;;  %s2088_s28 = smov (!%p433_p2), 96  }
   0x6   : > { %436 = sbr.rel (%p433_p2) target bundleno = 4085 (0xff5), region = 76  ;;  %vm2050_vm1 = vmpackc.low (!%p433_p2), %vm515_vm0, %vm515_vm0  ;;  %v2086_v52 = vmov (!%p433_p2), 0.0   ;;  %s2089_s17 = smov (!%p433_p2), 64  }
   0x7   : > { %v640_v16 = vshrl.u32 (!%p433_p2), %v639_v14, 7  ;;  %v2194_v21 = vand.u32 (!%p433_p2), 127, %v639_v14  ;;  %1949 = vmatprep.subr.bf16.mxu1 (!%p433_p2), %v2086_v52 }
   0x9   : > { %v641_v17 = vsub.s32 (!%p433_p2), 0, %v640_v16  ;;  %v649_v25 = vadd.s32 (!%p433_p2), 8, %v640_v16  ;;  %vm691_vm4 = vcmp.eq.s32.totalorder (!%p433_p2), %v2194_v21, %v640_v16 }
   0xb   : > { %vm692_vm6 = vcmp.eq.s32.totalorder (!%p433_p2), %v2194_v21, %v649_v25 }
   0xd   : > { %s2554_s30 = smov (!%p488_p3, %s1834_s30), 1 }
   0xe   : > { %s1904_s15 = sshll.u32 %s2554_s30, 4  ;;  %s1905_s22 = sshll.u32 %s2554_s30, 3 }
   0xf   : > { %s492_s18 = scalar_lea.vmem %s2538_s0, %s1904_s15  ;;  %s502_s21 = scalar_lea.vmem %s2540_s2, %s1904_s15 }
  0x10   : > { %v511_v0 = vld [vmem:[%s492_s18] sm:$0xff]  ;;  %v512_v1 = vld [vmem:[%s492_s18 + $0x8] sm:$0xff]  ;;  %s497_s27 = scalar_lea.vmem %s2539_s1, %s1905_s22  ;;  %s507_s16 = scalar_lea.vmem %s2552_s14, %s1905_s22 }
  0x11   : > { %v597_v2 = vmul.f32 %v511_v0, %v511_v0  ;;  %v598_v3 = vmul.f32 %v512_v1, %v512_v1  ;;  %v2049_v4 = vpack.c.bf16 %v512_v1, %v511_v0  ;;  %1946 = vmatprep.mubr.msk.f32.mxu0 %vm515_vm0, %v511_v0  ;;  %v2185_v5 = vld [vmem:[%s502_s21] sm:$0xff]  ;;  %v2191_v8 = vld [vmem:[%s502_s21 + $0x8] sm:$0xff] }
  0x12   : > { %650 = vxpose.xlu1.b32.start [1/2] (short) (narrow) %v2185_v5, 8 }
  0x13   : > { %v599_v6 = vsel %vm515_vm0, %v597_v2, 0.0  ;;  %2051 = vmatprep.subr.msk.bf16.mxu0 %vm2050_vm1, %v2049_v4  ;;  %v602_v7 = vsel %vm515_vm0, %v598_v3, 0.0 }
  0x14   : > { %600 = vadd.xlane.f32.xlu0 %v599_v6  ;;  %2054 = vmatpush3.bf16.xpose.msk.msra.mxu0 %vm2050_vm1, %v2049_v4 }
  0x15   : > { %1955 = vmatprep.subr.bf16.mxu0 %v2086_v52 }
  0x16   : > { %651 = vxpose.xlu1.b32.end [2/2] (short) (narrow) %v2191_v8, 8 }
  0x18   : > { %603 = vadd.xlane.f32.xlu0 %v602_v7 }
  0x1b   : > { %1947 = vmatmul.mubr.msk.f32.vlgmr.msra.gmra.mrb[0].mxu0 %vm515_vm0, %v512_v1 }
  0x34   : > { %2071 = vset.pattern.permute.xlu1 %v2085_v9 }
  0x92   : > { %v666_v15 = vpop.trf.xlu1 }
  0x93   : > { %vm682_vm2 = vcmp.gt.f32.partialorder %v666_v15, 0.0 }
  0x94   : > { %v683_v18 = vsel %vm682_vm2, 1, %v2085_v9 }
  0x95   : > { %v687_v19 = vrot.slane %v683_v18, %v641_v17 }
  0x97   : > { %vm688_vm3 = vcmp.eq.s32.totalorder %v687_v19, 1 }
  0xa1   : > { %v601_v10 = vpop.xlane.xlu0 %600 }
  0xa2   : > { %607 = vxpose.xlu0.b32.start [1/2] (short) (narrow) %v601_v10, 8 }
  0xa5   : > { %v604_v11 = vpop.xlane.xlu0 %603 }
  0xa6   : > { %608 = vxpose.xlu0.b32.end [2/2] (short) (narrow) %v604_v11, 8 }
  0xcf   : > { %2070 = vset.pattern.permute.xlu0 %v2085_v9 }
  0xee   : > { %v1948_v12 = vpop.f32.mrb[0].mxu0 }
  0xef   : > { %v588_v13 = vpop.f32.mrb[1].mxu0  ;;  %v606_v20 = vmul.f32 2.0, %v1948_v12 }
  0xf0   : > { %v605_v22 = vmul.f32 2.0, %v588_v13 }
 0x122   : > { %v623_v23 = vpop.trf.xlu0 }
 0x123   : > { %v642_v24 = vrot.slane %v623_v23, %v641_v17 }
 0x125   : > { %v643_v26 = vsub.f32 %v605_v22, %v642_v24  ;;  %v644_v27 = vsub.f32 %v606_v20, %v642_v24 }
 0x127   : > { %v689_v28 = vsel %vm688_vm3, %v643_v26, -1e+30  ;;  %v690_v29 = vsel %vm688_vm3, %v644_v27, -1e+30 }
 0x128   : > { %v693_v30 = vsel %vm691_vm4, -3e+30, %v689_v28  ;;  %v694_v32 = vsel %vm692_vm6, -3e+30, %v690_v29 }
 0x129   : > { %v696_v31 = vsel %vm695_vm5, %v693_v30, -inf  ;;  %v699_v33 = vsel %vm695_vm5, %v694_v32, -inf }
 0x12a   : > { %697 = vmax.xlane.f32.xlu1 %v696_v31 }
 0x12e   : > { %700 = vmax.xlane.f32.xlu1 %v699_v33 }
 0x1b7   : > { %v698_v34 = vpop.xlane.xlu1 %697 }
 0x1b8   : > { %vm702_vm7 = vcmp.eq.f32.partialorder %v693_v30, %v698_v34 }
 0x1b9   : > { %v704_v35 = vsel %vm702_vm7, %v2194_v21, 16 }
 0x1ba   : > { %v706_v36 = vsel %vm695_vm5, %v704_v35, 2147483647 }
 0x1bb   : > { %v701_v37 = vpop.xlane.xlu1 %700  ;;  %v708_v38 = vshra.s32 %v706_v36, 16  ;;  %v707_v44 = vand.u32 65535, %v706_v36 }
 0x1bc   : > { %vm703_vm8 = vcmp.eq.f32.partialorder %v694_v32, %v701_v37 }
 0x1bd   : > { %v705_v39 = vsel %vm703_vm8, %v2194_v21, 16  ;;  %v710_v40 = vcvt.s32.f32 %v708_v38  ;;  %v709_v46 = vcvt.s32.f32 %v707_v44 }
 0x1be   : > { %v721_v41 = vsel %vm695_vm5, %v705_v39, 2147483647 }
 0x1bf   : > { %711 = vmin.xlane.f32.xlu1 %v710_v40  ;;  %v723_v42 = vshra.s32 %v721_v41, 16  ;;  %v722_v47 = vand.u32 65535, %v721_v41 }
 0x1c1   : > { %v725_v43 = vcvt.s32.f32 %v723_v42  ;;  %v724_v50 = vcvt.s32.f32 %v722_v47 }
 0x1c3   : > { %726 = vmin.xlane.f32.xlu1 %v725_v43 }
 0x24c   : > { %v712_v45 = vpop.xlane.xlu1 %711 }
 0x24d   : > { %vm713_vm9 = vcmp.eq.f32.partialorder %v710_v40, %v712_v45  ;;  %v718_v53 = vcvt.f32.s32 %v712_v45 }
 0x24e   : > { %v714_v48 = vsel %vm713_vm9, %v709_v46, inf }
 0x24f   : > { %715 = vmin.xlane.f32.xlu0 %v714_v48  ;;  %v719_v55 = vshll.u32 %v718_v53, 16 }
 0x250   : > { %v727_v49 = vpop.xlane.xlu1 %726 }
 0x251   : > { %vm728_vm10 = vcmp.eq.f32.partialorder %v725_v43, %v727_v49  ;;  %v733_v56 = vcvt.f32.s32 %v727_v49 }
 0x252   : > { %v729_v51 = vsel %vm728_vm10, %v724_v50, inf }
 0x253   : > { %730 = vmin.xlane.f32.xlu1 %v729_v51  ;;  %v734_v60 = vshll.u32 %v733_v56, 16 }
 0x2dc   : > { %v716_v54 = vpop.xlane.xlu0 %715 }
 0x2dd   : > { %v717_v57 = vcvt.f32.s32 %v716_v54 }
 0x2df   : > { %v720_v58 = vadd.s32 %v719_v55, %v717_v57 }
 0x2e0   : > { %v731_v59 = vpop.xlane.xlu1 %730 }
 0x2e1   : > { %v732_v61 = vcvt.f32.s32 %v731_v59  ;;  %vm736_vm11 = vcmp.eq.s32.totalorder %v2194_v21, %v720_v58 }
 0x2e2   : > { %v744_v62 = vsel %vm736_vm11, -3e+30, %v693_v30  ;;  %v1851_v1 = vsel %vm736_vm11, 1.0, %v2086_v52 }
 0x2e3   : > { %v735_v63 = vadd.s32 %v734_v60, %v732_v61  ;;  %v746_v0 = vsel %vm695_vm5, %v744_v62, -inf }
 0x2e4   : > { %747 = vmax.xlane.f32.xlu1 %v746_v0 }
 0x2e5   : > { %vm737_vm12 = vcmp.eq.s32.totalorder %v2194_v21, %v735_v63 }
 0x2e6   : > { %v745_v2 = vsel %vm737_vm12, -3e+30, %v694_v32  ;;  %v1852_v3 = vsel %vm737_vm12, 1.0, %v2086_v52 }
 0x2e7   : > { %v749_v4 = vsel %vm695_vm5, %v745_v2, -inf  ;;  %v742_v6 = vpack.c.bf16 %v1852_v3, %v1851_v1 }
 0x2e8   : > { %750 = vmax.xlane.f32.xlu1 %v749_v4 }
 0x2e9   : > { %743 = vst.msk [vmem:[#allocation2] sm:$0xff] %vm695_vm5, %v742_v6 }
 0x371   : > { %v748_v7 = vpop.xlane.xlu1 %747 }
 0x372   : > { %vm752_vm13 = vcmp.eq.f32.partialorder %v744_v62, %v748_v7 }
 0x373   : > { %v754_v9 = vsel %vm752_vm13, %v2194_v21, 16 }
 0x374   : > { %v756_v10 = vsel %vm695_vm5, %v754_v9, 2147483647 }
 0x375   : > { %v751_v11 = vpop.xlane.xlu1 %750  ;;  %v758_v12 = vshra.s32 %v756_v10, 16  ;;  %v757_v18 = vand.u32 65535, %v756_v10 }
 0x376   : > { %vm753_vm14 = vcmp.eq.f32.partialorder %v745_v2, %v751_v11 }
 0x377   : > { %v755_v13 = vsel %vm753_vm14, %v2194_v21, 16  ;;  %v760_v14 = vcvt.s32.f32 %v758_v12  ;;  %v759_v20 = vcvt.s32.f32 %v757_v18 }
 0x378   : > { %v771_v15 = vsel %vm695_vm5, %v755_v13, 2147483647 }
 0x379   : > { %761 = vmin.xlane.f32.xlu1 %v760_v14  ;;  %v773_v16 = vshra.s32 %v771_v15, 16  ;;  %v772_v22 = vand.u32 65535, %v771_v15 }
 0x37b   : > { %v775_v17 = vcvt.s32.f32 %v773_v16  ;;  %v774_v25 = vcvt.s32.f32 %v772_v22 }
 0x37d   : > { %776 = vmin.xlane.f32.xlu1 %v775_v17 }
 0x406   : > { %v762_v19 = vpop.xlane.xlu1 %761 }
 0x407   : > { %vm763_vm15 = vcmp.eq.f32.partialorder %v760_v14, %v762_v19  ;;  %v768_v27 = vcvt.f32.s32 %v762_v19 }
 0x408   : > { %v764_v23 = vsel %vm763_vm15, %v759_v20, inf }
 0x409   : > { %765 = vmin.xlane.f32.xlu1 %v764_v23  ;;  %v769_v29 = vshll.u32 %v768_v27, 16 }
 0x40a   : > { %v777_v24 = vpop.xlane.xlu1 %776 }
 0x40b   : > { %vm778_vm0 = vcmp.eq.f32.partialorder %v775_v17, %v777_v24  ;;  %v783_v30 = vcvt.f32.s32 %v777_v24 }
 0x40c   : > { %v779_v26 = vsel %vm778_vm0, %v774_v25, inf }
 0x40d   : > { %780 = vmin.xlane.f32.xlu1 %v779_v26  ;;  %v784_v34 = vshll.u32 %v783_v30, 16 }
 0x496   : > { %v766_v28 = vpop.xlane.xlu1 %765 }
 0x497   : > { %v767_v31 = vcvt.f32.s32 %v766_v28 }
 0x499   : > { %v770_v32 = vadd.s32 %v769_v29, %v767_v31 }
 0x49a   : > { %v781_v33 = vpop.xlane.xlu1 %780 }
 0x49b   : > { %v782_v35 = vcvt.f32.s32 %v781_v33  ;;  %vm786_vm1 = vcmp.eq.s32.totalorder %v2194_v21, %v770_v32 }
 0x49c   : > { %v794_v36 = vsel %vm786_vm1, -3e+30, %v744_v62  ;;  %v1853_v39 = vsel %vm786_vm1, 1.0, %v2086_v52 }
 0x49d   : > { %v785_v37 = vadd.s32 %v784_v34, %v782_v35  ;;  %v796_v38 = vsel %vm695_vm5, %v794_v36, -inf }
 0x49e   : > { %797 = vmax.xlane.f32.xlu1 %v796_v38 }
 0x49f   : > { %vm787_vm2 = vcmp.eq.s32.totalorder %v2194_v21, %v785_v37 }
 0x4a0   : > { %v795_v40 = vsel %vm787_vm2, -3e+30, %v745_v2  ;;  %v1854_v41 = vsel %vm787_vm2, 1.0, %v2086_v52 }
 0x4a1   : > { %v799_v42 = vsel %vm695_vm5, %v795_v40, -inf  ;;  %v792_v43 = vpack.c.bf16 %v1854_v41, %v1853_v39 }
 0x4a2   : > { %800 = vmax.xlane.f32.xlu1 %v799_v42 }
 0x4a3   : > { %793 = vst.msk [vmem:[#allocation2 + $0x8] sm:$0xff] %vm695_vm5, %v792_v43 }
 0x52b   : > { %v798_v44 = vpop.xlane.xlu1 %797 }
 0x52c   : > { %vm802_vm3 = vcmp.eq.f32.partialorder %v794_v36, %v798_v44 }
 0x52d   : > { %v804_v45 = vsel %vm802_vm3, %v2194_v21, 16 }
 0x52e   : > { %v806_v46 = vsel %vm695_vm5, %v804_v45, 2147483647 }
 0x52f   : > { %v801_v47 = vpop.xlane.xlu1 %800  ;;  %v808_v48 = vshra.s32 %v806_v46, 16  ;;  %v807_v55 = vand.u32 65535, %v806_v46 }
 0x530   : > { %vm803_vm4 = vcmp.eq.f32.partialorder %v795_v40, %v801_v47 }
 0x531   : > { %v805_v49 = vsel %vm803_vm4, %v2194_v21, 16  ;;  %v810_v50 = vcvt.s32.f32 %v808_v48  ;;  %v809_v57 = vcvt.s32.f32 %v807_v55 }
 0x532   : > { %v821_v51 = vsel %vm695_vm5, %v805_v49, 2147483647 }
 0x533   : > { %811 = vmin.xlane.f32.xlu1 %v810_v50  ;;  %v823_v53 = vshra.s32 %v821_v51, 16  ;;  %v822_v58 = vand.u32 65535, %v821_v51 }
 0x535   : > { %v825_v54 = vcvt.s32.f32 %v823_v53  ;;  %v824_v61 = vcvt.s32.f32 %v822_v58 }
 0x537   : > { %826 = vmin.xlane.f32.xlu1 %v825_v54 }
 0x5c0   : > { %v812_v56 = vpop.xlane.xlu1 %811 }
 0x5c1   : > { %vm813_vm6 = vcmp.eq.f32.partialorder %v810_v50, %v812_v56  ;;  %v818_v63 = vcvt.f32.s32 %v812_v56 }
 0x5c2   : > { %v814_v59 = vsel %vm813_vm6, %v809_v57, inf }
 0x5c3   : > { %815 = vmin.xlane.f32.xlu0 %v814_v59  ;;  %v819_v1 = vshll.u32 %v818_v63, 16 }
 0x5c4   : > { %v827_v60 = vpop.xlane.xlu1 %826 }
 0x5c5   : > { %vm828_vm7 = vcmp.eq.f32.partialorder %v825_v54, %v827_v60  ;;  %v833_v2 = vcvt.f32.s32 %v827_v60 }
 0x5c6   : > { %v829_v62 = vsel %vm828_vm7, %v824_v61, inf }
 0x5c7   : > { %830 = vmin.xlane.f32.xlu1 %v829_v62  ;;  %v834_v7 = vshll.u32 %v833_v2, 16 }
 0x650   : > { %v816_v0 = vpop.xlane.xlu0 %815 }
 0x651   : > { %v817_v3 = vcvt.f32.s32 %v816_v0 }
 0x653   : > { %v820_v4 = vadd.s32 %v819_v1, %v817_v3 }
 0x654   : > { %v831_v6 = vpop.xlane.xlu1 %830 }
 0x655   : > { %v832_v9 = vcvt.f32.s32 %v831_v6  ;;  %vm836_vm8 = vcmp.eq.s32.totalorder %v2194_v21, %v820_v4 }
 0x656   : > { %v844_v10 = vsel %vm836_vm8, -3e+30, %v794_v36  ;;  %v1855_v13 = vsel %vm836_vm8, 1.0, %v2086_v52 }
 0x657   : > { %v835_v11 = vadd.s32 %v834_v7, %v832_v9  ;;  %v846_v12 = vsel %vm695_vm5, %v844_v10, -inf }
 0x658   : > { %847 = vmax.xlane.f32.xlu0 %v846_v12 }
 0x659   : > { %vm837_vm9 = vcmp.eq.s32.totalorder %v2194_v21, %v835_v11 }
 0x65a   : > { %v845_v14 = vsel %vm837_vm9, -3e+30, %v795_v40  ;;  %v1856_v15 = vsel %vm837_vm9, 1.0, %v2086_v52  ;;  %vm1054_vm9 = vcmask 1041408  }
 0x65b   : > { %v849_v16 = vsel %vm695_vm5, %v845_v14, -inf  ;;  %v842_v17 = vpack.c.bf16 %v1856_v15, %v1855_v13 }
 0x65c   : > { %850 = vmax.xlane.f32.xlu1 %v849_v16 }
 0x65d   : > { %843 = vst.msk [vmem:[#allocation2 + $0x10] sm:$0xff] %vm695_vm5, %v842_v17 }
 0x6e5   : > { %v848_v18 = vpop.xlane.xlu0 %847 }
 0x6e6   : > { %vm852_vm10 = vcmp.eq.f32.partialorder %v844_v10, %v848_v18 }
 0x6e7   : > { %v854_v19 = vsel %vm852_vm10, %v2194_v21, 16  ;;  %vm2087_vm10 = vmmov 0  }
 0x6e8   : > { %v856_v20 = vsel %vm695_vm5, %v854_v19, 2147483647  ;;  %1951 = vmatprep.mubr.msk.bf16.mxu1 %vm2087_vm10, %v2086_v52  ;;  %1957 = vmatprep.mubr.msk.bf16.mxu0 %vm2087_vm10, %v2086_v52 }
 0x6e9   : > { %v851_v22 = vpop.xlane.xlu1 %850  ;;  %v858_v23 = vshra.s32 %v856_v20, 16  ;;  %v857_v29 = vand.u32 65535, %v856_v20 }
 0x6ea   : > { %vm853_vm11 = vcmp.eq.f32.partialorder %v845_v14, %v851_v22 }
 0x6eb   : > { %v855_v24 = vsel %vm853_vm11, %v2194_v21, 16  ;;  %v860_v25 = vcvt.s32.f32 %v858_v23  ;;  %v859_v31 = vcvt.s32.f32 %v857_v29  ;;  %vm1050_vm11 = vcmask 31744  }
 0x6ec   : > { %v871_v26 = vsel %vm695_vm5, %v855_v24, 2147483647 }
 0x6ed   : > { %861 = vmin.xlane.f32.xlu0 %v860_v25  ;;  %v873_v27 = vshra.s32 %v871_v26, 16  ;;  %v872_v32 = vand.u32 65535, %v871_v26 }
 0x6ef   : > { %v875_v28 = vcvt.s32.f32 %v873_v27  ;;  %v874_v35 = vcvt.s32.f32 %v872_v32 }
 0x6f1   : > { %876 = vmin.xlane.f32.xlu1 %v875_v28 }
 0x77a   : > { %v862_v30 = vpop.xlane.xlu0 %861 }
 0x77b   : > { %vm863_vm12 = vcmp.eq.f32.partialorder %v860_v25, %v862_v30  ;;  %v868_v37 = vcvt.f32.s32 %v862_v30 }
 0x77c   : > { %v864_v33 = vsel %vm863_vm12, %v859_v31, inf }
 0x77d   : > { %865 = vmin.xlane.f32.xlu0 %v864_v33  ;;  %v869_v39 = vshll.u32 %v868_v37, 16 }
 0x77e   : > { %v877_v34 = vpop.xlane.xlu1 %876 }
 0x77f   : > { %vm878_vm13 = vcmp.eq.f32.partialorder %v875_v28, %v877_v34  ;;  %v883_v40 = vcvt.f32.s32 %v877_v34 }
 0x780   : > { %v879_v36 = vsel %vm878_vm13, %v874_v35, inf }
 0x781   : > { %880 = vmin.xlane.f32.xlu1 %v879_v36  ;;  %v884_v44 = vshll.u32 %v883_v40, 16 }
 0x80a   : > { %v866_v38 = vpop.xlane.xlu0 %865 }
 0x80b   : > { %v867_v41 = vcvt.f32.s32 %v866_v38 }
 0x80d   : > { %v870_v42 = vadd.s32 %v869_v39, %v867_v41  ;;  %v1044_v39 = vld [vmem:[%s2541_s3] sm:$0x3] }
 0x80e   : > { %v881_v43 = vpop.xlane.xlu1 %880  ;;  %v1056_v40 = vsel %vm1054_vm9, %v1044_v39, 0  ;;  %v2072_v41 = vld [vmem:[%s497_s27] sm:$0xff]   ;;  %v2074_v39 = vld [vmem:[%s2544_s6 + $0x8] sm:$0xff]  }
 0x80f   : > { %v882_v45 = vcvt.f32.s32 %v881_v43  ;;  %vm886_vm14 = vcmp.eq.s32.totalorder %v2194_v21, %v870_v42  ;;  %1950 = vmatpush3.bf16.msra.mxu1 %v1056_v40 }
 0x810   : > { %v894_v46 = vsel %vm886_vm14, -3e+30, %v844_v10  ;;  %v1857_v49 = vsel %vm886_vm14, 1.0, %v2086_v52  ;;  %2055 = vmatprep.subr.bf16.mxu1 %v2086_v52 }
 0x811   : > { %v885_v47 = vadd.s32 %v884_v44, %v882_v45  ;;  %v896_v48 = vsel %vm695_vm5, %v894_v46, -inf }
 0x812   : > { %897 = vmax.xlane.f32.xlu0 %v896_v48  ;;  %1952 = vmatmul.mubr.msk.bf16.vlgmr.msra.gmra.mrb[0].mxu1 %vm1050_vm11, %v2072_v41 }
 0x813   : > { %vm887_vm15 = vcmp.eq.s32.totalorder %v2194_v21, %v885_v47  ;;  %1973 = vmatprep.mubr.msk.bf16.mxu1 %vm2087_vm10, %v2086_v52 }
 0x814   : > { %v895_v50 = vsel %vm887_vm15, -3e+30, %v845_v14  ;;  %v1858_v51 = vsel %vm887_vm15, 1.0, %v2086_v52 }
 0x815   : > { %v899_v53 = vsel %vm695_vm5, %v895_v50, -inf  ;;  %v892_v54 = vpack.c.bf16 %v1858_v51, %v1857_v49 }
 0x816   : > { %900 = vmax.xlane.f32.xlu1 %v899_v53 }
 0x817   : > { %893 = vst.msk [vmem:[#allocation2 + $0x18] sm:$0xff] %vm695_vm5, %v892_v54 }
 0x89f   : > { %v898_v55 = vpop.xlane.xlu0 %897 }
 0x8a0   : > { %vm902_vm0 = vcmp.eq.f32.partialorder %v894_v46, %v898_v55 }
 0x8a1   : > { %v904_v56 = vsel %vm902_vm0, %v2194_v21, 16 }
 0x8a2   : > { %v906_v57 = vsel %vm695_vm5, %v904_v56, 2147483647 }
 0x8a3   : > { %v901_v58 = vpop.xlane.xlu1 %900  ;;  %v908_v59 = vshra.s32 %v906_v57, 16  ;;  %v907_v1 = vand.u32 65535, %v906_v57 }
 0x8a4   : > { %vm903_vm1 = vcmp.eq.f32.partialorder %v895_v50, %v901_v58 }
 0x8a5   : > { %v905_v60 = vsel %vm903_vm1, %v2194_v21, 16  ;;  %v910_v61 = vcvt.s32.f32 %v908_v59  ;;  %v909_v3 = vcvt.s32.f32 %v907_v1 }
 0x8a6   : > { %v921_v62 = vsel %vm695_vm5, %v905_v60, 2147483647 }
 0x8a7   : > { %911 = vmin.xlane.f32.xlu0 %v910_v61  ;;  %v923_v63 = vshra.s32 %v921_v62, 16  ;;  %v922_v4 = vand.u32 65535, %v921_v62 }
 0x8a9   : > { %v925_v0 = vcvt.s32.f32 %v923_v63  ;;  %v924_v9 = vcvt.s32.f32 %v922_v4 }
 0x8ab   : > { %926 = vmin.xlane.f32.xlu1 %v925_v0 }
 0x8e5   : > { %v2284_v4 = vpop.f32.mrb[0].mxu1 }
 0x934   : > { %v912_v2 = vpop.xlane.xlu0 %911 }
 0x935   : > { %vm913_vm2 = vcmp.eq.f32.partialorder %v910_v61, %v912_v2  ;;  %v918_v11 = vcvt.f32.s32 %v912_v2 }
 0x936   : > { %v914_v6 = vsel %vm913_vm2, %v909_v3, inf }
 0x937   : > { %915 = vmin.xlane.f32.xlu0 %v914_v6  ;;  %v919_v13 = vshll.u32 %v918_v11, 16  ;;  %v1953_v6 = vpop.f32.mrb[1].mxu1 }
 0x938   : > { %v927_v7 = vpop.xlane.xlu1 %926 }
 0x939   : > { %vm928_vm3 = vcmp.eq.f32.partialorder %v925_v0, %v927_v7  ;;  %v933_v14 = vcvt.f32.s32 %v927_v7  ;;  %v2286_v7 = vpop.f32.mrb[2].mxu1 }
 0x93a   : > { %v929_v10 = vsel %vm928_vm3, %v924_v9, inf  ;;  %v1099_v9 = vpack.c.bf16 %v2286_v7, %v2284_v4 }
 0x93b   : > { %930 = vmin.xlane.f32.xlu1 %v929_v10  ;;  %v934_v18 = vshll.u32 %v933_v14, 16  ;;  %v1954_v10 = vpop.f32.mrb[3].mxu1 }
 0x9c4   : > { %v916_v12 = vpop.xlane.xlu0 %915 }
 0x9c5   : > { %v917_v15 = vcvt.f32.s32 %v916_v12 }
 0x9c7   : > { %v920_v16 = vadd.s32 %v919_v13, %v917_v15 }
 0x9c8   : > { %v931_v17 = vpop.xlane.xlu1 %930 }
 0x9c9   : > { %v932_v19 = vcvt.f32.s32 %v931_v17  ;;  %vm936_vm4 = vcmp.eq.s32.totalorder %v2194_v21, %v920_v16 }
 0x9ca   : > { %v944_v20 = vsel %vm936_vm4, -3e+30, %v894_v46  ;;  %v1859_v24 = vsel %vm936_vm4, 1.0, %v2086_v52 }
 0x9cb   : > { %v935_v22 = vadd.s32 %v934_v18, %v932_v19  ;;  %v946_v23 = vsel %vm695_vm5, %v944_v20, -inf }
 0x9cc   : > { %947 = vmax.xlane.f32.xlu0 %v946_v23 }
 0x9cd   : > { %vm937_vm6 = vcmp.eq.s32.totalorder %v2194_v21, %v935_v22  ;;  %v1868_v22 = vld [vmem:[%s2551_s13] ss:$0 sm:$0xff] }
 0x9ce   : > { %v945_v25 = vsel %vm937_vm6, -3e+30, %v895_v50  ;;  %v1860_v26 = vsel %vm937_vm6, 1.0, %v2086_v52 }
 0x9cf   : > { %v949_v27 = vsel %vm695_vm5, %v945_v25, -inf  ;;  %v942_v28 = vpack.c.bf16 %v1860_v26, %v1859_v24 }
 0x9d0   : > { %950 = vmax.xlane.f32.xlu1 %v949_v27 }
 0x9d1   : > { %943 = vst.msk [vmem:[#allocation2 + $0x20] sm:$0xff] %vm695_vm5, %v942_v28 }
 0xa59   : > { %v948_v29 = vpop.xlane.xlu0 %947 }
 0xa5a   : > { %vm952_vm7 = vcmp.eq.f32.partialorder %v944_v20, %v948_v29 }
 0xa5b   : > { %v954_v30 = vsel %vm952_vm7, %v2194_v21, 16  ;;  %vm1752_vm7 = vcmask 257024  }
 0xa5c   : > { %v956_v31 = vsel %vm695_vm5, %v954_v30, 2147483647 }
 0xa5d   : > { %v951_v32 = vpop.xlane.xlu1 %950  ;;  %v958_v33 = vshra.s32 %v956_v31, 16  ;;  %v957_v42 = vand.u32 65535, %v956_v31 }
 0xa5e   : > { %vm953_vm8 = vcmp.eq.f32.partialorder %v945_v25, %v951_v32  ;;  %v1126_v32 = vld [vmem:[#allocation2 + $0x20] sm:$0xff] }
 0xa5f   : > { %v955_v34 = vsel %vm953_vm8, %v2194_v21, 16  ;;  %v960_v35 = vcvt.s32.f32 %v958_v33  ;;  %v959_v44 = vcvt.s32.f32 %v957_v42  ;;  %v1123_v33 = vld [vmem:[#allocation2 + $0x8] sm:$0xff] }
 0xa60   : > { %v971_v36 = vsel %vm695_vm5, %v955_v34, 2147483647 }
 0xa61   : > { %961 = vmin.xlane.f32.xlu0 %v960_v35  ;;  %v973_v37 = vshra.s32 %v971_v36, 16  ;;  %v972_v45 = vand.u32 65535, %v971_v36  ;;  %v1124_v36 = vld [vmem:[#allocation2 + $0x10] sm:$0xff] }
 0xa63   : > { %v975_v38 = vcvt.s32.f32 %v973_v37  ;;  %v974_v48 = vcvt.s32.f32 %v972_v45  ;;  %v1125_v37 = vld [vmem:[#allocation2 + $0x18] sm:$0xff] }
 0xa65   : > { %976 = vmin.xlane.f32.xlu1 %v975_v38 }
 0xaee   : > { %v962_v43 = vpop.xlane.xlu0 %961 }
 0xaef   : > { %vm963_vm12 = vcmp.eq.f32.partialorder %v960_v35, %v962_v43  ;;  %v968_v50 = vcvt.f32.s32 %v962_v43  ;;  %v1867_v35 = vld [vmem:[%s2550_s12] ss:$0 sm:$0xff] }
 0xaf0   : > { %v964_v46 = vsel %vm963_vm12, %v959_v44, inf }
 0xaf1   : > { %965 = vmin.xlane.f32.xlu0 %v964_v46  ;;  %v969_v53 = vshll.u32 %v968_v50, 16 }
 0xaf2   : > { %v977_v47 = vpop.xlane.xlu1 %976 }
 0xaf3   : > { %vm978_vm13 = vcmp.eq.f32.partialorder %v975_v38, %v977_v47  ;;  %v983_v54 = vcvt.f32.s32 %v977_v47  ;;  %v2073_v38 = vld [vmem:[%s2544_s6] sm:$0xff]  }
 0xaf4   : > { %v979_v49 = vsel %vm978_vm13, %v974_v48, inf }
 0xaf5   : > { %980 = vmin.xlane.f32.xlu1 %v979_v49  ;;  %v984_v58 = vshll.u32 %v983_v54, 16 }
 0xb7e   : > { %v966_v51 = vpop.xlane.xlu0 %965 }
 0xb7f   : > { %v967_v55 = vcvt.f32.s32 %v966_v51 }
 0xb81   : > { %v970_v56 = vadd.s32 %v969_v53, %v967_v55 }
 0xb82   : > { %v981_v57 = vpop.xlane.xlu1 %980 }
 0xb83   : > { %v982_v59 = vcvt.f32.s32 %v981_v57  ;;  %vm986_vm14 = vcmp.eq.s32.totalorder %v2194_v21, %v970_v56 }
 0xb84   : > { %v994_v60 = vsel %vm986_vm14, -3e+30, %v944_v20  ;;  %v1861_v63 = vsel %vm986_vm14, 1.0, %v2086_v52 }
 0xb85   : > { %v985_v61 = vadd.s32 %v984_v58, %v982_v59  ;;  %v996_v62 = vsel %vm695_vm5, %v994_v60, -inf }
 0xb86   : > { %997 = vmax.xlane.f32.xlu0 %v996_v62 }
 0xb87   : > { %vm987_vm15 = vcmp.eq.s32.totalorder %v2194_v21, %v985_v61 }
 0xb88   : > { %v995_v0 = vsel %vm987_vm15, -3e+30, %v945_v25  ;;  %v1862_v1 = vsel %vm987_vm15, 1.0, %v2086_v52 }
 0xb89   : > { %v999_v2 = vsel %vm695_vm5, %v995_v0, -inf  ;;  %v992_v3 = vpack.c.bf16 %v1862_v1, %v1861_v63 }
 0xb8a   : > { %1000 = vmax.xlane.f32.xlu1 %v999_v2  ;;  %v2353_v2 = vld [vmem:[%s2543_s5] ss:$0 sm:$0xff] }
 0xb8b   : > { %993 = vst.msk [vmem:[#allocation2 + $0x28] sm:$0xff] %vm695_vm5, %v992_v3 }
 0xb92   : > { %v1127_v34 = vld [vmem:[#allocation2 + $0x28] sm:$0xff] }
 0xc13   : > { %v998_v11 = vpop.xlane.xlu0 %997 }
 0xc14   : > { %vm1002_vm0 = vcmp.eq.f32.partialorder %v994_v60, %v998_v11  ;;  %v2346_v60 = vld [vmem:[%s2542_s4] ss:$0 sm:$0xff] }
 0xc15   : > { %v1004_v12 = vsel %vm1002_vm0, %v2194_v21, 16 }
 0xc16   : > { %v1006_v13 = vsel %vm695_vm5, %v1004_v12, 2147483647 }
 0xc17   : > { %v1001_v14 = vpop.xlane.xlu1 %1000  ;;  %v1008_v15 = vshra.s32 %v1006_v13, 16  ;;  %v1007_v23 = vand.u32 65535, %v1006_v13 }
 0xc18   : > { %vm1003_vm1 = vcmp.eq.f32.partialorder %v995_v0, %v1001_v14 }
 0xc19   : > { %v1005_v16 = vsel %vm1003_vm1, %v2194_v21, 16  ;;  %v1010_v17 = vcvt.s32.f32 %v1008_v15  ;;  %v1009_v25 = vcvt.s32.f32 %v1007_v23 }
 0xc1a   : > { %v1021_v18 = vsel %vm695_vm5, %v1005_v16, 2147483647 }
 0xc1b   : > { %1011 = vmin.xlane.f32.xlu0 %v1010_v17  ;;  %v1023_v19 = vshra.s32 %v1021_v18, 16  ;;  %v1022_v26 = vand.u32 65535, %v1021_v18 }
 0xc1d   : > { %v1025_v20 = vcvt.s32.f32 %v1023_v19  ;;  %v1024_v30 = vcvt.s32.f32 %v1022_v26 }
 0xc1f   : > { %1026 = vmin.xlane.f32.xlu1 %v1025_v20 }
 0xc31   : > { %1130 = vrot.lane.b32.xlu0 %v1099_v9, %s2088_s28 }
 0xc35   : > { %1117 = vrot.lane.b32.xlu0 %v1868_v22, %s2089_s17 }
 0xc39   : > { %1734 = vperm.xlu0 %2070, %v2185_v5   ;;  %v1122_v5 = vld [vmem:[#allocation2] sm:$0xff] }
 0xca8   : > { %v1012_v24 = vpop.xlane.xlu0 %1011 }
 0xca9   : > { %vm1013_vm2 = vcmp.eq.f32.partialorder %v1010_v17, %v1012_v24  ;;  %v1018_v40 = vcvt.f32.s32 %v1012_v24 }
 0xcaa   : > { %v1014_v27 = vsel %vm1013_vm2, %v1009_v25, inf }
 0xcab   : > { %1015 = vmin.xlane.f32.xlu1 %v1014_v27  ;;  %v1019_v41 = vshll.u32 %v1018_v40, 16 }
 0xcac   : > { %v1131_v28 = vpop.permute.xlu0 %1130  ;;  %v1027_v29 = vpop.xlane.xlu1 %1026 }
 0xcad   : > { %1956 = vmatpush3.bf16.msra.mxu0 %v1131_v28  ;;  %2056 = vmatpush3.bf16.msra.mxu1 %v1131_v28  ;;  %vm1028_vm3 = vcmp.eq.f32.partialorder %v1025_v20, %v1027_v29  ;;  %v1033_v42 = vcvt.f32.s32 %v1027_v29 }
 0xcae   : > { %v1029_v31 = vsel %vm1028_vm3, %v1024_v30, inf  ;;  %1985 = vmatprep.subr.bf16.mxu1 %v2086_v52  ;;  %2017 = vmatprep.subr.bf16.mxu0 %v2086_v52 }
 0xcaf   : > { %1030 = vmin.xlane.f32.xlu1 %v1029_v31  ;;  %v1034_v46 = vshll.u32 %v1033_v42, 16 }
 0xcb0   : > { %1958 = vmatmul.mubr.msk.bf16.vlgmr.msra.gmra.mrb[4].mxu0 %vm695_vm5, %v1122_v5  ;;  %1974 = vmatmul.mubr.msk.bf16.vlgmr.msra.gmra.mrb[4].mxu1 %vm695_vm5, %v1126_v32  ;;  %v1118_v50 = vpop.permute.xlu0 %1117 }
 0xcb1   : > { %1961 = vmatprep.mubr.msk.bf16.mxu0 %vm2087_vm10, %v2086_v52  ;;  %1977 = vmatprep.mubr.msk.bf16.mxu1 %vm2087_vm10, %v2086_v52 }
 0xcb2   : > { %1986 = vmatpush3.bf16.msra.mxu1 %v2073_v38 }
 0xcb3   : > { %1987 = vmatprep.subr.bf16.mxu1 %v2086_v52 }
 0xcb6   : > { %1988 = vmatpush3.bf16.msra.mxu1 %v2074_v39 }
 0xcb8   : > { %1962 = vmatmul.mubr.msk.bf16.gmra.mrb[8].mxu0 %vm695_vm5, %v1123_v33  ;;  %1978 = vmatmul.mubr.msk.bf16.gmra.mrb[8].mxu1 %vm695_vm5, %v1127_v34 }
 0xcb9   : > { %1965 = vmatprep.mubr.msk.bf16.mxu0 %vm2087_vm10, %v2086_v52  ;;  %1981 = vmatprep.mubr.msk.bf16.mxu1 %vm2087_vm10, %v2086_v52 }
 0xcc0   : > { %1966 = vmatmul.mubr.msk.bf16.gmra.mrb[12].mxu0 %vm695_vm5, %v1124_v36  ;;  %1106 = vrot.lane.b32.xlu1 %v1867_v35, %s2089_s17 }
 0xcc1   : > { %1969 = vmatprep.mubr.msk.bf16.mxu0 %vm2087_vm10, %v2086_v52 }
 0xcc4   : > { %1739 = vperm.xlu1 %2071, %v2191_v8  }
 0xcc8   : > { %1970 = vmatmul.mubr.msk.bf16.gmra.mrb[16].mxu0 %vm695_vm5, %v1125_v37 }
 0xcc9   : > { %2021 = vmatprep.mubr.msk.bf16.mxu0 %vm2087_vm10, %v2086_v52 }
 0xd38   : > { %v1016_v8 = vpop.xlane.xlu1 %1015 }
 0xd39   : > { %v1017_v43 = vcvt.f32.s32 %v1016_v8 }
 0xd3b   : > { %v1020_v44 = vadd.s32 %v1019_v41, %v1017_v43 }
 0xd3c   : > { %v1031_v45 = vpop.xlane.xlu1 %1030 }
 0xd3d   : > { %v1032_v47 = vcvt.f32.s32 %v1031_v45  ;;  %vm1036_vm4 = vcmp.eq.s32.totalorder %v2194_v21, %v1020_v44 }
 0xd3e   : > { %v1863_v54 = vsel %vm1036_vm4, 1.0, %v2086_v52 }
 0xd3f   : > { %v1035_v48 = vadd.s32 %v1034_v46, %v1032_v47 }
 0xd40   : > { %v1107_v49 = vpop.permute.xlu1 %1106 }
 0xd41   : > { %vm1037_vm6 = vcmp.eq.s32.totalorder %v2194_v21, %v1035_v48  ;;  %v1109_v51 = vmul.f32 %v1107_v49, %v2284_v4  ;;  %v1110_v53 = vmul.f32 %v1107_v49, %v2286_v7 }
 0xd42   : > { %v1864_v55 = vsel %vm1037_vm6, 1.0, %v2086_v52 }
 0xd43   : > { %v1042_v56 = vpack.c.bf16 %v1864_v55, %v1863_v54  ;;  %v1120_v57 = vadd.f32 %v1118_v50, %v1109_v51  ;;  %v1121_v58 = vadd.f32 %v1118_v50, %v1110_v53 }
 0xd45   : > { %1043 = vst.msk [vmem:[#allocation2 + $0x30] sm:$0xff] %vm695_vm5, %v1042_v56  ;;  %1724 = vrot.lane.b32.xlu0 %v1121_v58, %s2089_s17  ;;  %1722 = vrot.lane.b32.xlu1 %v1120_v57, %s2089_s17 }
 0xd4c   : > { %v1128_v59 = vld [vmem:[#allocation2 + $0x30] sm:$0xff] }
 0xd4d   : > { %1982 = vmatmul.mubr.msk.bf16.gmra.mrb[12].mxu1 %vm695_vm5, %v1128_v59  ;;  %vm1336_vm5 = vcmask 261120  }
 0xd4e   : > { %1989 = vmatprep.mubr.msk.bf16.mxu1 %vm2087_vm10, %v2086_v52 }
 0xd83   : > { %v1188_v21 = vpop.f32.mrb[4].mxu0  ;;  %v1220_v61 = vpop.f32.mrb[4].mxu1 }
 0xd84   : > { %v1243_v62 = vadd.f32 %v1188_v21, %v2284_v4  ;;  %v1251_v63 = vadd.f32 %v1220_v61, %v2284_v4  ;;  %v1959_v0 = vpop.f32.mrb[5].mxu0  ;;  %v1975_v1 = vpop.f32.mrb[5].mxu1 }
 0xd85   : > { %v1191_v3 = vpop.f32.mrb[6].mxu0  ;;  %v1223_v6 = vpop.f32.mrb[6].mxu1 }
 0xd86   : > { %v1264_v9 = vmul.f32 %v2346_v60, %v1243_v62  ;;  %v1272_v10 = vmul.f32 %v2346_v60, %v1251_v63  ;;  %v1244_v11 = vadd.f32 %v1191_v3, %v2286_v7  ;;  %v1252_v12 = vadd.f32 %v1223_v6, %v2286_v7  ;;  %v1960_v13 = vpop.f32.mrb[7].mxu0  ;;  %v1976_v14 = vpop.f32.mrb[7].mxu1 }
 0xd88   : > { %v1285_v15 = vadd.f32 %v2353_v2, %v1264_v9  ;;  %v1293_v16 = vadd.f32 %v2353_v2, %v1272_v10  ;;  %v1265_v17 = vmul.f32 %v2346_v60, %v1244_v11  ;;  %v1273_v18 = vmul.f32 %v2346_v60, %v1252_v12 }
 0xd8a   : > { %v1286_v19 = vadd.f32 %v2353_v2, %v1265_v17  ;;  %v1294_v20 = vadd.f32 %v2353_v2, %v1273_v18  ;;  %v1299_v22 = vmax.f32 %v1285_v15, 0.0  ;;  %v1307_v23 = vmax.f32 %v1293_v16, 0.0 }
 0xd8b   : > { %v1196_v24 = vpop.f32.mrb[8].mxu0  ;;  %v1228_v25 = vpop.f32.mrb[8].mxu1 }
 0xd8c   : > { %v1300_v26 = vmax.f32 %v1286_v19, 0.0  ;;  %v1308_v27 = vmax.f32 %v1294_v20, 0.0  ;;  %v1245_v28 = vadd.f32 %v1196_v24, %v2284_v4  ;;  %v1253_v29 = vadd.f32 %v1228_v25, %v2284_v4  ;;  %v1963_v30 = vpop.f32.mrb[9].mxu0  ;;  %v1979_v31 = vpop.f32.mrb[9].mxu1  ;;  %v2075_v20 = vld [vmem:[%s2547_s9] sm:$0xff]  }
 0xd8d   : > { %v1199_v5 = vpop.f32.mrb[10].mxu0  ;;  %v1231_v32 = vpop.f32.mrb[10].mxu1  ;;  %2018 = vmatpush3.bf16.msra.mxu0 %v2075_v20 }
 0xd8e   : > { %v1313_v33 = vpack.c.bf16 %v1300_v26, %v1299_v22  ;;  %v1317_v34 = vpack.c.bf16 %v1308_v27, %v1307_v23  ;;  %v1266_v35 = vmul.f32 %v2346_v60, %v1245_v28  ;;  %v1274_v36 = vmul.f32 %v2346_v60, %v1253_v29  ;;  %v1964_v37 = vpop.f32.mrb[11].mxu0  ;;  %v1980_v38 = vpop.f32.mrb[11].mxu1  ;;  %2019 = vmatprep.subr.bf16.mxu0 %v2086_v52  ;;  %v2076_v22 = vld [vmem:[%s2547_s9 + $0x8] sm:$0xff]  }
 0xd8f   : > { %v1246_v39 = vadd.f32 %v1199_v5, %v2286_v7  ;;  %v1254_v40 = vadd.f32 %v1231_v32, %v2286_v7 }
 0xd90   : > { %1990 = vmatmul.mubr.msk.bf16.vlgmr.msra.gmra.mrb[16].mxu1 %vm1336_vm5, %v1313_v33  ;;  %v1287_v8 = vadd.f32 %v2353_v2, %v1266_v35  ;;  %v1295_v41 = vadd.f32 %v2353_v2, %v1274_v36 }
 0xd91   : > { %v1267_v42 = vmul.f32 %v2346_v60, %v1246_v39  ;;  %v1275_v43 = vmul.f32 %v2346_v60, %v1254_v40  ;;  %1993 = vmatprep.mubr.msk.bf16.mxu1 %vm2087_vm10, %v2086_v52  ;;  %2020 = vmatpush3.bf16.msra.mxu0 %v2076_v22 }
 0xd92   : > { %v1301_v49 = vmax.f32 %v1287_v8, 0.0  ;;  %v1309_v50 = vmax.f32 %v1295_v41, 0.0 }
 0xd93   : > { %v1288_v44 = vadd.f32 %v2353_v2, %v1267_v42  ;;  %v1296_v45 = vadd.f32 %v2353_v2, %v1275_v43  ;;  %v1204_v46 = vpop.f32.mrb[12].mxu0 }
 0xd94   : > { %v1247_v47 = vadd.f32 %v1204_v46, %v2284_v4  ;;  %v1967_v48 = vpop.f32.mrb[13].mxu0 }
 0xd95   : > { %v1302_v51 = vmax.f32 %v1288_v44, 0.0  ;;  %v1310_v53 = vmax.f32 %v1296_v45, 0.0  ;;  %v1207_v54 = vpop.f32.mrb[14].mxu0 }
 0xd96   : > { %v1268_v55 = vmul.f32 %v2346_v60, %v1247_v47  ;;  %v1248_v56 = vadd.f32 %v1207_v54, %v2286_v7  ;;  %v1968_v57 = vpop.f32.mrb[15].mxu0 }
 0xd97   : > { %v1314_v58 = vpack.c.bf16 %v1302_v51, %v1301_v49  ;;  %v1318_v59 = vpack.c.bf16 %v1310_v53, %v1309_v50 }
 0xd98   : > { %v1289_v21 = vadd.f32 %v2353_v2, %v1268_v55  ;;  %v1269_v61 = vmul.f32 %v2346_v60, %v1248_v56 }
 0xd99   : > { %1994 = vmatmul.mubr.msk.bf16.gmra.mrb[20].mxu1 %vm1336_vm5, %v1314_v58 }
 0xd9a   : > { %v1290_v62 = vadd.f32 %v2353_v2, %v1269_v61  ;;  %1997 = vmatprep.mubr.msk.bf16.mxu1 %vm2087_vm10, %v2086_v52  ;;  %v1303_v0 = vmax.f32 %v1289_v21, 0.0 }
 0xd9b   : > { %v1212_v63 = vpop.f32.mrb[16].mxu0 }
 0xd9c   : > { %v1304_v1 = vmax.f32 %v1290_v62, 0.0  ;;  %v1249_v3 = vadd.f32 %v1212_v63, %v2284_v4  ;;  %v1971_v6 = vpop.f32.mrb[17].mxu0 }
 0xd9d   : > { %v1215_v9 = vpop.f32.mrb[18].mxu0 }
 0xd9e   : > { %v1315_v10 = vpack.c.bf16 %v1304_v1, %v1303_v0  ;;  %v1270_v11 = vmul.f32 %v2346_v60, %v1249_v3  ;;  %v1250_v12 = vadd.f32 %v1215_v9, %v2286_v7  ;;  %v1972_v13 = vpop.f32.mrb[19].mxu0 }
 0xda0   : > { %v1291_v14 = vadd.f32 %v2353_v2, %v1270_v11  ;;  %v1271_v15 = vmul.f32 %v2346_v60, %v1250_v12 }
 0xda1   : > { %1998 = vmatmul.mubr.msk.bf16.gmra.mrb[24].mxu1 %vm1336_vm5, %v1315_v10 }
 0xda2   : > { %v1292_v16 = vadd.f32 %v2353_v2, %v1271_v15  ;;  %2001 = vmatprep.mubr.msk.bf16.mxu1 %vm2087_vm10, %v2086_v52  ;;  %v1305_v17 = vmax.f32 %v1291_v14, 0.0 }
 0xda4   : > { %v1306_v18 = vmax.f32 %v1292_v16, 0.0 }
 0xda6   : > { %v1316_v19 = vpack.c.bf16 %v1306_v18, %v1305_v17 }
 0xda9   : > { %2002 = vmatmul.mubr.msk.bf16.gmra.mrb[28].mxu1 %vm1336_vm5, %v1316_v19 }
 0xdaa   : > { %2005 = vmatprep.mubr.msk.bf16.mxu1 %vm2087_vm10, %v2086_v52 }
 0xdb1   : > { %2006 = vmatmul.mubr.msk.bf16.gmra.mrb[32].mxu1 %vm1336_vm5, %v1317_v34 }
 0xdb2   : > { %2009 = vmatprep.mubr.msk.bf16.mxu1 %vm2087_vm10, %v2086_v52 }
 0xdb9   : > { %2010 = vmatmul.mubr.msk.bf16.gmra.mrb[36].mxu1 %vm1336_vm5, %v1318_v59 }
 0xdba   : > { %2013 = vmatprep.mubr.msk.bf16.mxu1 %vm2087_vm10, %v2086_v52 }
 0xe20   : > { %v1236_v23 = vpop.f32.mrb[12].mxu1 }
 0xe21   : > { %v1255_v24 = vadd.f32 %v1236_v23, %v2284_v4  ;;  %v1983_v25 = vpop.f32.mrb[13].mxu1  ;;  %v2424_v4 = vld [vmem:[%s2545_s7] ss:$0 sm:$0xff] }
 0xe22   : > { %v1239_v26 = vpop.f32.mrb[14].mxu1 }
 0xe23   : > { %v1276_v27 = vmul.f32 %v2346_v60, %v1255_v24  ;;  %v1256_v28 = vadd.f32 %v1239_v26, %v2286_v7  ;;  %v1984_v29 = vpop.f32.mrb[15].mxu1  ;;  %v2429_v7 = vld [vmem:[%s2546_s8] ss:$0 sm:$0xff] }
 0xe25   : > { %v1297_v30 = vadd.f32 %v2353_v2, %v1276_v27  ;;  %v1277_v31 = vmul.f32 %v2346_v60, %v1256_v28 }
 0xe27   : > { %v1298_v5 = vadd.f32 %v2353_v2, %v1277_v31  ;;  %v1311_v32 = vmax.f32 %v1297_v30, 0.0 }
 0xe29   : > { %v1312_v33 = vmax.f32 %v1298_v5, 0.0 }
 0xe2b   : > { %v1319_v34 = vpack.c.bf16 %v1312_v33, %v1311_v32 }
 0xe2d   : > { %2014 = vmatmul.mubr.msk.bf16.gmra.mrb[40].mxu1 %vm1336_vm5, %v1319_v34 }
 0xe63   : > { %v1392_v35 = vpop.f32.mrb[16].mxu1 }
 0xe64   : > { %v1454_v60 = vmul.f32 %v2424_v4, %v1392_v35  ;;  %v1991_v36 = vpop.f32.mrb[17].mxu1 }
 0xe65   : > { %v1395_v2 = vpop.f32.mrb[18].mxu1 }
 0xe66   : > { %v1475_v37 = vadd.f32 %v2429_v7, %v1454_v60  ;;  %v1455_v38 = vmul.f32 %v2424_v4, %v1395_v2  ;;  %v1992_v39 = vpop.f32.mrb[19].mxu1 }
 0xe68   : > { %v1476_v40 = vadd.f32 %v2429_v7, %v1455_v38  ;;  %v1489_v8 = vmax.f32 %v1475_v37, 0.0 }
 0xe6a   : > { %v1490_v41 = vmax.f32 %v1476_v40, 0.0 }
 0xe6c   : > { %v1503_v42 = vpack.c.bf16 %v1490_v41, %v1489_v8  ;;  %v1400_v43 = vpop.f32.mrb[20].mxu1 }
 0xe6d   : > { %v1456_v44 = vmul.f32 %v2424_v4, %v1400_v43  ;;  %v1995_v45 = vpop.f32.mrb[21].mxu1 }
 0xe6e   : > { %v1403_v46 = vpop.f32.mrb[22].mxu1  ;;  %2022 = vmatmul.mubr.msk.bf16.vlgmr.msra.gmra.mrb[20].mxu0 %vm1336_vm5, %v1503_v42 }
 0xe6f   : > { %v1477_v47 = vadd.f32 %v2429_v7, %v1456_v44  ;;  %v1457_v48 = vmul.f32 %v2424_v4, %v1403_v46  ;;  %v1996_v49 = vpop.f32.mrb[23].mxu1  ;;  %2025 = vmatprep.mubr.msk.bf16.mxu0 %vm2087_vm10, %v2086_v52 }
 0xe71   : > { %v1478_v50 = vadd.f32 %v2429_v7, %v1457_v48  ;;  %v1491_v51 = vmax.f32 %v1477_v47, 0.0 }
 0xe73   : > { %v1492_v53 = vmax.f32 %v1478_v50, 0.0 }
 0xe74   : > { %v1408_v54 = vpop.f32.mrb[24].mxu1 }
 0xe75   : > { %v1504_v55 = vpack.c.bf16 %v1492_v53, %v1491_v51  ;;  %v1458_v56 = vmul.f32 %v2424_v4, %v1408_v54  ;;  %v1999_v57 = vpop.f32.mrb[25].mxu1 }
 0xe76   : > { %v1411_v58 = vpop.f32.mrb[26].mxu1 }
 0xe77   : > { %v1479_v59 = vadd.f32 %v2429_v7, %v1458_v56  ;;  %v1459_v21 = vmul.f32 %v2424_v4, %v1411_v58  ;;  %v2000_v61 = vpop.f32.mrb[27].mxu1  ;;  %2026 = vmatmul.mubr.msk.bf16.gmra.mrb[24].mxu0 %vm1336_vm5, %v1504_v55 }
 0xe78   : > { %2029 = vmatprep.mubr.msk.bf16.mxu0 %vm2087_vm10, %v2086_v52 }
 0xe79   : > { %v1480_v62 = vadd.f32 %v2429_v7, %v1459_v21  ;;  %v1493_v63 = vmax.f32 %v1479_v59, 0.0 }
 0xe7b   : > { %v1494_v0 = vmax.f32 %v1480_v62, 0.0 }
 0xe7c   : > { %v1416_v1 = vpop.f32.mrb[28].mxu1 }
 0xe7d   : > { %v1505_v3 = vpack.c.bf16 %v1494_v0, %v1493_v63  ;;  %v1460_v6 = vmul.f32 %v2424_v4, %v1416_v1  ;;  %v2003_v9 = vpop.f32.mrb[29].mxu1 }
 0xe7e   : > { %v1419_v10 = vpop.f32.mrb[30].mxu1 }
 0xe7f   : > { %v1481_v11 = vadd.f32 %v2429_v7, %v1460_v6  ;;  %v1461_v12 = vmul.f32 %v2424_v4, %v1419_v10  ;;  %v2004_v13 = vpop.f32.mrb[31].mxu1  ;;  %2030 = vmatmul.mubr.msk.bf16.gmra.mrb[28].mxu0 %vm1336_vm5, %v1505_v3 }
 0xe80   : > { %2033 = vmatprep.mubr.msk.bf16.mxu0 %vm2087_vm10, %v2086_v52 }
 0xe81   : > { %v1482_v14 = vadd.f32 %v2429_v7, %v1461_v12  ;;  %v1495_v15 = vmax.f32 %v1481_v11, 0.0 }
 0xe83   : > { %v1496_v16 = vmax.f32 %v1482_v14, 0.0 }
 0xe84   : > { %v1424_v17 = vpop.f32.mrb[32].mxu1 }
 0xe85   : > { %v1506_v18 = vpack.c.bf16 %v1496_v16, %v1495_v15  ;;  %v1462_v19 = vmul.f32 %v2424_v4, %v1424_v17  ;;  %v2007_v20 = vpop.f32.mrb[33].mxu1 }
 0xe86   : > { %v1427_v22 = vpop.f32.mrb[34].mxu1 }
 0xe87   : > { %v1483_v23 = vadd.f32 %v2429_v7, %v1462_v19  ;;  %v1463_v24 = vmul.f32 %v2424_v4, %v1427_v22  ;;  %v2008_v25 = vpop.f32.mrb[35].mxu1  ;;  %2034 = vmatmul.mubr.msk.bf16.gmra.mrb[32].mxu0 %vm1336_vm5, %v1506_v18 }
 0xe88   : > { %2037 = vmatprep.mubr.msk.bf16.mxu0 %vm2087_vm10, %v2086_v52 }
 0xe89   : > { %v1484_v26 = vadd.f32 %v2429_v7, %v1463_v24  ;;  %v1497_v27 = vmax.f32 %v1483_v23, 0.0 }
 0xe8b   : > { %v1498_v28 = vmax.f32 %v1484_v26, 0.0 }
 0xe8c   : > { %v1432_v29 = vpop.f32.mrb[36].mxu1 }
 0xe8d   : > { %v1507_v30 = vpack.c.bf16 %v1498_v28, %v1497_v27  ;;  %v1464_v31 = vmul.f32 %v2424_v4, %v1432_v29  ;;  %v2011_v5 = vpop.f32.mrb[37].mxu1 }
 0xe8e   : > { %v1435_v32 = vpop.f32.mrb[38].mxu1 }
 0xe8f   : > { %v1485_v33 = vadd.f32 %v2429_v7, %v1464_v31  ;;  %v1465_v34 = vmul.f32 %v2424_v4, %v1435_v32  ;;  %v2012_v35 = vpop.f32.mrb[39].mxu1  ;;  %2038 = vmatmul.mubr.msk.bf16.gmra.mrb[36].mxu0 %vm1336_vm5, %v1507_v30 }
 0xe90   : > { %2041 = vmatprep.mubr.msk.bf16.mxu0 %vm2087_vm10, %v2086_v52 }
 0xe91   : > { %v1486_v60 = vadd.f32 %v2429_v7, %v1465_v34  ;;  %v1499_v36 = vmax.f32 %v1485_v33, 0.0 }
 0xe93   : > { %v1500_v2 = vmax.f32 %v1486_v60, 0.0 }
 0xe95   : > { %v1508_v37 = vpack.c.bf16 %v1500_v2, %v1499_v36 }
 0xe97   : > { %2042 = vmatmul.mubr.msk.bf16.gmra.mrb[40].mxu0 %vm1336_vm5, %v1508_v37 }
 0xe98   : > { %2045 = vmatprep.mubr.msk.bf16.mxu0 %vm2087_vm10, %v2086_v52  ;;  %v2481_v52 = vld [vmem:[%s2548_s10] ss:$0 sm:$0xff] }
 0xf00   : > { %v1440_v38 = vpop.f32.mrb[40].mxu1 }
 0xf01   : > { %v1466_v39 = vmul.f32 %v2424_v4, %v1440_v38  ;;  %v2015_v40 = vpop.f32.mrb[41].mxu1 }
 0xf02   : > { %v1443_v8 = vpop.f32.mrb[42].mxu1 }
 0xf03   : > { %v1487_v41 = vadd.f32 %v2429_v7, %v1466_v39  ;;  %v1467_v42 = vmul.f32 %v2424_v4, %v1443_v8  ;;  %v2016_v43 = vpop.f32.mrb[43].mxu1  ;;  %v2487_v4 = vld [vmem:[%s2549_s11] ss:$0 sm:$0xff] }
 0xf05   : > { %v1488_v44 = vadd.f32 %v2429_v7, %v1467_v42  ;;  %v1501_v45 = vmax.f32 %v1487_v41, 0.0 }
 0xf07   : > { %v1502_v46 = vmax.f32 %v1488_v44, 0.0 }
 0xf09   : > { %v1509_v47 = vpack.c.bf16 %v1502_v46, %v1501_v45 }
 0xf0b   : > { %2046 = vmatmul.mubr.msk.bf16.gmra.mrb[44].mxu0 %vm1336_vm5, %v1509_v47 }
 0xf41   : > { %v1581_v48 = vpop.f32.mrb[20].mxu0 }
 0xf42   : > { %v2023_v49 = vpop.f32.mrb[21].mxu0  ;;  %v1643_v53 = vmul.f32 %v2481_v52, %v1581_v48 }
 0xf43   : > { %v1584_v50 = vpop.f32.mrb[22].mxu0 }
 0xf44   : > { %v2024_v51 = vpop.f32.mrb[23].mxu0  ;;  %v1644_v7 = vmul.f32 %v2481_v52, %v1584_v50  ;;  %v1664_v54 = vadd.f32 %v2487_v4, %v1643_v53 }
 0xf46   : > { %v1665_v56 = vadd.f32 %v2487_v4, %v1644_v7  ;;  %v1678_v21 = vmax.f32 %v1664_v54, 0.0 }
 0xf48   : > { %v1679_v0 = vmax.f32 %v1665_v56, 0.0  ;;  %v1692_v6 = vsel %vm1336_vm5, %v1678_v21, 0.0 }
 0xf4a   : > { %v1589_v55 = vpop.f32.mrb[24].mxu0  ;;  %v1705_v13 = vsel %vm1336_vm5, %v1679_v0, 0.0 }
 0xf4b   : > { %v1645_v57 = vmul.f32 %v2481_v52, %v1589_v55  ;;  %v2027_v58 = vpop.f32.mrb[25].mxu0 }
 0xf4c   : > { %v1592_v59 = vpop.f32.mrb[26].mxu0 }
 0xf4d   : > { %v1666_v61 = vadd.f32 %v2487_v4, %v1645_v57  ;;  %v1646_v62 = vmul.f32 %v2481_v52, %v1592_v59  ;;  %v2028_v63 = vpop.f32.mrb[27].mxu0 }
 0xf4f   : > { %v1680_v1 = vmax.f32 %v1666_v61, 0.0  ;;  %v1667_v3 = vadd.f32 %v2487_v4, %v1646_v62 }
 0xf51   : > { %v1693_v9 = vsel %vm1336_vm5, %v1680_v1, 0.0  ;;  %v1681_v10 = vmax.f32 %v1667_v3, 0.0 }
 0xf52   : > { %v1694_v11 = vadd.f32 %v1693_v9, %v1692_v6  ;;  %v1597_v12 = vpop.f32.mrb[28].mxu0 }
 0xf53   : > { %v1706_v14 = vsel %vm1336_vm5, %v1681_v10, 0.0  ;;  %v1647_v15 = vmul.f32 %v2481_v52, %v1597_v12  ;;  %v2031_v16 = vpop.f32.mrb[29].mxu0 }
 0xf54   : > { %v1707_v17 = vadd.f32 %v1706_v14, %v1705_v13  ;;  %v1600_v18 = vpop.f32.mrb[30].mxu0  ;;  %v1740_v16 = vpop.permute.xlu1 %1739 }
 0xf55   : > { %v1668_v19 = vadd.f32 %v2487_v4, %v1647_v15  ;;  %v1648_v20 = vmul.f32 %v2481_v52, %v1600_v18  ;;  %v2032_v22 = vpop.f32.mrb[31].mxu0 }
 0xf57   : > { %v1682_v23 = vmax.f32 %v1668_v19, 0.0  ;;  %v1669_v24 = vadd.f32 %v2487_v4, %v1648_v20  ;;  %v1735_v19 = vpop.permute.xlu0 %1734 }
 0xf59   : > { %v1695_v25 = vsel %vm1336_vm5, %v1682_v23, 0.0  ;;  %v1683_v26 = vmax.f32 %v1669_v24, 0.0 }
 0xf5a   : > { %v1696_v27 = vadd.f32 %v1695_v25, %v1694_v11  ;;  %v1605_v28 = vpop.f32.mrb[32].mxu0 }
 0xf5b   : > { %v1708_v29 = vsel %vm1336_vm5, %v1683_v26, 0.0  ;;  %v1649_v30 = vmul.f32 %v2481_v52, %v1605_v28  ;;  %v2035_v31 = vpop.f32.mrb[33].mxu0 }
 0xf5c   : > { %v1709_v5 = vadd.f32 %v1708_v29, %v1707_v17  ;;  %v1608_v32 = vpop.f32.mrb[34].mxu0 }
 0xf5d   : > { %v1670_v33 = vadd.f32 %v2487_v4, %v1649_v30  ;;  %v1650_v34 = vmul.f32 %v2481_v52, %v1608_v32  ;;  %v2036_v35 = vpop.f32.mrb[35].mxu0  ;;  %v1725_v30 = vpop.permute.xlu0 %1724 }
 0xf5f   : > { %v1684_v60 = vmax.f32 %v1670_v33, 0.0  ;;  %v1671_v36 = vadd.f32 %v2487_v4, %v1650_v34 }
 0xf61   : > { %v1697_v2 = vsel %vm1336_vm5, %v1684_v60, 0.0  ;;  %v1685_v37 = vmax.f32 %v1671_v36, 0.0 }
 0xf62   : > { %v1698_v38 = vadd.f32 %v1697_v2, %v1696_v27  ;;  %v1613_v39 = vpop.f32.mrb[36].mxu0  ;;  %v1723_v27 = vpop.permute.xlu1 %1722 }
 0xf63   : > { %v1710_v40 = vsel %vm1336_vm5, %v1685_v37, 0.0  ;;  %v1651_v8 = vmul.f32 %v2481_v52, %v1613_v39  ;;  %v2039_v41 = vpop.f32.mrb[37].mxu0 }
 0xf64   : > { %v1711_v42 = vadd.f32 %v1710_v40, %v1709_v5  ;;  %v1616_v43 = vpop.f32.mrb[38].mxu0 }
 0xf65   : > { %v1672_v44 = vadd.f32 %v2487_v4, %v1651_v8  ;;  %v1652_v45 = vmul.f32 %v2481_v52, %v1616_v43  ;;  %v2040_v46 = vpop.f32.mrb[39].mxu0 }
 0xf67   : > { %v1686_v47 = vmax.f32 %v1672_v44, 0.0  ;;  %v1673_v48 = vadd.f32 %v2487_v4, %v1652_v45 }
 0xf69   : > { %v1699_v49 = vsel %vm1336_vm5, %v1686_v47, 0.0  ;;  %v1687_v50 = vmax.f32 %v1673_v48, 0.0 }
 0xf6a   : > { %v1700_v51 = vadd.f32 %v1699_v49, %v1698_v38  ;;  %v1621_v53 = vpop.f32.mrb[40].mxu0 }
 0xf6b   : > { %v1712_v7 = vsel %vm1336_vm5, %v1687_v50, 0.0  ;;  %v1653_v54 = vmul.f32 %v2481_v52, %v1621_v53  ;;  %v2043_v55 = vpop.f32.mrb[41].mxu0 }
 0xf6c   : > { %v1713_v56 = vadd.f32 %v1712_v7, %v1711_v42  ;;  %v1624_v57 = vpop.f32.mrb[42].mxu0 }
 0xf6d   : > { %v1674_v58 = vadd.f32 %v2487_v4, %v1653_v54  ;;  %v1654_v59 = vmul.f32 %v2481_v52, %v1624_v57  ;;  %v2044_v21 = vpop.f32.mrb[43].mxu0 }
 0xf6f   : > { %v1688_v61 = vmax.f32 %v1674_v58, 0.0  ;;  %v1675_v62 = vadd.f32 %v2487_v4, %v1654_v59 }
 0xf71   : > { %v1701_v63 = vsel %vm1336_vm5, %v1688_v61, 0.0  ;;  %v1689_v0 = vmax.f32 %v1675_v62, 0.0 }
 0xf72   : > { %v1702_v1 = vadd.f32 %v1701_v63, %v1700_v51 }
 0xf73   : > { %v1714_v3 = vsel %vm1336_vm5, %v1689_v0, 0.0 }
 0xf74   : > { %v1715_v6 = vadd.f32 %v1714_v3, %v1713_v56 }
 0xfde   : > { %v1629_v9 = vpop.f32.mrb[44].mxu0 }
 0xfdf   : > { %v1655_v10 = vmul.f32 %v2481_v52, %v1629_v9  ;;  %v2047_v11 = vpop.f32.mrb[45].mxu0 }
 0xfe0   : > { %v1632_v12 = vpop.f32.mrb[46].mxu0 }
 0xfe1   : > { %v1676_v13 = vadd.f32 %v2487_v4, %v1655_v10  ;;  %v1656_v14 = vmul.f32 %v2481_v52, %v1632_v12  ;;  %v2048_v15 = vpop.f32.mrb[47].mxu0 }
 0xfe3   : > { %v1690_v17 = vmax.f32 %v1676_v13, 0.0  ;;  %v1677_v18 = vadd.f32 %v2487_v4, %v1656_v14 }
 0xfe5   : > { %v1703_v20 = vsel %vm1336_vm5, %v1690_v17, 0.0  ;;  %v1691_v22 = vmax.f32 %v1677_v18, 0.0 }
 0xfe6   : > { %v1704_v23 = vadd.f32 %v1703_v20, %v1702_v1 }
 0xfe7   : > { %v1716_v24 = vsel %vm1336_vm5, %v1691_v22, 0.0 }
 0xfe8   : > { %v1718_v25 = vmul.f32 0.14285715, %v1704_v23  ;;  %v1717_v26 = vadd.f32 %v1716_v24, %v1715_v6 }
 0xfea   : > { %v1728_v28 = vadd.f32 %v1723_v27, %v1718_v25  ;;  %v1719_v29 = vmul.f32 0.14285715, %v1717_v26 }
 0xfec   : > { %v1730_v52 = vmax.f32 %v1728_v28, 0.0  ;;  %v1729_v31 = vadd.f32 %v1725_v30, %v1719_v29 }
 0xfee   : > { %v1742_v5 = vmul.f32 %v1735_v19, %v1730_v52  ;;  %v1731_v32 = vmax.f32 %v1729_v31, 0.0 }
 0xff0   : > { %v1908_v4 = vpack.c.bf16 %v1742_v5, %v1742_v5  ;;  %v1743_v33 = vmul.f32 %v1740_v16, %v1731_v32 }
 0xff2   : > { %1753 = vst.msk [vmem:[%s507_s16] sm:$0xf] %vm1752_vm7, %v1908_v4  ;;  %v1909_v34 = vpack.c.bf16 %v1743_v33, %v1743_v33 }
 0xff4   : > { %1754 = vst.msk [vmem:[%s507_s16 + $0x4] sm:$0xf] %vm1752_vm7, %v1909_v34 }
 0xff5 PF: > { %s24_s29 = sadd.s32 1, %s2083_s29  }
 0xff6   : > { %p21_p4 = scmp.ge.s32.totalorder %s24_s29, 4  }
 0xff8   :  { %23 = sbr.rel (!%p21_p4) target bundleno = 1 (0x1), region = 112 }

// kernel: particle_net_forward.5
= control target key start
LH: loop header
LB: loop body
LE: loop exit
PB: predicated region body
PF: predicated region fallthrough
CT: control target
= control target key end

     0   :  { %s2231_s29 = smov 0   ;;  %s2624_s0 = inlined_call_operand.vmem [shape: bf16[2,16,32], index: 0, kind: input, shape index: {}, may-alias: {0,1}]   ;;  %s2625_s1 = inlined_call_operand.vmem [shape: bf16[2,16,32], index: 1, kind: input, shape index: {}, may-alias: {0,1}]   ;;  %s2626_s2 = inlined_call_operand.vmem [shape: f32[2,16,1], index: 2, kind: input, shape index: {}]   ;;  %s2627_s3 = inlined_call_operand.vmem [shape: bf16[32,192], index: 3, kind: input, shape index: {}]   ;;  %s2628_s4 = inlined_call_operand.vmem [shape: f32[1,64], index: 4, kind: input, shape index: {}]   ;;  %s2629_s5 = inlined_call_operand.vmem [shape: f32[1,64], index: 5, kind: input, shape index: {}]   ;;  %s2630_s6 = inlined_call_operand.vmem [shape: bf16[64,64], index: 6, kind: input, shape index: {}]   ;;  %s2631_s7 = inlined_call_operand.vmem [shape: f32[1,64], index: 7, kind: input, shape index: {}]   ;;  %s2632_s8 = inlined_call_operand.vmem [shape: f32[1,64], index: 8, kind: input, shape index: {}]   ;;  %s2633_s9 = inlined_call_operand.vmem [shape: bf16[64,64], index: 9, kind: input, shape index: {}]   ;;  %s2634_s10 = inlined_call_operand.vmem [shape: f32[1,64], index: 10, kind: input, shape index: {}]   ;;  %s2635_s11 = inlined_call_operand.vmem [shape: f32[1,64], index: 11, kind: input, shape index: {}]   ;;  %s2636_s12 = inlined_call_operand.vmem [shape: f32[1,64], index: 12, kind: input, shape index: {}]   ;;  %s2637_s13 = inlined_call_operand.vmem [shape: f32[1,64], index: 13, kind: input, shape index: {}]   ;;  %s2638_s14 = inlined_call_operand.vmem [shape: bf16[2,16,64], index: 14, kind: output, shape index: {}]  }
   0x1 LB: > { %s1876_s30 = sadd.s32 4294967295, %s2150_s29   ;;  %p1880_p0 = scmp.ge.s32.totalorder %s2150_s29, 1  ;;  %s2150_s29 = sphi %s2231_s29, %s24_s29  }
   0x2   : > { %p432_p1 = scmp.lt.s32.totalorder %s2150_s29, 3 }
   0x4   : > { %p433_p2 = pnand %p1880_p0, %p432_p1 }
   0x5   : > { %p488_p3 = scmp.lt.s32.totalorder (!%p433_p2), %s1876_s30, 1  ;;  %vm517_vm0 = vcmask (!%p433_p2), 261120   ;;  %v2152_v9 = vmov (!%p433_p2), 0   ;;  %v641_v14 = vlaneseq (!%p433_p2)  ;;  %vm697_vm5 = vcmask (!%p433_p2), 130048   ;;  %s2155_s20 = smov (!%p433_p2), 64  }
   0x6   : > { %436 = sbr.rel (%p433_p2) target bundleno = 4087 (0xff7), region = 76  ;;  %vm2108_vm1 = vmpackc.low (!%p433_p2), %vm517_vm0, %vm517_vm0  ;;  %1110 = vmatprep.mubr.bf16.mxu1 (!%p433_p2), %v2152_v9  ;;  %v2153_v52 = vmov (!%p433_p2), 0.0  }
   0x7   : > { %v642_v16 = vshrl.u32 (!%p433_p2), %v641_v14, 7  ;;  %v2260_v21 = vand.u32 (!%p433_p2), 127, %v641_v14 }
   0x9   : > { %v643_v17 = vsub.s32 (!%p433_p2), 0, %v642_v16  ;;  %v651_v25 = vadd.s32 (!%p433_p2), 8, %v642_v16  ;;  %vm693_vm4 = vcmp.eq.s32.totalorder (!%p433_p2), %v2260_v21, %v642_v16 }
   0xb   : > { %vm694_vm6 = vcmp.eq.s32.totalorder (!%p433_p2), %v2260_v21, %v651_v25 }
   0xd   : > { %s2640_s30 = smov (!%p488_p3, %s1876_s30), 1 }
   0xe   : > { %s2239_s15 = sshll.u32 %s2640_s30, 3  ;;  %s1956_s16 = sshll.u32 %s2640_s30, 4 }
   0xf   : > { %s492_s19 = scalar_lea.vmem %s2624_s0, %s2239_s15  ;;  %s502_s22 = scalar_lea.vmem %s2626_s2, %s1956_s16 }
  0x10   : > { %v1961_v0 = vld [vmem:[%s492_s19] sm:$0xff]   ;;  %v2257_v8 = vld [vmem:[%s502_s22 + $0x8] sm:$0xff]  ;;  %s497_s17 = scalar_lea.vmem %s2625_s1, %s2239_s15  ;;  %s507_s27 = scalar_lea.vmem %s2638_s14, %s2239_s15 }
  0x11   : > { %v2250_v1 = vld [vmem:[%s502_s22] sm:$0xff]  ;;  %v1962_v2 = vunpack.c.l.bf16 %v1961_v0  ;;  %v1963_v3 = vunpack.c.h.bf16 %v1961_v0  ;;  %2109 = vmatprep.subr.msk.bf16.mxu0 %vm2108_vm1, %v1961_v0 }
  0x12   : > { %652 = vxpose.xlu1.b32.start [1/2] (short) (narrow) %v2250_v1, 8  ;;  %2112 = vmatpush3.bf16.xpose.msk.msra.mxu0 %vm2108_vm1, %v1961_v0 }
  0x13   : > { %v599_v4 = vmul.f32 %v1962_v2, %v1962_v2  ;;  %v600_v5 = vmul.f32 %v1963_v3, %v1963_v3  ;;  %2002 = vmatprep.mubr.msk.f32.mxu0 %vm517_vm0, %v1962_v2  ;;  %2005 = vmatprep.subr.bf16.mxu0 %v2153_v52 }
  0x15   : > { %v601_v6 = vsel %vm517_vm0, %v599_v4, 0.0  ;;  %v604_v7 = vsel %vm517_vm0, %v600_v5, 0.0 }
  0x16   : > { %602 = vadd.xlane.f32.xlu0 %v601_v6  ;;  %653 = vxpose.xlu1.b32.end [2/2] (short) (narrow) %v2257_v8, 8 }
  0x19   : > { %2003 = vmatmul.mubr.msk.f32.vlgmr.msra.gmra.mrb[0].mxu0 %vm517_vm0, %v1963_v3 }
  0x1a   : > { %605 = vadd.xlane.f32.xlu0 %v604_v7 }
  0x34   : > { %2127 = vset.pattern.permute.xlu1 %v2152_v9 }
  0x92   : > { %v668_v15 = vpop.trf.xlu1 }
  0x93   : > { %vm684_vm2 = vcmp.gt.f32.partialorder %v668_v15, 0.0 }
  0x94   : > { %v685_v18 = vsel %vm684_vm2, 1, %v2152_v9 }
  0x95   : > { %v689_v19 = vrot.slane %v685_v18, %v643_v17 }
  0x97   : > { %vm690_vm3 = vcmp.eq.s32.totalorder %v689_v19, 1 }
  0xa3   : > { %v603_v10 = vpop.xlane.xlu0 %602 }
  0xa4   : > { %609 = vxpose.xlu0.b32.start [1/2] (short) (narrow) %v603_v10, 8 }
  0xa7   : > { %v606_v11 = vpop.xlane.xlu0 %605 }
  0xa8   : > { %610 = vxpose.xlu0.b32.end [2/2] (short) (narrow) %v606_v11, 8 }
  0xd1   : > { %2128 = vset.pattern.permute.xlu0 %v2152_v9 }
  0xec   : > { %v2004_v12 = vpop.f32.mrb[0].mxu0 }
  0xed   : > { %v590_v13 = vpop.f32.mrb[1].mxu0  ;;  %v608_v20 = vmul.f32 2.0, %v2004_v12 }
  0xee   : > { %v607_v22 = vmul.f32 2.0, %v590_v13 }
 0x124   : > { %v625_v23 = vpop.trf.xlu0 }
 0x125   : > { %v644_v24 = vrot.slane %v625_v23, %v643_v17 }
 0x127   : > { %v645_v26 = vsub.f32 %v607_v22, %v644_v24  ;;  %v646_v27 = vsub.f32 %v608_v20, %v644_v24 }
 0x129   : > { %v691_v28 = vsel %vm690_vm3, %v645_v26, -1e+30  ;;  %v692_v29 = vsel %vm690_vm3, %v646_v27, -1e+30 }
 0x12a   : > { %v695_v30 = vsel %vm693_vm4, -3e+30, %v691_v28  ;;  %v696_v32 = vsel %vm694_vm6, -3e+30, %v692_v29 }
 0x12b   : > { %v698_v31 = vsel %vm697_vm5, %v695_v30, -inf  ;;  %v701_v33 = vsel %vm697_vm5, %v696_v32, -inf }
 0x12c   : > { %699 = vmax.xlane.f32.xlu1 %v698_v31 }
 0x130   : > { %702 = vmax.xlane.f32.xlu1 %v701_v33 }
 0x1b9   : > { %v700_v34 = vpop.xlane.xlu1 %699 }
 0x1ba   : > { %vm704_vm7 = vcmp.eq.f32.partialorder %v695_v30, %v700_v34 }
 0x1bb   : > { %v706_v35 = vsel %vm704_vm7, %v2260_v21, 16 }
 0x1bc   : > { %v708_v36 = vsel %vm697_vm5, %v706_v35, 2147483647 }
 0x1bd   : > { %v703_v37 = vpop.xlane.xlu1 %702  ;;  %v710_v38 = vshra.s32 %v708_v36, 16  ;;  %v709_v44 = vand.u32 65535, %v708_v36 }
 0x1be   : > { %vm705_vm8 = vcmp.eq.f32.partialorder %v696_v32, %v703_v37 }
 0x1bf   : > { %v707_v39 = vsel %vm705_vm8, %v2260_v21, 16  ;;  %v712_v40 = vcvt.s32.f32 %v710_v38  ;;  %v711_v46 = vcvt.s32.f32 %v709_v44 }
 0x1c0   : > { %v723_v41 = vsel %vm697_vm5, %v707_v39, 2147483647 }
 0x1c1   : > { %713 = vmin.xlane.f32.xlu1 %v712_v40  ;;  %v725_v42 = vshra.s32 %v723_v41, 16  ;;  %v724_v47 = vand.u32 65535, %v723_v41 }
 0x1c3   : > { %v727_v43 = vcvt.s32.f32 %v725_v42  ;;  %v726_v50 = vcvt.s32.f32 %v724_v47 }
 0x1c5   : > { %728 = vmin.xlane.f32.xlu1 %v727_v43 }
 0x24e   : > { %v714_v45 = vpop.xlane.xlu1 %713 }
 0x24f   : > { %vm715_vm9 = vcmp.eq.f32.partialorder %v712_v40, %v714_v45  ;;  %v720_v53 = vcvt.f32.s32 %v714_v45 }
 0x250   : > { %v716_v48 = vsel %vm715_vm9, %v711_v46, inf }
 0x251   : > { %717 = vmin.xlane.f32.xlu0 %v716_v48  ;;  %v721_v55 = vshll.u32 %v720_v53, 16 }
 0x252   : > { %v729_v49 = vpop.xlane.xlu1 %728 }
 0x253   : > { %vm730_vm10 = vcmp.eq.f32.partialorder %v727_v43, %v729_v49  ;;  %v735_v56 = vcvt.f32.s32 %v729_v49 }
 0x254   : > { %v731_v51 = vsel %vm730_vm10, %v726_v50, inf }
 0x255   : > { %732 = vmin.xlane.f32.xlu1 %v731_v51  ;;  %v736_v60 = vshll.u32 %v735_v56, 16 }
 0x2de   : > { %v718_v54 = vpop.xlane.xlu0 %717 }
 0x2df   : > { %v719_v57 = vcvt.f32.s32 %v718_v54 }
 0x2e1   : > { %v722_v58 = vadd.s32 %v721_v55, %v719_v57 }
 0x2e2   : > { %v733_v59 = vpop.xlane.xlu1 %732 }
 0x2e3   : > { %v734_v61 = vcvt.f32.s32 %v733_v59  ;;  %vm738_vm11 = vcmp.eq.s32.totalorder %v2260_v21, %v722_v58 }
 0x2e4   : > { %v746_v62 = vsel %vm738_vm11, -3e+30, %v695_v30  ;;  %v1893_v2 = vsel %vm738_vm11, 1.0, %v2153_v52 }
 0x2e5   : > { %v737_v63 = vadd.s32 %v736_v60, %v734_v61  ;;  %v748_v0 = vsel %vm697_vm5, %v746_v62, -inf }
 0x2e6   : > { %749 = vmax.xlane.f32.xlu1 %v748_v0 }
 0x2e7   : > { %vm739_vm12 = vcmp.eq.s32.totalorder %v2260_v21, %v737_v63 }
 0x2e8   : > { %v747_v3 = vsel %vm739_vm12, -3e+30, %v696_v32  ;;  %v1894_v4 = vsel %vm739_vm12, 1.0, %v2153_v52 }
 0x2e9   : > { %v751_v5 = vsel %vm697_vm5, %v747_v3, -inf  ;;  %v744_v6 = vpack.c.bf16 %v1894_v4, %v1893_v2 }
 0x2ea   : > { %752 = vmax.xlane.f32.xlu1 %v751_v5 }
 0x2eb   : > { %745 = vst.msk [vmem:[#allocation2] sm:$0xff] %vm697_vm5, %v744_v6 }
 0x373   : > { %v750_v7 = vpop.xlane.xlu1 %749 }
 0x374   : > { %vm754_vm13 = vcmp.eq.f32.partialorder %v746_v62, %v750_v7 }
 0x375   : > { %v756_v9 = vsel %vm754_vm13, %v2260_v21, 16 }
 0x376   : > { %v758_v10 = vsel %vm697_vm5, %v756_v9, 2147483647 }
 0x377   : > { %v753_v11 = vpop.xlane.xlu1 %752  ;;  %v760_v12 = vshra.s32 %v758_v10, 16  ;;  %v759_v18 = vand.u32 65535, %v758_v10 }
 0x378   : > { %vm755_vm14 = vcmp.eq.f32.partialorder %v747_v3, %v753_v11 }
 0x379   : > { %v757_v13 = vsel %vm755_vm14, %v2260_v21, 16  ;;  %v762_v14 = vcvt.s32.f32 %v760_v12  ;;  %v761_v20 = vcvt.s32.f32 %v759_v18 }
 0x37a   : > { %v773_v15 = vsel %vm697_vm5, %v757_v13, 2147483647 }
 0x37b   : > { %763 = vmin.xlane.f32.xlu1 %v762_v14  ;;  %v775_v16 = vshra.s32 %v773_v15, 16  ;;  %v774_v22 = vand.u32 65535, %v773_v15 }
 0x37d   : > { %v777_v17 = vcvt.s32.f32 %v775_v16  ;;  %v776_v25 = vcvt.s32.f32 %v774_v22 }
 0x37f   : > { %778 = vmin.xlane.f32.xlu1 %v777_v17 }
 0x408   : > { %v764_v19 = vpop.xlane.xlu1 %763 }
 0x409   : > { %vm765_vm15 = vcmp.eq.f32.partialorder %v762_v14, %v764_v19  ;;  %v770_v27 = vcvt.f32.s32 %v764_v19 }
 0x40a   : > { %v766_v23 = vsel %vm765_vm15, %v761_v20, inf }
 0x40b   : > { %767 = vmin.xlane.f32.xlu1 %v766_v23  ;;  %v771_v29 = vshll.u32 %v770_v27, 16 }
 0x40c   : > { %v779_v24 = vpop.xlane.xlu1 %778 }
 0x40d   : > { %vm780_vm1 = vcmp.eq.f32.partialorder %v777_v17, %v779_v24  ;;  %v785_v30 = vcvt.f32.s32 %v779_v24 }
 0x40e   : > { %v781_v26 = vsel %vm780_vm1, %v776_v25, inf }
 0x40f   : > { %782 = vmin.xlane.f32.xlu1 %v781_v26  ;;  %v786_v34 = vshll.u32 %v785_v30, 16 }
 0x498   : > { %v768_v28 = vpop.xlane.xlu1 %767 }
 0x499   : > { %v769_v31 = vcvt.f32.s32 %v768_v28 }
 0x49b   : > { %v772_v32 = vadd.s32 %v771_v29, %v769_v31 }
 0x49c   : > { %v783_v33 = vpop.xlane.xlu1 %782 }
 0x49d   : > { %v784_v35 = vcvt.f32.s32 %v783_v33  ;;  %vm788_vm2 = vcmp.eq.s32.totalorder %v2260_v21, %v772_v32 }
 0x49e   : > { %v796_v36 = vsel %vm788_vm2, -3e+30, %v746_v62  ;;  %v1895_v39 = vsel %vm788_vm2, 1.0, %v2153_v52 }
 0x49f   : > { %v787_v37 = vadd.s32 %v786_v34, %v784_v35  ;;  %v798_v38 = vsel %vm697_vm5, %v796_v36, -inf }
 0x4a0   : > { %799 = vmax.xlane.f32.xlu1 %v798_v38 }
 0x4a1   : > { %vm789_vm3 = vcmp.eq.s32.totalorder %v2260_v21, %v787_v37 }
 0x4a2   : > { %v797_v40 = vsel %vm789_vm3, -3e+30, %v747_v3  ;;  %v1896_v41 = vsel %vm789_vm3, 1.0, %v2153_v52 }
 0x4a3   : > { %v801_v42 = vsel %vm697_vm5, %v797_v40, -inf  ;;  %v794_v43 = vpack.c.bf16 %v1896_v41, %v1895_v39 }
 0x4a4   : > { %802 = vmax.xlane.f32.xlu1 %v801_v42 }
 0x4a5   : > { %795 = vst.msk [vmem:[#allocation2 + $0x8] sm:$0xff] %vm697_vm5, %v794_v43 }
 0x52d   : > { %v800_v44 = vpop.xlane.xlu1 %799 }
 0x52e   : > { %vm804_vm4 = vcmp.eq.f32.partialorder %v796_v36, %v800_v44 }
 0x52f   : > { %v806_v45 = vsel %vm804_vm4, %v2260_v21, 16 }
 0x530   : > { %v808_v46 = vsel %vm697_vm5, %v806_v45, 2147483647 }
 0x531   : > { %v803_v47 = vpop.xlane.xlu1 %802  ;;  %v810_v48 = vshra.s32 %v808_v46, 16  ;;  %v809_v55 = vand.u32 65535, %v808_v46 }
 0x532   : > { %vm805_vm6 = vcmp.eq.f32.partialorder %v797_v40, %v803_v47 }
 0x533   : > { %v807_v49 = vsel %vm805_vm6, %v2260_v21, 16  ;;  %v812_v50 = vcvt.s32.f32 %v810_v48  ;;  %v811_v57 = vcvt.s32.f32 %v809_v55 }
 0x534   : > { %v823_v51 = vsel %vm697_vm5, %v807_v49, 2147483647 }
 0x535   : > { %813 = vmin.xlane.f32.xlu1 %v812_v50  ;;  %v825_v53 = vshra.s32 %v823_v51, 16  ;;  %v824_v58 = vand.u32 65535, %v823_v51 }
 0x537   : > { %v827_v54 = vcvt.s32.f32 %v825_v53  ;;  %v826_v61 = vcvt.s32.f32 %v824_v58 }
 0x539   : > { %828 = vmin.xlane.f32.xlu1 %v827_v54 }
 0x5c2   : > { %v814_v56 = vpop.xlane.xlu1 %813 }
 0x5c3   : > { %vm815_vm7 = vcmp.eq.f32.partialorder %v812_v50, %v814_v56  ;;  %v820_v63 = vcvt.f32.s32 %v814_v56 }
 0x5c4   : > { %v816_v59 = vsel %vm815_vm7, %v811_v57, inf }
 0x5c5   : > { %817 = vmin.xlane.f32.xlu0 %v816_v59  ;;  %v821_v2 = vshll.u32 %v820_v63, 16 }
 0x5c6   : > { %v829_v60 = vpop.xlane.xlu1 %828 }
 0x5c7   : > { %vm830_vm8 = vcmp.eq.f32.partialorder %v827_v54, %v829_v60  ;;  %v835_v3 = vcvt.f32.s32 %v829_v60 }
 0x5c8   : > { %v831_v62 = vsel %vm830_vm8, %v826_v61, inf }
 0x5c9   : > { %832 = vmin.xlane.f32.xlu1 %v831_v62  ;;  %v836_v7 = vshll.u32 %v835_v3, 16 }
 0x652   : > { %v818_v0 = vpop.xlane.xlu0 %817 }
 0x653   : > { %v819_v4 = vcvt.f32.s32 %v818_v0 }
 0x655   : > { %v822_v5 = vadd.s32 %v821_v2, %v819_v4 }
 0x656   : > { %v833_v6 = vpop.xlane.xlu1 %832 }
 0x657   : > { %v834_v9 = vcvt.f32.s32 %v833_v6  ;;  %vm838_vm9 = vcmp.eq.s32.totalorder %v2260_v21, %v822_v5 }
 0x658   : > { %v846_v10 = vsel %vm838_vm9, -3e+30, %v796_v36  ;;  %v1897_v13 = vsel %vm838_vm9, 1.0, %v2153_v52 }
 0x659   : > { %v837_v11 = vadd.s32 %v836_v7, %v834_v9  ;;  %v848_v12 = vsel %vm697_vm5, %v846_v10, -inf }
 0x65a   : > { %849 = vmax.xlane.f32.xlu0 %v848_v12 }
 0x65b   : > { %vm839_vm10 = vcmp.eq.s32.totalorder %v2260_v21, %v837_v11 }
 0x65c   : > { %v847_v14 = vsel %vm839_vm10, -3e+30, %v797_v40  ;;  %v1898_v15 = vsel %vm839_vm10, 1.0, %v2153_v52 }
 0x65d   : > { %v851_v16 = vsel %vm697_vm5, %v847_v14, -inf  ;;  %v844_v17 = vpack.c.bf16 %v1898_v15, %v1897_v13 }
 0x65e   : > { %852 = vmax.xlane.f32.xlu1 %v851_v16 }
 0x65f   : > { %845 = vst.msk [vmem:[#allocation2 + $0x10] sm:$0xff] %vm697_vm5, %v844_v17 }
 0x6e7   : > { %v850_v18 = vpop.xlane.xlu0 %849 }
 0x6e8   : > { %vm854_vm11 = vcmp.eq.f32.partialorder %v846_v10, %v850_v18 }
 0x6e9   : > { %v856_v19 = vsel %vm854_vm11, %v2260_v21, 16 }
 0x6ea   : > { %v858_v20 = vsel %vm697_vm5, %v856_v19, 2147483647 }
 0x6eb   : > { %v853_v22 = vpop.xlane.xlu1 %852  ;;  %v860_v23 = vshra.s32 %v858_v20, 16  ;;  %v859_v29 = vand.u32 65535, %v858_v20 }
 0x6ec   : > { %vm855_vm12 = vcmp.eq.f32.partialorder %v847_v14, %v853_v22 }
 0x6ed   : > { %v857_v24 = vsel %vm855_vm12, %v2260_v21, 16  ;;  %v862_v25 = vcvt.s32.f32 %v860_v23  ;;  %v861_v31 = vcvt.s32.f32 %v859_v29 }
 0x6ee   : > { %v873_v26 = vsel %vm697_vm5, %v857_v24, 2147483647 }
 0x6ef   : > { %863 = vmin.xlane.f32.xlu0 %v862_v25  ;;  %v875_v27 = vshra.s32 %v873_v26, 16  ;;  %v874_v32 = vand.u32 65535, %v873_v26 }
 0x6f1   : > { %v877_v28 = vcvt.s32.f32 %v875_v27  ;;  %v876_v35 = vcvt.s32.f32 %v874_v32 }
 0x6f3   : > { %878 = vmin.xlane.f32.xlu1 %v877_v28 }
 0x77c   : > { %v864_v30 = vpop.xlane.xlu0 %863 }
 0x77d   : > { %vm865_vm13 = vcmp.eq.f32.partialorder %v862_v25, %v864_v30  ;;  %v870_v37 = vcvt.f32.s32 %v864_v30 }
 0x77e   : > { %v866_v33 = vsel %vm865_vm13, %v861_v31, inf }
 0x77f   : > { %867 = vmin.xlane.f32.xlu0 %v866_v33  ;;  %v871_v39 = vshll.u32 %v870_v37, 16 }
 0x780   : > { %v879_v34 = vpop.xlane.xlu1 %878 }
 0x781   : > { %vm880_vm14 = vcmp.eq.f32.partialorder %v877_v28, %v879_v34  ;;  %v885_v40 = vcvt.f32.s32 %v879_v34 }
 0x782   : > { %v881_v36 = vsel %vm880_vm14, %v876_v35, inf }
 0x783   : > { %882 = vmin.xlane.f32.xlu1 %v881_v36  ;;  %v886_v44 = vshll.u32 %v885_v40, 16  ;;  %v2131_v40 = vld [vmem:[%s2627_s3] ss:$8 sps:$4 sm:$0xff]  }
 0x80c   : > { %v868_v38 = vpop.xlane.xlu0 %867 }
 0x80d   : > { %v869_v41 = vcvt.f32.s32 %v868_v38 }
 0x80f   : > { %v872_v42 = vadd.s32 %v871_v39, %v869_v41  ;;  %v2129_v39 = vld [vmem:[%s2627_s3 + $0x4] ss:$8 sps:$4 sm:$0xff]   ;;  %v2132_v41 = vld [vmem:[%s2627_s3 + $0x14] ss:$8 sps:$4 sm:$0xff]  }
 0x810   : > { %v883_v43 = vpop.xlane.xlu1 %882  ;;  %1078 = vmatprep.subr.bf16.mxu1 %v2129_v39  ;;  %v2138_v39 = vld [vmem:[%s2630_s6 + $0x10] sm:$0xff]  }
 0x811   : > { %v884_v45 = vcvt.f32.s32 %v883_v43  ;;  %vm888_vm15 = vcmp.eq.s32.totalorder %v2260_v21, %v872_v42  ;;  %1079 = vmatpush1.bf16.msra.mxu1 %v2131_v40  ;;  %v2134_v42 = vld [vmem:[%s2627_s3 + $0x10] ss:$8 sps:$4 sm:$0xff]   ;;  %v2135_v43 = vld [vmem:[%s497_s17] sm:$0xff]  }
 0x812   : > { %v896_v46 = vsel %vm888_vm15, -3e+30, %v846_v10  ;;  %v1899_v49 = vsel %vm888_vm15, 1.0, %v2153_v52  ;;  %1080 = vmatprep.subr.bf16.mxu1 %v2132_v41  ;;  %v2139_v40 = vld [vmem:[%s2630_s6 + $0x18] sm:$0xff]  }
 0x813   : > { %v887_v47 = vadd.s32 %v886_v44, %v884_v45  ;;  %v898_v48 = vsel %vm697_vm5, %v896_v46, -inf }
 0x814   : > { %899 = vmax.xlane.f32.xlu0 %v898_v48 }
 0x815   : > { %vm889_vm1 = vcmp.eq.s32.totalorder %v2260_v21, %v887_v47  ;;  %1081 = vmatpush1.bf16.msra.mxu1 %v2134_v42 }
 0x816   : > { %v897_v50 = vsel %vm889_vm1, -3e+30, %v847_v14  ;;  %v1900_v51 = vsel %vm889_vm1, 1.0, %v2153_v52  ;;  %2113 = vmatprep.subr.bf16.mxu1 %v2153_v52  ;;  %vm2154_vm1 = vmmov 0  }
 0x817   : > { %v901_v53 = vsel %vm697_vm5, %v897_v50, -inf  ;;  %v894_v54 = vpack.c.bf16 %v1900_v51, %v1899_v49  ;;  %2007 = vmatprep.mubr.msk.bf16.mxu0 %vm2154_vm1, %v2153_v52 }
 0x818   : > { %902 = vmax.xlane.f32.xlu1 %v901_v53  ;;  %1912 = vmatmul.mubr.msk.bf16.vlgmr.msra.gmra.mrb[0].mxu1 %vm517_vm0, %v2135_v43 }
 0x819   : > { %895 = vst.msk [vmem:[#allocation2 + $0x18] sm:$0xff] %vm697_vm5, %v894_v54  ;;  %2023 = vmatprep.mubr.msk.bf16.mxu1 %vm2154_vm1, %v2153_v52 }
 0x8a1   : > { %v900_v55 = vpop.xlane.xlu0 %899 }
 0x8a2   : > { %vm904_vm2 = vcmp.eq.f32.partialorder %v896_v46, %v900_v55 }
 0x8a3   : > { %v906_v56 = vsel %vm904_vm2, %v2260_v21, 16 }
 0x8a4   : > { %v908_v57 = vsel %vm697_vm5, %v906_v56, 2147483647 }
 0x8a5   : > { %v903_v58 = vpop.xlane.xlu1 %902  ;;  %v910_v59 = vshra.s32 %v908_v57, 16  ;;  %v909_v2 = vand.u32 65535, %v908_v57 }
 0x8a6   : > { %vm905_vm3 = vcmp.eq.f32.partialorder %v897_v50, %v903_v58 }
 0x8a7   : > { %v907_v60 = vsel %vm905_vm3, %v2260_v21, 16  ;;  %v912_v61 = vcvt.s32.f32 %v910_v59  ;;  %v911_v4 = vcvt.s32.f32 %v909_v2 }
 0x8a8   : > { %v923_v62 = vsel %vm697_vm5, %v907_v60, 2147483647 }
 0x8a9   : > { %913 = vmin.xlane.f32.xlu0 %v912_v61  ;;  %v925_v63 = vshra.s32 %v923_v62, 16  ;;  %v924_v5 = vand.u32 65535, %v923_v62 }
 0x8ab   : > { %v927_v0 = vcvt.s32.f32 %v925_v63  ;;  %v926_v9 = vcvt.s32.f32 %v924_v5 }
 0x8ad   : > { %928 = vmin.xlane.f32.xlu1 %v927_v0 }
 0x936   : > { %v914_v3 = vpop.xlane.xlu0 %913 }
 0x937   : > { %vm915_vm4 = vcmp.eq.f32.partialorder %v912_v61, %v914_v3  ;;  %v920_v11 = vcvt.f32.s32 %v914_v3 }
 0x938   : > { %v916_v6 = vsel %vm915_vm4, %v911_v4, inf }
 0x939   : > { %917 = vmin.xlane.f32.xlu0 %v916_v6  ;;  %v921_v13 = vshll.u32 %v920_v11, 16 }
 0x93a   : > { %v929_v7 = vpop.xlane.xlu1 %928 }
 0x93b   : > { %vm930_vm6 = vcmp.eq.f32.partialorder %v927_v0, %v929_v7  ;;  %v935_v14 = vcvt.f32.s32 %v929_v7  ;;  %v2351_v7 = vpop.f32.mrb[0].mxu1 }
 0x93c   : > { %v931_v10 = vsel %vm930_vm6, %v926_v9, inf  ;;  %v2353_v9 = vpop.f32.mrb[1].mxu1 }
 0x93d   : > { %932 = vmin.xlane.f32.xlu1 %v931_v10  ;;  %v936_v18 = vshll.u32 %v935_v14, 16  ;;  %v2355_v10 = vpop.f32.mrb[2].mxu1 }
 0x93e   : > { %v1121_v11 = vpack.c.bf16 %v2355_v10, %v2351_v7 }
 0x9c6   : > { %v918_v12 = vpop.xlane.xlu0 %917 }
 0x9c7   : > { %v919_v15 = vcvt.f32.s32 %v918_v12  ;;  %v2359_v12 = vpop.f32.mrb[3].mxu1 }
 0x9c9   : > { %v922_v16 = vadd.s32 %v921_v13, %v919_v15 }
 0x9ca   : > { %v933_v17 = vpop.xlane.xlu1 %932 }
 0x9cb   : > { %v934_v19 = vcvt.f32.s32 %v933_v17  ;;  %vm938_vm7 = vcmp.eq.s32.totalorder %v2260_v21, %v922_v16 }
 0x9cc   : > { %v946_v20 = vsel %vm938_vm7, -3e+30, %v896_v46  ;;  %v1901_v24 = vsel %vm938_vm7, 1.0, %v2153_v52  ;;  %vm1794_vm7 = vcmask 519168  }
 0x9cd   : > { %v937_v22 = vadd.s32 %v936_v18, %v934_v19  ;;  %v948_v23 = vsel %vm697_vm5, %v946_v20, -inf }
 0x9ce   : > { %949 = vmax.xlane.f32.xlu0 %v948_v23 }
 0x9cf   : > { %vm939_vm8 = vcmp.eq.s32.totalorder %v2260_v21, %v937_v22 }
 0x9d0   : > { %v947_v25 = vsel %vm939_vm8, -3e+30, %v897_v50  ;;  %v1902_v26 = vsel %vm939_vm8, 1.0, %v2153_v52 }
 0x9d1   : > { %v951_v27 = vsel %vm697_vm5, %v947_v25, -inf  ;;  %v944_v28 = vpack.c.bf16 %v1902_v26, %v1901_v24 }
 0x9d2   : > { %952 = vmax.xlane.f32.xlu1 %v951_v27 }
 0x9d3   : > { %945 = vst.msk [vmem:[#allocation2 + $0x20] sm:$0xff] %vm697_vm5, %v944_v28 }
 0xa5b   : > { %v950_v29 = vpop.xlane.xlu0 %949 }
 0xa5c   : > { %vm954_vm9 = vcmp.eq.f32.partialorder %v946_v20, %v950_v29 }
 0xa5d   : > { %v956_v30 = vsel %vm954_vm9, %v2260_v21, 16 }
 0xa5e   : > { %v958_v31 = vsel %vm697_vm5, %v956_v30, 2147483647 }
 0xa5f   : > { %v953_v32 = vpop.xlane.xlu1 %952  ;;  %v960_v33 = vshra.s32 %v958_v31, 16  ;;  %v959_v44 = vand.u32 65535, %v958_v31 }
 0xa60   : > { %vm955_vm10 = vcmp.eq.f32.partialorder %v947_v25, %v953_v32 }
 0xa61   : > { %v957_v34 = vsel %vm955_vm10, %v2260_v21, 16  ;;  %v962_v35 = vcvt.s32.f32 %v960_v33  ;;  %v961_v46 = vcvt.s32.f32 %v959_v44  ;;  %v1144_v33 = vld [vmem:[#allocation2 + $0x20] sm:$0xff] }
 0xa62   : > { %v973_v36 = vsel %vm697_vm5, %v957_v34, 2147483647  ;;  %v1141_v34 = vld [vmem:[#allocation2 + $0x8] sm:$0xff] }
 0xa63   : > { %963 = vmin.xlane.f32.xlu0 %v962_v35  ;;  %v975_v37 = vshra.s32 %v973_v36, 16  ;;  %v974_v47 = vand.u32 65535, %v973_v36  ;;  %v1142_v36 = vld [vmem:[#allocation2 + $0x10] sm:$0xff] }
 0xa65   : > { %v977_v38 = vcvt.s32.f32 %v975_v37  ;;  %v976_v50 = vcvt.s32.f32 %v974_v47  ;;  %v1143_v37 = vld [vmem:[#allocation2 + $0x18] sm:$0xff] }
 0xa67   : > { %978 = vmin.xlane.f32.xlu1 %v977_v38 }
 0xaf0   : > { %v964_v45 = vpop.xlane.xlu0 %963 }
 0xaf1   : > { %vm965_vm11 = vcmp.eq.f32.partialorder %v962_v35, %v964_v45  ;;  %v970_v53 = vcvt.f32.s32 %v964_v45 }
 0xaf2   : > { %v966_v48 = vsel %vm965_vm11, %v961_v46, inf }
 0xaf3   : > { %967 = vmin.xlane.f32.xlu0 %v966_v48  ;;  %v971_v55 = vshll.u32 %v970_v53, 16 }
 0xaf4   : > { %v979_v49 = vpop.xlane.xlu1 %978 }
 0xaf5   : > { %vm980_vm12 = vcmp.eq.f32.partialorder %v977_v38, %v979_v49  ;;  %v985_v56 = vcvt.f32.s32 %v979_v49  ;;  %v2136_v38 = vld [vmem:[%s2630_s6] sm:$0xff]  }
 0xaf6   : > { %v981_v51 = vsel %vm980_vm12, %v976_v50, inf }
 0xaf7   : > { %982 = vmin.xlane.f32.xlu1 %v981_v51  ;;  %v986_v60 = vshll.u32 %v985_v56, 16 }
 0xb80   : > { %v968_v54 = vpop.xlane.xlu0 %967 }
 0xb81   : > { %v969_v57 = vcvt.f32.s32 %v968_v54 }
 0xb83   : > { %v972_v58 = vadd.s32 %v971_v55, %v969_v57  ;;  %v2417_v57 = vld [vmem:[%s2628_s4] ss:$0 sm:$0xff] }
 0xb84   : > { %v983_v59 = vpop.xlane.xlu1 %982 }
 0xb85   : > { %v984_v61 = vcvt.f32.s32 %v983_v59  ;;  %vm988_vm0 = vcmp.eq.s32.totalorder %v2260_v21, %v972_v58 }
 0xb86   : > { %v996_v62 = vsel %vm988_vm0, -3e+30, %v946_v20  ;;  %v1903_v2 = vsel %vm988_vm0, 1.0, %v2153_v52 }
 0xb87   : > { %v987_v63 = vadd.s32 %v986_v60, %v984_v61  ;;  %v998_v0 = vsel %vm697_vm5, %v996_v62, -inf }
 0xb88   : > { %999 = vmax.xlane.f32.xlu0 %v998_v0 }
 0xb89   : > { %vm989_vm13 = vcmp.eq.s32.totalorder %v2260_v21, %v987_v63 }
 0xb8a   : > { %v997_v3 = vsel %vm989_vm13, -3e+30, %v947_v25  ;;  %v1904_v4 = vsel %vm989_vm13, 1.0, %v2153_v52 }
 0xb8b   : > { %v1001_v5 = vsel %vm697_vm5, %v997_v3, -inf  ;;  %v994_v6 = vpack.c.bf16 %v1904_v4, %v1903_v2 }
 0xb8c   : > { %1002 = vmax.xlane.f32.xlu1 %v1001_v5 }
 0xb8d   : > { %995 = vst.msk [vmem:[#allocation2 + $0x28] sm:$0xff] %vm697_vm5, %v994_v6 }
 0xb94   : > { %v1145_v35 = vld [vmem:[#allocation2 + $0x28] sm:$0xff] }
 0xc15   : > { %v1000_v13 = vpop.xlane.xlu0 %999 }
 0xc16   : > { %vm1004_vm14 = vcmp.eq.f32.partialorder %v996_v62, %v1000_v13  ;;  %v2424_v62 = vld [vmem:[%s2629_s5] ss:$0 sm:$0xff] }
 0xc17   : > { %v1006_v14 = vsel %vm1004_vm14, %v2260_v21, 16 }
 0xc18   : > { %v1008_v15 = vsel %vm697_vm5, %v1006_v14, 2147483647 }
 0xc19   : > { %v1003_v16 = vpop.xlane.xlu1 %1002  ;;  %v1010_v17 = vshra.s32 %v1008_v15, 16  ;;  %v1009_v24 = vand.u32 65535, %v1008_v15 }
 0xc1a   : > { %vm1005_vm15 = vcmp.eq.f32.partialorder %v997_v3, %v1003_v16 }
 0xc1b   : > { %v1007_v18 = vsel %vm1005_vm15, %v2260_v21, 16  ;;  %v1012_v19 = vcvt.s32.f32 %v1010_v17  ;;  %v1011_v26 = vcvt.s32.f32 %v1009_v24 }
 0xc1c   : > { %v1023_v20 = vsel %vm697_vm5, %v1007_v18, 2147483647 }
 0xc1d   : > { %1013 = vmin.xlane.f32.xlu0 %v1012_v19  ;;  %v1025_v22 = vshra.s32 %v1023_v20, 16  ;;  %v1024_v27 = vand.u32 65535, %v1023_v20 }
 0xc1f   : > { %v1027_v23 = vcvt.s32.f32 %v1025_v22  ;;  %v1026_v31 = vcvt.s32.f32 %v1024_v27 }
 0xc21   : > { %1028 = vmin.xlane.f32.xlu1 %v1027_v23 }
 0xc33   : > { %1148 = vrot.lane.b32.xlu0 %v1121_v11, %s2155_s20 }
 0xc37   : > { %1781 = vperm.xlu0 %2128, %v2257_v8   ;;  %v1140_v8 = vld [vmem:[#allocation2] sm:$0xff] }
 0xcaa   : > { %v1014_v25 = vpop.xlane.xlu0 %1013 }
 0xcab   : > { %vm1015_vm2 = vcmp.eq.f32.partialorder %v1012_v19, %v1014_v25  ;;  %v1020_v41 = vcvt.f32.s32 %v1014_v25 }
 0xcac   : > { %v1016_v28 = vsel %vm1015_vm2, %v1011_v26, inf }
 0xcad   : > { %1017 = vmin.xlane.f32.xlu1 %v1016_v28  ;;  %v1021_v43 = vshll.u32 %v1020_v41, 16 }
 0xcae   : > { %v1149_v29 = vpop.permute.xlu0 %1148  ;;  %v1029_v30 = vpop.xlane.xlu1 %1028 }
 0xcaf   : > { %2006 = vmatpush3.bf16.msra.mxu0 %v1149_v29  ;;  %2114 = vmatpush3.bf16.msra.mxu1 %v1149_v29  ;;  %vm1030_vm3 = vcmp.eq.f32.partialorder %v1027_v23, %v1029_v30  ;;  %v1035_v44 = vcvt.f32.s32 %v1029_v30 }
 0xcb0   : > { %v1031_v32 = vsel %vm1030_vm3, %v1026_v31, inf  ;;  %2035 = vmatprep.subr.bf16.mxu1 %v2153_v52  ;;  %2071 = vmatprep.subr.bf16.mxu0 %v2153_v52 }
 0xcb1   : > { %1032 = vmin.xlane.f32.xlu1 %v1031_v32  ;;  %v1036_v48 = vshll.u32 %v1035_v44, 16 }
 0xcb2   : > { %2008 = vmatmul.mubr.msk.bf16.vlgmr.msra.gmra.mrb[4].mxu0 %vm697_vm5, %v1140_v8  ;;  %2024 = vmatmul.mubr.msk.bf16.vlgmr.msra.gmra.mrb[4].mxu1 %vm697_vm5, %v1144_v33 }
 0xcb3   : > { %2011 = vmatprep.mubr.msk.bf16.mxu0 %vm2154_vm1, %v2153_v52  ;;  %2027 = vmatprep.mubr.msk.bf16.mxu1 %vm2154_vm1, %v2153_v52 }
 0xcb4   : > { %2036 = vmatpush3.bf16.msra.mxu1 %v2136_v38 }
 0xcb5   : > { %2037 = vmatprep.subr.bf16.mxu1 %v2153_v52 }
 0xcba   : > { %2012 = vmatmul.mubr.msk.bf16.gmra.mrb[8].mxu0 %vm697_vm5, %v1141_v34  ;;  %2028 = vmatmul.mubr.msk.bf16.gmra.mrb[8].mxu1 %vm697_vm5, %v1145_v35 }
 0xcbb   : > { %2015 = vmatprep.mubr.msk.bf16.mxu0 %vm2154_vm1, %v2153_v52  ;;  %2031 = vmatprep.mubr.msk.bf16.mxu1 %vm2154_vm1, %v2153_v52 }
 0xcc2   : > { %2016 = vmatmul.mubr.msk.bf16.gmra.mrb[12].mxu0 %vm697_vm5, %v1142_v36  ;;  %1776 = vperm.xlu1 %2127, %v2250_v1   ;;  %v2137_v1 = vld [vmem:[%s2630_s6 + $0x8] sm:$0xff]  }
 0xcc3   : > { %2019 = vmatprep.mubr.msk.bf16.mxu0 %vm2154_vm1, %v2153_v52  ;;  %2038 = vmatpush3.bf16.msra.mxu1 %v2137_v1 }
 0xcc4   : > { %2039 = vmatprep.subr.bf16.mxu1 %v2153_v52 }
 0xcc7   : > { %2040 = vmatpush3.bf16.msra.mxu1 %v2138_v39 }
 0xcc8   : > { %2041 = vmatprep.subr.bf16.mxu1 %v2153_v52 }
 0xcca   : > { %2020 = vmatmul.mubr.msk.bf16.gmra.mrb[16].mxu0 %vm697_vm5, %v1143_v37 }
 0xccb   : > { %2079 = vmatprep.mubr.msk.bf16.mxu0 %vm2154_vm1, %v2153_v52  ;;  %2042 = vmatpush3.bf16.msra.mxu1 %v2139_v40 }
 0xd3a   : > { %v1018_v42 = vpop.xlane.xlu1 %1017 }
 0xd3b   : > { %v1019_v45 = vcvt.f32.s32 %v1018_v42 }
 0xd3d   : > { %v1022_v46 = vadd.s32 %v1021_v43, %v1019_v45 }
 0xd3e   : > { %v1033_v47 = vpop.xlane.xlu1 %1032 }
 0xd3f   : > { %v1034_v49 = vcvt.f32.s32 %v1033_v47  ;;  %vm1038_vm4 = vcmp.eq.s32.totalorder %v2260_v21, %v1022_v46 }
 0xd40   : > { %v1905_v51 = vsel %vm1038_vm4, 1.0, %v2153_v52 }
 0xd41   : > { %v1037_v50 = vadd.s32 %v1036_v48, %v1034_v49 }
 0xd43   : > { %vm1039_vm6 = vcmp.eq.s32.totalorder %v2260_v21, %v1037_v50 }
 0xd44   : > { %v1906_v53 = vsel %vm1039_vm6, 1.0, %v2153_v52 }
 0xd45   : > { %v1044_v54 = vpack.c.bf16 %v1906_v53, %v1905_v51 }
 0xd47   : > { %1045 = vst.msk [vmem:[#allocation2 + $0x30] sm:$0xff] %vm697_vm5, %v1044_v54 }
 0xd4e   : > { %v1146_v55 = vld [vmem:[#allocation2 + $0x30] sm:$0xff] }
 0xd4f   : > { %2032 = vmatmul.mubr.msk.bf16.gmra.mrb[12].mxu1 %vm697_vm5, %v1146_v55  ;;  %vm1370_vm5 = vcmask 523264  }
 0xd50   : > { %2043 = vmatprep.mubr.msk.bf16.mxu1 %vm2154_vm1, %v2153_v52 }
 0xd85   : > { %v1206_v56 = vpop.f32.mrb[4].mxu0  ;;  %v1238_v21 = vpop.f32.mrb[4].mxu1 }
 0xd86   : > { %v1261_v58 = vadd.f32 %v1206_v56, %v2351_v7  ;;  %v1269_v59 = vadd.f32 %v1238_v21, %v2351_v7  ;;  %v2009_v60 = vpop.f32.mrb[5].mxu0  ;;  %v2025_v61 = vpop.f32.mrb[5].mxu1 }
 0xd87   : > { %v1209_v63 = vpop.f32.mrb[6].mxu0  ;;  %v1241_v0 = vpop.f32.mrb[6].mxu1 }
 0xd88   : > { %v1282_v2 = vmul.f32 %v2417_v57, %v1261_v58  ;;  %v1290_v3 = vmul.f32 %v2417_v57, %v1269_v59  ;;  %v1262_v4 = vadd.f32 %v1209_v63, %v2355_v10  ;;  %v1270_v5 = vadd.f32 %v1241_v0, %v2355_v10  ;;  %v2010_v6 = vpop.f32.mrb[7].mxu0  ;;  %v2026_v11 = vpop.f32.mrb[7].mxu1 }
 0xd8a   : > { %v1303_v13 = vadd.f32 %v2424_v62, %v1282_v2  ;;  %v1311_v14 = vadd.f32 %v2424_v62, %v1290_v3  ;;  %v1283_v15 = vmul.f32 %v2417_v57, %v1262_v4  ;;  %v1291_v16 = vmul.f32 %v2417_v57, %v1270_v5 }
 0xd8c   : > { %v1304_v17 = vadd.f32 %v2424_v62, %v1283_v15  ;;  %v1312_v18 = vadd.f32 %v2424_v62, %v1291_v16  ;;  %v1317_v19 = vmax.f32 %v1303_v13, 0.0  ;;  %v1325_v20 = vmax.f32 %v1311_v14, 0.0 }
 0xd8d   : > { %v1214_v22 = vpop.f32.mrb[8].mxu0  ;;  %v1246_v23 = vpop.f32.mrb[8].mxu1 }
 0xd8e   : > { %v1318_v24 = vmax.f32 %v1304_v17, 0.0  ;;  %v1326_v25 = vmax.f32 %v1312_v18, 0.0  ;;  %v1263_v26 = vadd.f32 %v1214_v22, %v2351_v7  ;;  %v1271_v27 = vadd.f32 %v1246_v23, %v2351_v7  ;;  %v2013_v28 = vpop.f32.mrb[9].mxu0  ;;  %v2029_v29 = vpop.f32.mrb[9].mxu1  ;;  %v2141_v22 = vld [vmem:[%s2633_s9 + $0x8] sm:$0xff]   ;;  %v2142_v23 = vld [vmem:[%s2633_s9 + $0x10] sm:$0xff]  }
 0xd8f   : > { %v1217_v30 = vpop.f32.mrb[10].mxu0  ;;  %v1249_v31 = vpop.f32.mrb[10].mxu1 }
 0xd90   : > { %v1331_v32 = vpack.c.bf16 %v1318_v24, %v1317_v19  ;;  %v1335_v8 = vpack.c.bf16 %v1326_v25, %v1325_v20  ;;  %v1284_v33 = vmul.f32 %v2417_v57, %v1263_v26  ;;  %v1292_v34 = vmul.f32 %v2417_v57, %v1271_v27  ;;  %v2014_v35 = vpop.f32.mrb[11].mxu0  ;;  %v2030_v36 = vpop.f32.mrb[11].mxu1  ;;  %v2140_v20 = vld [vmem:[%s2633_s9] sm:$0xff]   ;;  %v2143_v24 = vld [vmem:[%s2633_s9 + $0x18] sm:$0xff]  }
 0xd91   : > { %v1264_v37 = vadd.f32 %v1217_v30, %v2355_v10  ;;  %v1272_v38 = vadd.f32 %v1249_v31, %v2355_v10  ;;  %2072 = vmatpush3.bf16.msra.mxu0 %v2140_v20 }
 0xd92   : > { %2044 = vmatmul.mubr.msk.bf16.vlgmr.msra.gmra.mrb[16].mxu1 %vm1370_vm5, %v1331_v32  ;;  %v1305_v1 = vadd.f32 %v2424_v62, %v1284_v33  ;;  %v1313_v39 = vadd.f32 %v2424_v62, %v1292_v34  ;;  %2073 = vmatprep.subr.bf16.mxu0 %v2153_v52 }
 0xd93   : > { %v1285_v40 = vmul.f32 %v2417_v57, %v1264_v37  ;;  %v1293_v41 = vmul.f32 %v2417_v57, %v1272_v38  ;;  %2047 = vmatprep.mubr.msk.bf16.mxu1 %vm2154_vm1, %v2153_v52 }
 0xd94   : > { %v1319_v47 = vmax.f32 %v1305_v1, 0.0  ;;  %v1327_v48 = vmax.f32 %v1313_v39, 0.0 }
 0xd95   : > { %v1306_v42 = vadd.f32 %v2424_v62, %v1285_v40  ;;  %v1314_v43 = vadd.f32 %v2424_v62, %v1293_v41  ;;  %v1222_v44 = vpop.f32.mrb[12].mxu0  ;;  %2074 = vmatpush3.bf16.msra.mxu0 %v2141_v22 }
 0xd96   : > { %v1265_v45 = vadd.f32 %v1222_v44, %v2351_v7  ;;  %v2017_v46 = vpop.f32.mrb[13].mxu0  ;;  %2075 = vmatprep.subr.bf16.mxu0 %v2153_v52 }
 0xd97   : > { %v1320_v49 = vmax.f32 %v1306_v42, 0.0  ;;  %v1328_v50 = vmax.f32 %v1314_v43, 0.0  ;;  %v1225_v51 = vpop.f32.mrb[14].mxu0 }
 0xd98   : > { %v1286_v53 = vmul.f32 %v2417_v57, %v1265_v45  ;;  %v1266_v54 = vadd.f32 %v1225_v51, %v2355_v10  ;;  %v2018_v55 = vpop.f32.mrb[15].mxu0 }
 0xd99   : > { %v1332_v56 = vpack.c.bf16 %v1320_v49, %v1319_v47  ;;  %v1336_v21 = vpack.c.bf16 %v1328_v50, %v1327_v48  ;;  %2076 = vmatpush3.bf16.msra.mxu0 %v2142_v23 }
 0xd9a   : > { %v1307_v58 = vadd.f32 %v2424_v62, %v1286_v53  ;;  %v1287_v59 = vmul.f32 %v2417_v57, %v1266_v54  ;;  %2077 = vmatprep.subr.bf16.mxu0 %v2153_v52 }
 0xd9b   : > { %2048 = vmatmul.mubr.msk.bf16.gmra.mrb[20].mxu1 %vm1370_vm5, %v1332_v56 }
 0xd9c   : > { %v1308_v60 = vadd.f32 %v2424_v62, %v1287_v59  ;;  %2051 = vmatprep.mubr.msk.bf16.mxu1 %vm2154_vm1, %v2153_v52  ;;  %v1321_v63 = vmax.f32 %v1307_v58, 0.0 }
 0xd9d   : > { %v1230_v61 = vpop.f32.mrb[16].mxu0  ;;  %2078 = vmatpush3.bf16.msra.mxu0 %v2143_v24 }
 0xd9e   : > { %v1322_v0 = vmax.f32 %v1308_v60, 0.0  ;;  %v1267_v2 = vadd.f32 %v1230_v61, %v2351_v7  ;;  %v2021_v3 = vpop.f32.mrb[17].mxu0 }
 0xd9f   : > { %v1233_v4 = vpop.f32.mrb[18].mxu0 }
 0xda0   : > { %v1333_v5 = vpack.c.bf16 %v1322_v0, %v1321_v63  ;;  %v1288_v6 = vmul.f32 %v2417_v57, %v1267_v2  ;;  %v1268_v11 = vadd.f32 %v1233_v4, %v2355_v10  ;;  %v2022_v13 = vpop.f32.mrb[19].mxu0 }
 0xda2   : > { %v1309_v14 = vadd.f32 %v2424_v62, %v1288_v6  ;;  %v1289_v15 = vmul.f32 %v2417_v57, %v1268_v11 }
 0xda3   : > { %2052 = vmatmul.mubr.msk.bf16.gmra.mrb[24].mxu1 %vm1370_vm5, %v1333_v5 }
 0xda4   : > { %v1310_v16 = vadd.f32 %v2424_v62, %v1289_v15  ;;  %2055 = vmatprep.mubr.msk.bf16.mxu1 %vm2154_vm1, %v2153_v52  ;;  %v1323_v17 = vmax.f32 %v1309_v14, 0.0 }
 0xda6   : > { %v1324_v18 = vmax.f32 %v1310_v16, 0.0 }
 0xda8   : > { %v1334_v19 = vpack.c.bf16 %v1324_v18, %v1323_v17 }
 0xdab   : > { %2056 = vmatmul.mubr.msk.bf16.gmra.mrb[28].mxu1 %vm1370_vm5, %v1334_v19 }
 0xdac   : > { %2059 = vmatprep.mubr.msk.bf16.mxu1 %vm2154_vm1, %v2153_v52 }
 0xdb3   : > { %2060 = vmatmul.mubr.msk.bf16.gmra.mrb[32].mxu1 %vm1370_vm5, %v1335_v8 }
 0xdb4   : > { %2063 = vmatprep.mubr.msk.bf16.mxu1 %vm2154_vm1, %v2153_v52 }
 0xdbb   : > { %2064 = vmatmul.mubr.msk.bf16.gmra.mrb[36].mxu1 %vm1370_vm5, %v1336_v21 }
 0xdbc   : > { %2067 = vmatprep.mubr.msk.bf16.mxu1 %vm2154_vm1, %v2153_v52 }
 0xe22   : > { %v1254_v25 = vpop.f32.mrb[12].mxu1 }
 0xe23   : > { %v1273_v26 = vadd.f32 %v1254_v25, %v2351_v7  ;;  %v2033_v27 = vpop.f32.mrb[13].mxu1  ;;  %v2503_v7 = vld [vmem:[%s2631_s7] ss:$0 sm:$0xff] }
 0xe24   : > { %v1257_v28 = vpop.f32.mrb[14].mxu1 }
 0xe25   : > { %v1294_v29 = vmul.f32 %v2417_v57, %v1273_v26  ;;  %v1274_v30 = vadd.f32 %v1257_v28, %v2355_v10  ;;  %v2034_v31 = vpop.f32.mrb[15].mxu1  ;;  %v2508_v10 = vld [vmem:[%s2632_s8] ss:$0 sm:$0xff] }
 0xe27   : > { %v1315_v32 = vadd.f32 %v2424_v62, %v1294_v29  ;;  %v1295_v8 = vmul.f32 %v2417_v57, %v1274_v30 }
 0xe29   : > { %v1316_v33 = vadd.f32 %v2424_v62, %v1295_v8  ;;  %v1329_v34 = vmax.f32 %v1315_v32, 0.0 }
 0xe2b   : > { %v1330_v35 = vmax.f32 %v1316_v33, 0.0 }
 0xe2d   : > { %v1337_v36 = vpack.c.bf16 %v1330_v35, %v1329_v34 }
 0xe2f   : > { %2068 = vmatmul.mubr.msk.bf16.gmra.mrb[40].mxu1 %vm1370_vm5, %v1337_v36 }
 0xe65   : > { %v1426_v37 = vpop.f32.mrb[16].mxu1 }
 0xe66   : > { %v1488_v57 = vmul.f32 %v2503_v7, %v1426_v37  ;;  %v2045_v38 = vpop.f32.mrb[17].mxu1 }
 0xe67   : > { %v1429_v62 = vpop.f32.mrb[18].mxu1 }
 0xe68   : > { %v1509_v1 = vadd.f32 %v2508_v10, %v1488_v57  ;;  %v1489_v39 = vmul.f32 %v2503_v7, %v1429_v62  ;;  %v2046_v40 = vpop.f32.mrb[19].mxu1 }
 0xe6a   : > { %v1510_v41 = vadd.f32 %v2508_v10, %v1489_v39  ;;  %v1523_v42 = vmax.f32 %v1509_v1, 0.0 }
 0xe6c   : > { %v1524_v43 = vmax.f32 %v1510_v41, 0.0 }
 0xe6e   : > { %v1537_v44 = vpack.c.bf16 %v1524_v43, %v1523_v42  ;;  %v1434_v45 = vpop.f32.mrb[20].mxu1 }
 0xe6f   : > { %v1490_v46 = vmul.f32 %v2503_v7, %v1434_v45  ;;  %v2049_v47 = vpop.f32.mrb[21].mxu1 }
 0xe70   : > { %v1437_v48 = vpop.f32.mrb[22].mxu1  ;;  %2080 = vmatmul.mubr.msk.bf16.vlgmr.msra.gmra.mrb[20].mxu0 %vm1370_vm5, %v1537_v44 }
 0xe71   : > { %v1511_v49 = vadd.f32 %v2508_v10, %v1490_v46  ;;  %v1491_v50 = vmul.f32 %v2503_v7, %v1437_v48  ;;  %v2050_v51 = vpop.f32.mrb[23].mxu1  ;;  %2083 = vmatprep.mubr.msk.bf16.mxu0 %vm2154_vm1, %v2153_v52 }
 0xe73   : > { %v1512_v53 = vadd.f32 %v2508_v10, %v1491_v50  ;;  %v1525_v54 = vmax.f32 %v1511_v49, 0.0 }
 0xe75   : > { %v1526_v55 = vmax.f32 %v1512_v53, 0.0 }
 0xe76   : > { %v1442_v56 = vpop.f32.mrb[24].mxu1 }
 0xe77   : > { %v1538_v21 = vpack.c.bf16 %v1526_v55, %v1525_v54  ;;  %v1492_v58 = vmul.f32 %v2503_v7, %v1442_v56  ;;  %v2053_v59 = vpop.f32.mrb[25].mxu1 }
 0xe78   : > { %v1445_v60 = vpop.f32.mrb[26].mxu1 }
 0xe79   : > { %v1513_v61 = vadd.f32 %v2508_v10, %v1492_v58  ;;  %v1493_v63 = vmul.f32 %v2503_v7, %v1445_v60  ;;  %v2054_v0 = vpop.f32.mrb[27].mxu1  ;;  %2084 = vmatmul.mubr.msk.bf16.gmra.mrb[24].mxu0 %vm1370_vm5, %v1538_v21 }
 0xe7a   : > { %2087 = vmatprep.mubr.msk.bf16.mxu0 %vm2154_vm1, %v2153_v52 }
 0xe7b   : > { %v1514_v2 = vadd.f32 %v2508_v10, %v1493_v63  ;;  %v1527_v3 = vmax.f32 %v1513_v61, 0.0 }
 0xe7d   : > { %v1528_v4 = vmax.f32 %v1514_v2, 0.0 }
 0xe7e   : > { %v1450_v5 = vpop.f32.mrb[28].mxu1 }
 0xe7f   : > { %v1539_v6 = vpack.c.bf16 %v1528_v4, %v1527_v3  ;;  %v1494_v11 = vmul.f32 %v2503_v7, %v1450_v5  ;;  %v2057_v13 = vpop.f32.mrb[29].mxu1 }
 0xe80   : > { %v1453_v14 = vpop.f32.mrb[30].mxu1 }
 0xe81   : > { %v1515_v15 = vadd.f32 %v2508_v10, %v1494_v11  ;;  %v1495_v16 = vmul.f32 %v2503_v7, %v1453_v14  ;;  %v2058_v17 = vpop.f32.mrb[31].mxu1  ;;  %2088 = vmatmul.mubr.msk.bf16.gmra.mrb[28].mxu0 %vm1370_vm5, %v1539_v6 }
 0xe82   : > { %2091 = vmatprep.mubr.msk.bf16.mxu0 %vm2154_vm1, %v2153_v52 }
 0xe83   : > { %v1516_v18 = vadd.f32 %v2508_v10, %v1495_v16  ;;  %v1529_v19 = vmax.f32 %v1515_v15, 0.0 }
 0xe85   : > { %v1530_v20 = vmax.f32 %v1516_v18, 0.0 }
 0xe86   : > { %v1458_v22 = vpop.f32.mrb[32].mxu1 }
 0xe87   : > { %v1540_v23 = vpack.c.bf16 %v1530_v20, %v1529_v19  ;;  %v1496_v24 = vmul.f32 %v2503_v7, %v1458_v22  ;;  %v2061_v25 = vpop.f32.mrb[33].mxu1 }
 0xe88   : > { %v1461_v26 = vpop.f32.mrb[34].mxu1 }
 0xe89   : > { %v1517_v27 = vadd.f32 %v2508_v10, %v1496_v24  ;;  %v1497_v28 = vmul.f32 %v2503_v7, %v1461_v26  ;;  %v2062_v29 = vpop.f32.mrb[35].mxu1  ;;  %2092 = vmatmul.mubr.msk.bf16.gmra.mrb[32].mxu0 %vm1370_vm5, %v1540_v23 }
 0xe8a   : > { %2095 = vmatprep.mubr.msk.bf16.mxu0 %vm2154_vm1, %v2153_v52 }
 0xe8b   : > { %v1518_v30 = vadd.f32 %v2508_v10, %v1497_v28  ;;  %v1531_v31 = vmax.f32 %v1517_v27, 0.0 }
 0xe8d   : > { %v1532_v32 = vmax.f32 %v1518_v30, 0.0 }
 0xe8e   : > { %v1466_v8 = vpop.f32.mrb[36].mxu1 }
 0xe8f   : > { %v1541_v33 = vpack.c.bf16 %v1532_v32, %v1531_v31  ;;  %v1498_v34 = vmul.f32 %v2503_v7, %v1466_v8  ;;  %v2065_v35 = vpop.f32.mrb[37].mxu1 }
 0xe90   : > { %v1469_v36 = vpop.f32.mrb[38].mxu1 }
 0xe91   : > { %v1519_v37 = vadd.f32 %v2508_v10, %v1498_v34  ;;  %v1499_v57 = vmul.f32 %v2503_v7, %v1469_v36  ;;  %v2066_v38 = vpop.f32.mrb[39].mxu1  ;;  %2096 = vmatmul.mubr.msk.bf16.gmra.mrb[36].mxu0 %vm1370_vm5, %v1541_v33 }
 0xe92   : > { %2099 = vmatprep.mubr.msk.bf16.mxu0 %vm2154_vm1, %v2153_v52 }
 0xe93   : > { %v1520_v62 = vadd.f32 %v2508_v10, %v1499_v57  ;;  %v1533_v1 = vmax.f32 %v1519_v37, 0.0 }
 0xe95   : > { %v1534_v39 = vmax.f32 %v1520_v62, 0.0 }
 0xe97   : > { %v1542_v40 = vpack.c.bf16 %v1534_v39, %v1533_v1 }
 0xe99   : > { %2100 = vmatmul.mubr.msk.bf16.gmra.mrb[40].mxu0 %vm1370_vm5, %v1542_v40 }
 0xe9a   : > { %2103 = vmatprep.mubr.msk.bf16.mxu0 %vm2154_vm1, %v2153_v52  ;;  %v2560_v52 = vld [vmem:[%s2634_s10] ss:$0 sm:$0xff] }
 0xf02   : > { %v1474_v41 = vpop.f32.mrb[40].mxu1 }
 0xf03   : > { %v1500_v42 = vmul.f32 %v2503_v7, %v1474_v41  ;;  %v2069_v43 = vpop.f32.mrb[41].mxu1 }
 0xf04   : > { %v1477_v44 = vpop.f32.mrb[42].mxu1 }
 0xf05   : > { %v1521_v45 = vadd.f32 %v2508_v10, %v1500_v42  ;;  %v1501_v46 = vmul.f32 %v2503_v7, %v1477_v44  ;;  %v2070_v47 = vpop.f32.mrb[43].mxu1  ;;  %v2566_v7 = vld [vmem:[%s2635_s11] ss:$0 sm:$0xff] }
 0xf07   : > { %v1522_v48 = vadd.f32 %v2508_v10, %v1501_v46  ;;  %v1535_v49 = vmax.f32 %v1521_v45, 0.0 }
 0xf09   : > { %v1536_v50 = vmax.f32 %v1522_v48, 0.0 }
 0xf0b   : > { %v1543_v51 = vpack.c.bf16 %v1536_v50, %v1535_v49 }
 0xf0d   : > { %2104 = vmatmul.mubr.msk.bf16.gmra.mrb[44].mxu0 %vm1370_vm5, %v1543_v51 }
 0xf43   : > { %v1631_v53 = vpop.f32.mrb[20].mxu0 }
 0xf44   : > { %v2081_v54 = vpop.f32.mrb[21].mxu0  ;;  %v1693_v21 = vmul.f32 %v2560_v52, %v1631_v53 }
 0xf45   : > { %v1634_v55 = vpop.f32.mrb[22].mxu0 }
 0xf46   : > { %v2082_v56 = vpop.f32.mrb[23].mxu0  ;;  %v1694_v10 = vmul.f32 %v2560_v52, %v1634_v55  ;;  %v1714_v58 = vadd.f32 %v2566_v7, %v1693_v21 }
 0xf48   : > { %v1715_v60 = vadd.f32 %v2566_v7, %v1694_v10  ;;  %v1728_v2 = vmax.f32 %v1714_v58, 0.0 }
 0xf4a   : > { %v1729_v6 = vmax.f32 %v1715_v60, 0.0  ;;  %v1742_v14 = vsel %vm1370_vm5, %v1728_v2, 0.0 }
 0xf4c   : > { %v1639_v59 = vpop.f32.mrb[24].mxu0  ;;  %v1755_v19 = vsel %vm1370_vm5, %v1729_v6, 0.0 }
 0xf4d   : > { %v1695_v61 = vmul.f32 %v2560_v52, %v1639_v59  ;;  %v2085_v63 = vpop.f32.mrb[25].mxu0 }
 0xf4e   : > { %v1642_v0 = vpop.f32.mrb[26].mxu0 }
 0xf4f   : > { %v1716_v3 = vadd.f32 %v2566_v7, %v1695_v61  ;;  %v1696_v4 = vmul.f32 %v2560_v52, %v1642_v0  ;;  %v2086_v5 = vpop.f32.mrb[27].mxu0 }
 0xf51   : > { %v1730_v11 = vmax.f32 %v1716_v3, 0.0  ;;  %v1717_v13 = vadd.f32 %v2566_v7, %v1696_v4 }
 0xf53   : > { %v1743_v15 = vsel %vm1370_vm5, %v1730_v11, 0.0  ;;  %v1731_v16 = vmax.f32 %v1717_v13, 0.0 }
 0xf54   : > { %v1744_v17 = vadd.f32 %v1743_v15, %v1742_v14  ;;  %v1647_v18 = vpop.f32.mrb[28].mxu0 }
 0xf55   : > { %v1756_v20 = vsel %vm1370_vm5, %v1731_v16, 0.0  ;;  %v1697_v22 = vmul.f32 %v2560_v52, %v1647_v18  ;;  %v2089_v23 = vpop.f32.mrb[29].mxu0 }
 0xf56   : > { %v1757_v24 = vadd.f32 %v1756_v20, %v1755_v19  ;;  %v1650_v25 = vpop.f32.mrb[30].mxu0 }
 0xf57   : > { %v1718_v26 = vadd.f32 %v2566_v7, %v1697_v22  ;;  %v1698_v27 = vmul.f32 %v2560_v52, %v1650_v25  ;;  %v2090_v28 = vpop.f32.mrb[31].mxu0  ;;  %v1913_v22 = vld [vmem:[%s2636_s12] ss:$0 sm:$0xff] }
 0xf58   : > { %v1129_v28 = vmul.f32 %v1913_v22, %v2353_v9  ;;  %v1777_v9 = vpop.permute.xlu1 %1776 }
 0xf59   : > { %v1732_v29 = vmax.f32 %v1718_v26, 0.0  ;;  %v1719_v30 = vadd.f32 %v2566_v7, %v1698_v27 }
 0xf5b   : > { %v1745_v31 = vsel %vm1370_vm5, %v1732_v29, 0.0  ;;  %v1733_v32 = vmax.f32 %v1719_v30, 0.0  ;;  %v1914_v29 = vld [vmem:[%s2637_s13] ss:$0 sm:$0xff] }
 0xf5c   : > { %v1746_v8 = vadd.f32 %v1745_v31, %v1744_v17  ;;  %v1655_v33 = vpop.f32.mrb[32].mxu0 }
 0xf5d   : > { %v1758_v34 = vsel %vm1370_vm5, %v1733_v32, 0.0  ;;  %v1699_v35 = vmul.f32 %v2560_v52, %v1655_v33  ;;  %v2093_v36 = vpop.f32.mrb[33].mxu0  ;;  %v1130_v32 = vmul.f32 %v1913_v22, %v2359_v12 }
 0xf5e   : > { %v1759_v37 = vadd.f32 %v1758_v34, %v1757_v24  ;;  %v1658_v57 = vpop.f32.mrb[34].mxu0 }
 0xf5f   : > { %v1720_v38 = vadd.f32 %v2566_v7, %v1699_v35  ;;  %v1700_v62 = vmul.f32 %v2560_v52, %v1658_v57  ;;  %v2094_v1 = vpop.f32.mrb[35].mxu0  ;;  %v1139_v36 = vadd.f32 %v1914_v29, %v1130_v32 }
 0xf61   : > { %v1734_v39 = vmax.f32 %v1720_v38, 0.0  ;;  %v1721_v40 = vadd.f32 %v2566_v7, %v1700_v62  ;;  %v1782_v62 = vpop.permute.xlu0 %1781 }
 0xf63   : > { %v1747_v41 = vsel %vm1370_vm5, %v1734_v39, 0.0  ;;  %v1735_v42 = vmax.f32 %v1721_v40, 0.0 }
 0xf64   : > { %v1748_v43 = vadd.f32 %v1747_v41, %v1746_v8  ;;  %v1663_v44 = vpop.f32.mrb[36].mxu0 }
 0xf65   : > { %v1760_v45 = vsel %vm1370_vm5, %v1735_v42, 0.0  ;;  %v1701_v46 = vmul.f32 %v2560_v52, %v1663_v44  ;;  %v2097_v47 = vpop.f32.mrb[37].mxu0 }
 0xf66   : > { %v1761_v48 = vadd.f32 %v1760_v45, %v1759_v37  ;;  %v1666_v49 = vpop.f32.mrb[38].mxu0 }
 0xf67   : > { %v1722_v50 = vadd.f32 %v2566_v7, %v1701_v46  ;;  %v1702_v51 = vmul.f32 %v2560_v52, %v1666_v49  ;;  %v2098_v53 = vpop.f32.mrb[39].mxu0 }
 0xf69   : > { %v1736_v54 = vmax.f32 %v1722_v50, 0.0  ;;  %v1723_v55 = vadd.f32 %v2566_v7, %v1702_v51 }
 0xf6b   : > { %v1749_v56 = vsel %vm1370_vm5, %v1736_v54, 0.0  ;;  %v1737_v21 = vmax.f32 %v1723_v55, 0.0 }
 0xf6c   : > { %v1750_v10 = vadd.f32 %v1749_v56, %v1748_v43  ;;  %v1671_v58 = vpop.f32.mrb[40].mxu0 }
 0xf6d   : > { %v1762_v59 = vsel %vm1370_vm5, %v1737_v21, 0.0  ;;  %v1703_v60 = vmul.f32 %v2560_v52, %v1671_v58  ;;  %v2101_v61 = vpop.f32.mrb[41].mxu0 }
 0xf6e   : > { %v1763_v63 = vadd.f32 %v1762_v59, %v1761_v48  ;;  %v1674_v0 = vpop.f32.mrb[42].mxu0 }
 0xf6f   : > { %v1724_v2 = vadd.f32 %v2566_v7, %v1703_v60  ;;  %v1704_v3 = vmul.f32 %v2560_v52, %v1674_v0  ;;  %v2102_v4 = vpop.f32.mrb[43].mxu0 }
 0xf71   : > { %v1738_v5 = vmax.f32 %v1724_v2, 0.0  ;;  %v1725_v6 = vadd.f32 %v2566_v7, %v1704_v3 }
 0xf73   : > { %v1751_v11 = vsel %vm1370_vm5, %v1738_v5, 0.0  ;;  %v1739_v13 = vmax.f32 %v1725_v6, 0.0 }
 0xf74   : > { %v1752_v14 = vadd.f32 %v1751_v11, %v1750_v10 }
 0xf75   : > { %v1764_v15 = vsel %vm1370_vm5, %v1739_v13, 0.0 }
 0xf76   : > { %v1765_v16 = vadd.f32 %v1764_v15, %v1763_v63 }
 0xfe0   : > { %v1679_v17 = vpop.f32.mrb[44].mxu0 }
 0xfe1   : > { %v1705_v18 = vmul.f32 %v2560_v52, %v1679_v17  ;;  %v2105_v19 = vpop.f32.mrb[45].mxu0 }
 0xfe2   : > { %v1682_v20 = vpop.f32.mrb[46].mxu0 }
 0xfe3   : > { %v1726_v23 = vadd.f32 %v2566_v7, %v1705_v18  ;;  %v1706_v24 = vmul.f32 %v2560_v52, %v1682_v20  ;;  %v2106_v25 = vpop.f32.mrb[47].mxu0  ;;  %v1138_v52 = vadd.f32 %v1914_v29, %v1129_v28 }
 0xfe5   : > { %v1740_v26 = vmax.f32 %v1726_v23, 0.0  ;;  %v1727_v27 = vadd.f32 %v2566_v7, %v1706_v24 }
 0xfe7   : > { %v1753_v30 = vsel %vm1370_vm5, %v1740_v26, 0.0  ;;  %v1741_v31 = vmax.f32 %v1727_v27, 0.0 }
 0xfe8   : > { %v1754_v8 = vadd.f32 %v1753_v30, %v1752_v14 }
 0xfe9   : > { %v1766_v33 = vsel %vm1370_vm5, %v1741_v31, 0.0 }
 0xfea   : > { %v1768_v34 = vmul.f32 0.14285715, %v1754_v8  ;;  %v1767_v35 = vadd.f32 %v1766_v33, %v1765_v16 }
 0xfec   : > { %v1770_v7 = vadd.f32 %v1768_v34, %v1138_v52  ;;  %v1769_v37 = vmul.f32 0.14285715, %v1767_v35 }
 0xfee   : > { %v1772_v57 = vmax.f32 %v1770_v7, 0.0  ;;  %v1771_v38 = vadd.f32 %v1769_v37, %v1139_v36 }
 0xff0   : > { %v1784_v1 = vmul.f32 %v1777_v9, %v1772_v57  ;;  %v1773_v39 = vmax.f32 %v1771_v38, 0.0 }
 0xff2   : > { %v1958_v12 = vpack.c.bf16 %v1784_v1, %v1784_v1  ;;  %v1785_v40 = vmul.f32 %v1782_v62, %v1773_v39 }
 0xff4   : > { %1795 = vst.msk [vmem:[%s507_s27] sm:$0xf] %vm1794_vm7, %v1958_v12  ;;  %v1959_v41 = vpack.c.bf16 %v1785_v40, %v1785_v40 }
 0xff6   : > { %1796 = vst.msk [vmem:[%s507_s27 + $0x4] sm:$0xf] %vm1794_vm7, %v1959_v41 }
 0xff7 PF: > { %s24_s29 = sadd.s32 1, %s2150_s29  }
 0xff8   : > { %p21_p4 = scmp.ge.s32.totalorder %s24_s29, 4  }
 0xffa   :  { %23 = sbr.rel (!%p21_p4) target bundleno = 1 (0x1), region = 112 }

</bundles_post_ra>
